<compile_context>
chip_gen: v5e
topology: v5e:2x2
jax: 0.10.0
libtpu: 0.0.40
codegen_flags: <defaults>
</compile_context>

<pallas_src>
import functools
import math

import jax
import jax.numpy as jnp
from jax import lax
from jax.experimental import pallas as pl
from jax.experimental.pallas import tpu as pltpu


# ----------------------------------------------------------------------------
# small math helpers (usable both in-kernel and in the pure-JAX reference)
# ----------------------------------------------------------------------------
def _gelu_tanh(x):
    # TODO(synk): torch.nn.functional.gelu defaults to the exact erf form; the tanh
    # approximation is used here (reference below matches it) since erf has no
    # guaranteed Mosaic lowering.
    c = math.sqrt(2.0 / math.pi)
    return 0.5 * x * (1.0 + jnp.tanh(c * (x + 0.044715 * x * x * x)))


def _layer_norm(x, g, b, eps=1e-5):
    mu = jnp.mean(x, axis=-1, keepdims=True)
    xc = x - mu
    var = jnp.mean(xc * xc, axis=-1, keepdims=True)
    return xc * lax.rsqrt(var + eps) * g + b


def _tpu_kind():
    try:
        return jax.devices()[0].device_kind.lower()
    except Exception:  # pragma: no cover
        return "unknown"


def _pick_block_batch(N, T, kind):
    """Generation-aware block batch Nb (samples per grid step).

    v7x  : 2 TensorCores -> prefer >= 4 grid steps (>= 2 per core), 128-row blocks.
    v6e  : single TC, 256x256 MXU -> fill up to 256 rows, no multi-step requirement.
    v5e  : single TC, 128x128 MXU -> 128-row blocks, no multi-step requirement.
    Nb is capped at 8 to bound the unrolled per-sample loop (vreg pressure / trace time).
    """
    if "v7" in kind or "7x" in kind:
        target_rows, want_steps = 128, 4
    elif "v6" in kind:
        target_rows, want_steps = 256, 1
    else:  # v5e / unknown
        target_rows, want_steps = 128, 1
    max_nb = 8
    for steps in (want_steps, 2, 1):
        cands = [d for d in range(1, N + 1)
                 if N % d == 0 and d * T <= target_rows and d <= max_nb and N // d >= steps]
        if cands:
            return max(cands)
    return 1


# ----------------------------------------------------------------------------
# Pallas kernel: one grid step == Nb batch samples.
# ----------------------------------------------------------------------------
def _box_transformer_kernel(
    # inputs
    emb_ref, kbias_ref, posen_ref, rel_ref,
    wqkv_ref, bqkv_ref, poskbd_ref, posqbd_ref,
    g1_ref, be1_ref, w1_ref, b1_ref, w2_ref, b2_ref, g2_ref, be2_ref,
    # outputs
    out_emb_ref, out_attn_ref,
    *, Nb, T, D, H, C, Hc, P, resw1, resw2,
):
    f32, bf16 = jnp.float32, jnp.bfloat16
    Hd = C * Hc            # attention head size
    Dv = D // H            # value head size (do_pooling=True)

    x = emb_ref[...]                                                       # (Nb*T, D) f32
    xb = x.astype(bf16)

    # ---- one fused QKV matmul (bf16 operands, f32 accumulate); 1/sqrt(Hd) is
    #      already folded into the q columns/bias in the wrapper ----
    qkv = jnp.dot(xb, wqkv_ref[...], preferred_element_type=f32) + bqkv_ref[...]
    q = qkv[:, :H * Hd]                    # (Nb*T, H*Hd)  head-major (h, c, d) columns
    k = qkv[:, H * Hd:2 * H * Hd]
    v = qkv[:, 2 * H * Hd:]                # (Nb*T, D)

    # ---- DeBERTa position tables: two block-diagonal matmuls cover ALL (h, c) ----
    qb = q.astype(bf16)
    kb = k.astype(bf16)
    # qp[row, g*P + p]  = q[row, g-block] . posK[g][p]      (g = h*C + c)   -> c2p side
    qp = jnp.dot(qb, poskbd_ref[...], preferred_element_type=f32)           # (Nb*T, H*C*P)
    # kpT[g*P + p, row] = posQ[g][p] . k[row, g-block]  (keys on lane axis) -> p2c side
    kpT = lax.dot_general(posqbd_ref[...], kb, (((1,), (1,)), ((), ())),
                          preferred_element_type=f32)                       # (H*C*P, Nb*T)

    updates = []
    for b in range(Nb):
        r0 = b * T
        q_b, k_b, v_b = q[r0:r0 + T], k[r0:r0 + T], v[r0:r0 + T]
        kbias = kbias_ref[b]              # (1, T) additive key mask: 0.0 or -1e30
        pen = posen_ref[b]                # (T, T) 1.0 = position terms enabled

        # --- c2p + p2c via in-kernel P-wide select gather (no HBM one-hot):
        #     pos[h][i,j] += qp[i, r[i,j]] + kpT[r[i,j], j]; compare hoisted over heads.
        pos = [jnp.zeros((T, T), f32) for _ in range(H)]
        for c in range(C):
            r = rel_ref[b, c]             # (T, T) int32 relative-position bucket
            for p in range(P):
                sel = r == p
                for h in range(H):
                    g = h * C + c
                    col = qp[r0:r0 + T, g * P + p:g * P + p + 1]            # (T, 1)
                    row = kpT[g * P + p:g * P + p + 1, r0:r0 + T]           # (1, T)
                    pos[h] = pos[h] + jnp.where(sel, col + row, 0.0)

        upd_heads = []
        for h in range(H):
            # c2c: one dot per head, K = Hd (both coordinates contracted at once)
            qh = q_b[:, h * Hd:(h + 1) * Hd].astype(bf16)
            kh = k_b[:, h * Hd:(h + 1) * Hd].astype(bf16)
            c2c = lax.dot_general(qh, kh, (((1,), (1,)), ((), ())),
                                  preferred_element_type=f32)               # (T, T)
            logits = c2c + pen * pos[h]          # scale already folded into q / posQ
            out_attn_ref[b, h] = logits          # lane dim = keys (T)

            # masked softmax (additive key bias) + per-head value pooling (f32, tiny K)
            masked = logits + kbias
            m = jnp.max(masked, axis=-1, keepdims=True)
            e = jnp.exp(masked - m)
            s = jnp.sum(e, axis=-1, keepdims=True)
            w = e * pl.reciprocal(s, approx=True)
            upd_heads.append(jnp.dot(w, v_b[:, h * Dv:(h + 1) * Dv],
                                     preferred_element_type=f32))           # (T, Dv)

        updates.append(jnp.concatenate(upd_heads, axis=1))                  # (T, D)

    update = updates[0] if Nb == 1 else jnp.concatenate(updates, axis=0)    # (Nb*T, D)

    # ---- residual gate 1 + LN1 + FFN (bf16 MXU operands) + residual gate 2 + LN2 ----
    h1 = x + resw1 * update
    ln1 = _layer_norm(h1, g1_ref[...], be1_ref[...])
    mid = _gelu_tanh(jnp.dot(ln1.astype(bf16), w1_ref[...],
                             preferred_element_type=f32) + b1_ref[...])
    ff = jnp.dot(mid.astype(bf16), w2_ref[...], preferred_element_type=f32) + b2_ref[...]
    h2 = ln1 + resw2 * ff
    out_emb_ref[...] = _layer_norm(h2, g2_ref[...], be2_ref[...])


# ----------------------------------------------------------------------------
# wrapper: parameter re-layout (tiny one-time glue, pure JAX) + pallas_call
# ----------------------------------------------------------------------------
def box_transformer_layer(embeds, mask, relative_positions, no_position_mask, params,
                          *, num_heads=2, n_coordinates=2):
    N, T, D = embeds.shape
    H, C = num_heads, n_coordinates
    Hd = params["w_q"].shape[1] // H
    Hc = Hd // C
    P = params["position_embedding"].shape[0]
    f32, bf16 = jnp.float32, jnp.bfloat16
    inv_sqrt = 1.0 / math.sqrt(float(Hd))

    # fused QKV weight/bias; 1/sqrt(Hd) folded into the q columns (c2c & c2p pick the
    # scale up via q, p2c via the posQ table below)
    wqkv = jnp.concatenate(
        [params["w_q"] * inv_sqrt, params["w_k"], params["w_v"]], axis=1).astype(bf16)
    bqkv = jnp.concatenate(
        [params["b_q"] * inv_sqrt, params["b_k"], params["b_v"]]).reshape(1, -1).astype(f32)

    # pre-projected position tables, block-diagonal over g = h*C + c so one matmul in
    # the kernel covers every (head, coordinate)
    pos_emb = params["position_embedding"]
    pk = (pos_emb @ params["w_pk"] + params["b_pk"]).reshape(P, H * C, Hc)
    pq = ((pos_emb @ params["w_pq"] + params["b_pq"]) * inv_sqrt).reshape(P, H * C, Hc)
    posk_bd = jax.scipy.linalg.block_diag(
        *[pk[:, g, :].T for g in range(H * C)]).astype(bf16)    # (H*C*Hc, H*C*P)
    posq_bd = jax.scipy.linalg.block_diag(
        *[pq[:, g, :] for g in range(H * C)]).astype(bf16)      # (H*C*P, H*C*Hc)

    key_bias = (1.0 - mask.astype(f32)).reshape(N, 1, T) * (-1e30)          # additive
    if no_position_mask is None:
        pos_en = jnp.ones((N, T, T), f32)
    else:
        pos_en = 1.0 - no_position_mask.astype(f32)
    rel = relative_positions.astype(jnp.int32).transpose(0, 3, 1, 2)        # (N, C, T, T)

    kind = _tpu_kind()
    Nb = _pick_block_batch(N, T, kind)
    assert (Nb * T) % 8 == 0 or Nb == N, "row block must satisfy the (8,128) sublane rule"
    emb_flat = embeds.reshape(N * T, D).astype(f32)

    r2 = lambda a: a.reshape(1, -1).astype(f32)
    operands = [
        emb_flat, key_bias, pos_en, rel,
        wqkv, bqkv, posk_bd, posq_bd,
        r2(params["ln1_g"]), r2(params["ln1_b"]),
        params["w_1"].astype(bf16), r2(params["b_1"]),
        params["w_2"].astype(bf16), r2(params["b_2"]),
        r2(params["ln2_g"]), r2(params["ln2_b"]),
    ]

    def full_spec(shape):
        nd = len(shape)
        return pl.BlockSpec(shape, lambda n, _nd=nd: (0,) * _nd)

    in_specs = [
        pl.BlockSpec((Nb * T, D), lambda n: (n, 0)),            # embeds (flattened rows)
        pl.BlockSpec((Nb, 1, T), lambda n: (n, 0, 0)),          # additive key mask
        pl.BlockSpec((Nb, T, T), lambda n: (n, 0, 0)),          # position-enable mask
        pl.BlockSpec((Nb, C, T, T), lambda n: (n, 0, 0, 0)),    # int32 relative positions
    ] + [full_spec(op.shape) for op in operands[4:]]            # weights: resident

    # VMEM budget: 64 MiB physical per TC on v7x, 128 MiB on v5e/v6e.
    if "v5" in kind or "v6" in kind:
        vmem_limit = 96 * 1024 * 1024
    else:
        vmem_limit = 48 * 1024 * 1024

    kernel = functools.partial(
        _box_transformer_kernel,
        Nb=Nb, T=T, D=D, H=H, C=C, Hc=Hc, P=P,
        resw1=float(params["resweight"]), resw2=float(params["resweight2"]),
    )

    out_emb_flat, attn_nhtt = pl.pallas_call(
        kernel,
        out_shape=(jax.ShapeDtypeStruct((N * T, D), f32),
                   jax.ShapeDtypeStruct((N, H, T, T), f32)),
        grid_spec=pltpu.PrefetchScalarGridSpec(
            num_scalar_prefetch=0,
            grid=(N // Nb,),
            in_specs=in_specs,
            out_specs=[pl.BlockSpec((Nb * T, D), lambda n: (n, 0)),
                       pl.BlockSpec((Nb, H, T, T), lambda n: (n, 0, 0, 0))],
        ),
        compiler_params=pltpu.CompilerParams(
            dimension_semantics=("parallel",),
            vmem_limit_bytes=vmem_limit,
        ),
    )(*operands)

    out_emb = out_emb_flat.reshape(N, T, D)
    # TODO(synk): the module interface mandates (N, T, T, H); the kernel stores logits
    # lane-dense (keys on the lane axis), so the one remaining relayout stays here.
    return out_emb, attn_nhtt.transpose(0, 2, 3, 1)


# ----------------------------------------------------------------------------
# pure-JAX reference (same semantics) used for verification
# ----------------------------------------------------------------------------
def box_transformer_layer_ref(embeds, mask, relative_positions, no_position_mask, params,
                              *, num_heads=2, n_coordinates=2):
    N, T, D = embeds.shape
    H, C = num_heads, n_coordinates
    Hd = params["w_q"].shape[1] // H
    Hc = Hd // C
    P = params["position_embedding"].shape[0]

    q = (embeds @ params["w_q"] + params["b_q"]).reshape(N, T, H, C, Hc)
    k = (embeds @ params["w_k"] + params["b_k"]).reshape(N, T, H, C, Hc)
    v = (embeds @ params["w_v"] + params["b_v"]).reshape(N, T, H, D // H)

    pos_emb = params["position_embedding"]
    posk = (pos_emb @ params["w_pk"] + params["b_pk"]).reshape(P, H, C, Hc).transpose(2, 0, 1, 3)
    posq = (pos_emb @ params["w_pq"] + params["b_pq"]).reshape(P, H, C, Hc).transpose(2, 0, 1, 3)

    c2c = jnp.einsum("nihcd,njhcd->nijh", q, k)
    cidx = jnp.arange(C)[None, None, None, :]
    gk = posk[cidx, relative_positions]              # (N,T,T,C,H,Hc)
    gq = posq[cidx, relative_positions]
    c2p = jnp.einsum("nijchd,nihcd->nijh", gk, q)
    p2c = jnp.einsum("nijchd,njhcd->nijh", gq, k)

    if no_position_mask is None:
        pos_en = jnp.ones((N, T, T), jnp.float32)
    else:
        pos_en = 1.0 - no_position_mask.astype(jnp.float32)
    logits = (c2c + pos_en[..., None] * (c2p + p2c)) / math.sqrt(float(Hd))

    masked = jnp.where(mask[:, None, :, None], logits, -1e30)
    w = jax.nn.softmax(masked, axis=2)
    update = jnp.einsum("nijh,njhd->nihd", w, v).reshape(N, T, D)

    def ln(x, g, b, eps=1e-5):
        mu = x.mean(-1, keepdims=True)
        var = ((x - mu) ** 2).mean(-1, keepdims=True)
        return (x - mu) / jnp.sqrt(var + eps) * g + b

    h1 = embeds + params["resweight"] * update
    ln1 = ln(h1, params["ln1_g"], params["ln1_b"])
    ff = _gelu_tanh(ln1 @ params["w_1"] + params["b_1"]) @ params["w_2"] + params["b_2"]
    h2 = ln1 + params["resweight2"] * ff
    return ln(h2, params["ln2_g"], params["ln2_b"]), logits


# ----------------------------------------------------------------------------
# deterministic parameter init (synthetic; no checkpoint loading)
# ----------------------------------------------------------------------------
def init_params(key, D, H, Hd, P):
    ks = jax.random.split(key, 9)
    s = 1.0 / math.sqrt(D)
    lin = lambda kk, din, dout: (jax.random.normal(kk, (din, dout), jnp.float32) * s)
    small = lambda kk, n: jax.random.normal(kk, (n,), jnp.float32) * 0.01
    kb = jax.random.split(ks[8], 8)
    return dict(
        w_q=lin(ks[0], D, H * Hd), b_q=small(kb[0], H * Hd),
        w_k=lin(ks[1], D, H * Hd), b_k=small(kb[1], H * Hd),
        w_v=lin(ks[2], D, D),      b_v=small(kb[2], D),
        w_pk=lin(ks[3], D, H * Hd), b_pk=small(kb[3], H * Hd),
        w_pq=lin(ks[4], D, H * Hd), b_pq=small(kb[4], H * Hd),
        position_embedding=jax.random.normal(ks[5], (P, D), jnp.float32) * 0.1,
        ln1_g=jnp.ones((D,), jnp.float32), ln1_b=jnp.zeros((D,), jnp.float32),
        ln2_g=jnp.ones((D,), jnp.float32), ln2_b=jnp.zeros((D,), jnp.float32),
        w_1=lin(ks[6], D, 2 * D), b_1=small(kb[5], 2 * D),
        w_2=lin(ks[7], 2 * D, D), b_2=small(kb[6], D),
        # residual gate weights (module default init is 0.0 == identity layer;
        # use 0.5 here so the whole path is numerically exercised)
        resweight=0.5, resweight2=0.5,
    )


if __name__ == "__main__":
    N, T, D, H, C, P = 2, 8, 32, 2, 2, 16
    Hd = D // H

    key = jax.random.PRNGKey(0)
    k_emb, k_rel, k_nop, k_par = jax.random.split(key, 4)

    embeds = jax.random.normal(k_emb, (N, T, D), jnp.float32)
    mask = jnp.ones((N, T), bool).at[0, T - 2:].set(False)           # sample 0 has padding
    relative_positions = jax.random.randint(k_rel, (N, T, T, C), 0, P)
    no_position_mask = jax.random.bernoulli(k_nop, 0.2, (N, T, T))
    params = init_params(k_par, D, H, Hd, P)

    out, attn = box_transformer_layer(embeds, mask, relative_positions,
                                      no_position_mask, params,
                                      num_heads=H, n_coordinates=C)
    out, attn = jax.block_until_ready((out, attn))

    ref_out, ref_attn = box_transformer_layer_ref(embeds, mask, relative_positions,
                                                  no_position_mask, params,
                                                  num_heads=H, n_coordinates=C)

    assert out.shape == (N, T, D) and attn.shape == (N, T, T, H)
    # tolerances are loosened because the MXU operands are bf16 (f32 accumulation)
    # and the softmax uses pl.reciprocal(approx=True); the f32 reference is exact.
    assert jnp.allclose(attn, ref_attn, atol=4e-2, rtol=4e-2), \
        float(jnp.max(jnp.abs(attn - ref_attn)))
    assert jnp.allclose(out, ref_out, atol=6e-2, rtol=6e-2), \
        float(jnp.max(jnp.abs(out - ref_out)))
    print("KERNEL_OK")
</pallas_src>

<mosaic_0001>
module attributes {stable_mosaic.version = 11 : i64} {
  func.func @_box_transformer_kernel(%arg0: i32, %arg1: memref<16x32xf32, #tpu.memory_space<vmem>>, %arg2: memref<2x1x8xf32, #tpu.memory_space<vmem>>, %arg3: memref<2x8x8xf32, #tpu.memory_space<vmem>>, %arg4: memref<2x2x8x8xi32, #tpu.memory_space<vmem>>, %arg5: memref<32x96xbf16, #tpu.memory_space<vmem>>, %arg6: memref<1x96xf32, #tpu.memory_space<vmem>>, %arg7: memref<32x64xbf16, #tpu.memory_space<vmem>>, %arg8: memref<64x32xbf16, #tpu.memory_space<vmem>>, %arg9: memref<1x32xf32, #tpu.memory_space<vmem>>, %arg10: memref<1x32xf32, #tpu.memory_space<vmem>>, %arg11: memref<32x64xbf16, #tpu.memory_space<vmem>>, %arg12: memref<1x64xf32, #tpu.memory_space<vmem>>, %arg13: memref<64x32xbf16, #tpu.memory_space<vmem>>, %arg14: memref<1x32xf32, #tpu.memory_space<vmem>>, %arg15: memref<1x32xf32, #tpu.memory_space<vmem>>, %arg16: memref<1x32xf32, #tpu.memory_space<vmem>>, %arg17: memref<16x32xf32, #tpu.memory_space<vmem>>, %arg18: memref<2x2x8x8xf32, #tpu.memory_space<vmem>>) attributes {dimension_semantics = [#tpu.dimension_semantics<parallel>], iteration_bounds = array<i64: 1>, scalar_prefetch = 0 : i64, scratch_operands = 0 : i64, tpu.core_type = #tpu.core_type<tc>, window_params = [{transform_indices = @transform_0, window_bounds = array<i64: 16, 32>}, {transform_indices = @transform_1, window_bounds = array<i64: 2, 1, 8>}, {transform_indices = @transform_2, window_bounds = array<i64: 2, 8, 8>}, {transform_indices = @transform_3, window_bounds = array<i64: 2, 2, 8, 8>}, {pipeline_mode = #tpu.pipeline_mode<synchronous>, transform_indices = @transform_4, window_bounds = array<i64: 32, 96>}, {pipeline_mode = #tpu.pipeline_mode<synchronous>, transform_indices = @transform_5, window_bounds = array<i64: 1, 96>}, {pipeline_mode = #tpu.pipeline_mode<synchronous>, transform_indices = @transform_6, window_bounds = array<i64: 32, 64>}, {pipeline_mode = #tpu.pipeline_mode<synchronous>, transform_indices = @transform_7, window_bounds = array<i64: 64, 32>}, {pipeline_mode = #tpu.pipeline_mode<synchronous>, transform_indices = @transform_8, window_bounds = array<i64: 1, 32>}, {pipeline_mode = #tpu.pipeline_mode<synchronous>, transform_indices = @transform_9, window_bounds = array<i64: 1, 32>}, {pipeline_mode = #tpu.pipeline_mode<synchronous>, transform_indices = @transform_10, window_bounds = array<i64: 32, 64>}, {pipeline_mode = #tpu.pipeline_mode<synchronous>, transform_indices = @transform_11, window_bounds = array<i64: 1, 64>}, {pipeline_mode = #tpu.pipeline_mode<synchronous>, transform_indices = @transform_12, window_bounds = array<i64: 64, 32>}, {pipeline_mode = #tpu.pipeline_mode<synchronous>, transform_indices = @transform_13, window_bounds = array<i64: 1, 32>}, {pipeline_mode = #tpu.pipeline_mode<synchronous>, transform_indices = @transform_14, window_bounds = array<i64: 1, 32>}, {pipeline_mode = #tpu.pipeline_mode<synchronous>, transform_indices = @transform_15, window_bounds = array<i64: 1, 32>}, {transform_indices = @transform_16, window_bounds = array<i64: 16, 32>}, {transform_indices = @transform_17, window_bounds = array<i64: 2, 2, 8, 8>}]} {
    %c0 = arith.constant 0 : index
    %c0_0 = arith.constant 0 : index
    %0 = vector.load %arg1[%c0, %c0_0] : memref<16x32xf32, #tpu.memory_space<vmem>>, vector<16x32xf32>
    %1 = arith.truncf %0 : vector<16x32xf32> to vector<16x32xbf16>
    %c0_1 = arith.constant 0 : index
    %c0_2 = arith.constant 0 : index
    %2 = vector.load %arg5[%c0_1, %c0_2] : memref<32x96xbf16, #tpu.memory_space<vmem>>, vector<32x96xbf16>
    %cst = arith.constant dense<0.000000e+00> : vector<16x96xf32>
    %3 = tpu.matmul %1, %2, %cst {dimension_numbers = #tpu.dot_dimension_numbers<[1], [0], [0], [1], [0, 0, 1, 1], [], []>} : vector<16x32xbf16>, vector<32x96xbf16>, vector<16x96xf32> -> vector<16x96xf32>
    %c0_3 = arith.constant 0 : index
    %c0_4 = arith.constant 0 : index
    %4 = vector.load %arg6[%c0_3, %c0_4] : memref<1x96xf32, #tpu.memory_space<vmem>>, vector<1x96xf32>
    %5 = vector.broadcast %4 : vector<1x96xf32> to vector<16x96xf32>
    %6 = arith.addf %3, %5 : vector<16x96xf32>
    %7 = vector.extract_strided_slice %6 {offsets = [0, 0], sizes = [16, 32], strides = [1, 1]} : vector<16x96xf32> to vector<16x32xf32>
    %8 = vector.extract_strided_slice %6 {offsets = [0, 32], sizes = [16, 32], strides = [1, 1]} : vector<16x96xf32> to vector<16x32xf32>
    %9 = vector.extract_strided_slice %6 {offsets = [0, 64], sizes = [16, 32], strides = [1, 1]} : vector<16x96xf32> to vector<16x32xf32>
    %10 = arith.truncf %7 : vector<16x32xf32> to vector<16x32xbf16>
    %11 = arith.truncf %8 : vector<16x32xf32> to vector<16x32xbf16>
    %c0_5 = arith.constant 0 : index
    %c0_6 = arith.constant 0 : index
    %12 = vector.load %arg7[%c0_5, %c0_6] : memref<32x64xbf16, #tpu.memory_space<vmem>>, vector<32x64xbf16>
    %cst_7 = arith.constant dense<0.000000e+00> : vector<16x64xf32>
    %13 = tpu.matmul %10, %12, %cst_7 {dimension_numbers = #tpu.dot_dimension_numbers<[1], [0], [0], [1], [0, 0, 1, 1], [], []>} : vector<16x32xbf16>, vector<32x64xbf16>, vector<16x64xf32> -> vector<16x64xf32>
    %c0_8 = arith.constant 0 : index
    %c0_9 = arith.constant 0 : index
    %14 = vector.load %arg8[%c0_8, %c0_9] : memref<64x32xbf16, #tpu.memory_space<vmem>>, vector<64x32xbf16>
    %cst_10 = arith.constant dense<0.000000e+00> : vector<64x16xf32>
    %15 = tpu.matmul %14, %11, %cst_10 {dimension_numbers = #tpu.dot_dimension_numbers<[1], [1], [0], [0], [0, 0, 1, 0], [], []>} : vector<64x32xbf16>, vector<16x32xbf16>, vector<64x16xf32> -> vector<64x16xf32>
    %16 = vector.extract_strided_slice %7 {offsets = [0, 0], sizes = [8, 32], strides = [1, 1]} : vector<16x32xf32> to vector<8x32xf32>
    %17 = vector.extract_strided_slice %8 {offsets = [0, 0], sizes = [8, 32], strides = [1, 1]} : vector<16x32xf32> to vector<8x32xf32>
    %18 = vector.extract_strided_slice %9 {offsets = [0, 0], sizes = [8, 32], strides = [1, 1]} : vector<16x32xf32> to vector<8x32xf32>
    %c0_11 = arith.constant 0 : index
    %c0_12 = arith.constant 0 : index
    %c0_13 = arith.constant 0 : index
    %19 = vector.load %arg2[%c0_11, %c0_12, %c0_13] : memref<2x1x8xf32, #tpu.memory_space<vmem>>, vector<1x1x8xf32>
    %20 = vector.shape_cast %19 : vector<1x1x8xf32> to vector<1x8xf32>
    %c0_14 = arith.constant 0 : index
    %c0_15 = arith.constant 0 : index
    %c0_16 = arith.constant 0 : index
    %21 = vector.load %arg3[%c0_14, %c0_15, %c0_16] : memref<2x8x8xf32, #tpu.memory_space<vmem>>, vector<1x8x8xf32>
    %22 = vector.shape_cast %21 : vector<1x8x8xf32> to vector<8x8xf32>
    %cst_17 = arith.constant 0.000000e+00 : f32
    %23 = vector.broadcast %cst_17 : f32 to vector<8x8xf32>
    %cst_18 = arith.constant 0.000000e+00 : f32
    %24 = vector.broadcast %cst_18 : f32 to vector<8x8xf32>
    %c0_19 = arith.constant 0 : index
    %c0_20 = arith.constant 0 : index
    %c0_21 = arith.constant 0 : index
    %c0_22 = arith.constant 0 : index
    %25 = vector.load %arg4[%c0_19, %c0_20, %c0_21, %c0_22] : memref<2x2x8x8xi32, #tpu.memory_space<vmem>>, vector<1x1x8x8xi32>
    %26 = vector.shape_cast %25 : vector<1x1x8x8xi32> to vector<8x8xi32>
    %c0_i32 = arith.constant 0 : i32
    %27 = vector.broadcast %c0_i32 : i32 to vector<8x8xi32>
    %28 = arith.cmpi eq, %26, %27 : vector<8x8xi32>
    %29 = vector.extract_strided_slice %13 {offsets = [0, 0], sizes = [8, 1], strides = [1, 1]} : vector<16x64xf32> to vector<8x1xf32>
    %30 = vector.extract_strided_slice %15 {offsets = [0, 0], sizes = [1, 8], strides = [1, 1]} : vector<64x16xf32> to vector<1x8xf32>
    %31 = vector.broadcast %29 : vector<8x1xf32> to vector<8x8xf32>
    %32 = vector.broadcast %30 : vector<1x8xf32> to vector<8x8xf32>
    %33 = arith.addf %31, %32 : vector<8x8xf32>
    %cst_23 = arith.constant 0.000000e+00 : f32
    %34 = vector.broadcast %cst_23 : f32 to vector<8x8xf32>
    %35 = arith.select %28, %33, %34 : vector<8x8xi1>, vector<8x8xf32>
    %36 = arith.addf %23, %35 : vector<8x8xf32>
    %37 = vector.extract_strided_slice %13 {offsets = [0, 32], sizes = [8, 1], strides = [1, 1]} : vector<16x64xf32> to vector<8x1xf32>
    %38 = vector.extract_strided_slice %15 {offsets = [32, 0], sizes = [1, 8], strides = [1, 1]} : vector<64x16xf32> to vector<1x8xf32>
    %39 = vector.broadcast %37 : vector<8x1xf32> to vector<8x8xf32>
    %40 = vector.broadcast %38 : vector<1x8xf32> to vector<8x8xf32>
    %41 = arith.addf %39, %40 : vector<8x8xf32>
    %cst_24 = arith.constant 0.000000e+00 : f32
    %42 = vector.broadcast %cst_24 : f32 to vector<8x8xf32>
    %43 = arith.select %28, %41, %42 : vector<8x8xi1>, vector<8x8xf32>
    %44 = arith.addf %24, %43 : vector<8x8xf32>
    %c1_i32 = arith.constant 1 : i32
    %45 = vector.broadcast %c1_i32 : i32 to vector<8x8xi32>
    %46 = arith.cmpi eq, %26, %45 : vector<8x8xi32>
    %47 = vector.extract_strided_slice %13 {offsets = [0, 1], sizes = [8, 1], strides = [1, 1]} : vector<16x64xf32> to vector<8x1xf32>
    %48 = vector.extract_strided_slice %15 {offsets = [1, 0], sizes = [1, 8], strides = [1, 1]} : vector<64x16xf32> to vector<1x8xf32>
    %49 = vector.broadcast %47 : vector<8x1xf32> to vector<8x8xf32>
    %50 = vector.broadcast %48 : vector<1x8xf32> to vector<8x8xf32>
    %51 = arith.addf %49, %50 : vector<8x8xf32>
    %cst_25 = arith.constant 0.000000e+00 : f32
    %52 = vector.broadcast %cst_25 : f32 to vector<8x8xf32>
    %53 = arith.select %46, %51, %52 : vector<8x8xi1>, vector<8x8xf32>
    %54 = arith.addf %36, %53 : vector<8x8xf32>
    %55 = vector.extract_strided_slice %13 {offsets = [0, 33], sizes = [8, 1], strides = [1, 1]} : vector<16x64xf32> to vector<8x1xf32>
    %56 = vector.extract_strided_slice %15 {offsets = [33, 0], sizes = [1, 8], strides = [1, 1]} : vector<64x16xf32> to vector<1x8xf32>
    %57 = vector.broadcast %55 : vector<8x1xf32> to vector<8x8xf32>
    %58 = vector.broadcast %56 : vector<1x8xf32> to vector<8x8xf32>
    %59 = arith.addf %57, %58 : vector<8x8xf32>
    %cst_26 = arith.constant 0.000000e+00 : f32
    %60 = vector.broadcast %cst_26 : f32 to vector<8x8xf32>
    %61 = arith.select %46, %59, %60 : vector<8x8xi1>, vector<8x8xf32>
    %62 = arith.addf %44, %61 : vector<8x8xf32>
    %c2_i32 = arith.constant 2 : i32
    %63 = vector.broadcast %c2_i32 : i32 to vector<8x8xi32>
    %64 = arith.cmpi eq, %26, %63 : vector<8x8xi32>
    %65 = vector.extract_strided_slice %13 {offsets = [0, 2], sizes = [8, 1], strides = [1, 1]} : vector<16x64xf32> to vector<8x1xf32>
    %66 = vector.extract_strided_slice %15 {offsets = [2, 0], sizes = [1, 8], strides = [1, 1]} : vector<64x16xf32> to vector<1x8xf32>
    %67 = vector.broadcast %65 : vector<8x1xf32> to vector<8x8xf32>
    %68 = vector.broadcast %66 : vector<1x8xf32> to vector<8x8xf32>
    %69 = arith.addf %67, %68 : vector<8x8xf32>
    %cst_27 = arith.constant 0.000000e+00 : f32
    %70 = vector.broadcast %cst_27 : f32 to vector<8x8xf32>
    %71 = arith.select %64, %69, %70 : vector<8x8xi1>, vector<8x8xf32>
    %72 = arith.addf %54, %71 : vector<8x8xf32>
    %73 = vector.extract_strided_slice %13 {offsets = [0, 34], sizes = [8, 1], strides = [1, 1]} : vector<16x64xf32> to vector<8x1xf32>
    %74 = vector.extract_strided_slice %15 {offsets = [34, 0], sizes = [1, 8], strides = [1, 1]} : vector<64x16xf32> to vector<1x8xf32>
    %75 = vector.broadcast %73 : vector<8x1xf32> to vector<8x8xf32>
    %76 = vector.broadcast %74 : vector<1x8xf32> to vector<8x8xf32>
    %77 = arith.addf %75, %76 : vector<8x8xf32>
    %cst_28 = arith.constant 0.000000e+00 : f32
    %78 = vector.broadcast %cst_28 : f32 to vector<8x8xf32>
    %79 = arith.select %64, %77, %78 : vector<8x8xi1>, vector<8x8xf32>
    %80 = arith.addf %62, %79 : vector<8x8xf32>
    %c3_i32 = arith.constant 3 : i32
    %81 = vector.broadcast %c3_i32 : i32 to vector<8x8xi32>
    %82 = arith.cmpi eq, %26, %81 : vector<8x8xi32>
    %83 = vector.extract_strided_slice %13 {offsets = [0, 3], sizes = [8, 1], strides = [1, 1]} : vector<16x64xf32> to vector<8x1xf32>
    %84 = vector.extract_strided_slice %15 {offsets = [3, 0], sizes = [1, 8], strides = [1, 1]} : vector<64x16xf32> to vector<1x8xf32>
    %85 = vector.broadcast %83 : vector<8x1xf32> to vector<8x8xf32>
    %86 = vector.broadcast %84 : vector<1x8xf32> to vector<8x8xf32>
    %87 = arith.addf %85, %86 : vector<8x8xf32>
    %cst_29 = arith.constant 0.000000e+00 : f32
    %88 = vector.broadcast %cst_29 : f32 to vector<8x8xf32>
    %89 = arith.select %82, %87, %88 : vector<8x8xi1>, vector<8x8xf32>
    %90 = arith.addf %72, %89 : vector<8x8xf32>
    %91 = vector.extract_strided_slice %13 {offsets = [0, 35], sizes = [8, 1], strides = [1, 1]} : vector<16x64xf32> to vector<8x1xf32>
    %92 = vector.extract_strided_slice %15 {offsets = [35, 0], sizes = [1, 8], strides = [1, 1]} : vector<64x16xf32> to vector<1x8xf32>
    %93 = vector.broadcast %91 : vector<8x1xf32> to vector<8x8xf32>
    %94 = vector.broadcast %92 : vector<1x8xf32> to vector<8x8xf32>
    %95 = arith.addf %93, %94 : vector<8x8xf32>
    %cst_30 = arith.constant 0.000000e+00 : f32
    %96 = vector.broadcast %cst_30 : f32 to vector<8x8xf32>
    %97 = arith.select %82, %95, %96 : vector<8x8xi1>, vector<8x8xf32>
    %98 = arith.addf %80, %97 : vector<8x8xf32>
    %c4_i32 = arith.constant 4 : i32
    %99 = vector.broadcast %c4_i32 : i32 to vector<8x8xi32>
    %100 = arith.cmpi eq, %26, %99 : vector<8x8xi32>
    %101 = vector.extract_strided_slice %13 {offsets = [0, 4], sizes = [8, 1], strides = [1, 1]} : vector<16x64xf32> to vector<8x1xf32>
    %102 = vector.extract_strided_slice %15 {offsets = [4, 0], sizes = [1, 8], strides = [1, 1]} : vector<64x16xf32> to vector<1x8xf32>
    %103 = vector.broadcast %101 : vector<8x1xf32> to vector<8x8xf32>
    %104 = vector.broadcast %102 : vector<1x8xf32> to vector<8x8xf32>
    %105 = arith.addf %103, %104 : vector<8x8xf32>
    %cst_31 = arith.constant 0.000000e+00 : f32
    %106 = vector.broadcast %cst_31 : f32 to vector<8x8xf32>
    %107 = arith.select %100, %105, %106 : vector<8x8xi1>, vector<8x8xf32>
    %108 = arith.addf %90, %107 : vector<8x8xf32>
    %109 = vector.extract_strided_slice %13 {offsets = [0, 36], sizes = [8, 1], strides = [1, 1]} : vector<16x64xf32> to vector<8x1xf32>
    %110 = vector.extract_strided_slice %15 {offsets = [36, 0], sizes = [1, 8], strides = [1, 1]} : vector<64x16xf32> to vector<1x8xf32>
    %111 = vector.broadcast %109 : vector<8x1xf32> to vector<8x8xf32>
    %112 = vector.broadcast %110 : vector<1x8xf32> to vector<8x8xf32>
    %113 = arith.addf %111, %112 : vector<8x8xf32>
    %cst_32 = arith.constant 0.000000e+00 : f32
    %114 = vector.broadcast %cst_32 : f32 to vector<8x8xf32>
    %115 = arith.select %100, %113, %114 : vector<8x8xi1>, vector<8x8xf32>
    %116 = arith.addf %98, %115 : vector<8x8xf32>
    %c5_i32 = arith.constant 5 : i32
    %117 = vector.broadcast %c5_i32 : i32 to vector<8x8xi32>
    %118 = arith.cmpi eq, %26, %117 : vector<8x8xi32>
    %119 = vector.extract_strided_slice %13 {offsets = [0, 5], sizes = [8, 1], strides = [1, 1]} : vector<16x64xf32> to vector<8x1xf32>
    %120 = vector.extract_strided_slice %15 {offsets = [5, 0], sizes = [1, 8], strides = [1, 1]} : vector<64x16xf32> to vector<1x8xf32>
    %121 = vector.broadcast %119 : vector<8x1xf32> to vector<8x8xf32>
    %122 = vector.broadcast %120 : vector<1x8xf32> to vector<8x8xf32>
    %123 = arith.addf %121, %122 : vector<8x8xf32>
    %cst_33 = arith.constant 0.000000e+00 : f32
    %124 = vector.broadcast %cst_33 : f32 to vector<8x8xf32>
    %125 = arith.select %118, %123, %124 : vector<8x8xi1>, vector<8x8xf32>
    %126 = arith.addf %108, %125 : vector<8x8xf32>
    %127 = vector.extract_strided_slice %13 {offsets = [0, 37], sizes = [8, 1], strides = [1, 1]} : vector<16x64xf32> to vector<8x1xf32>
    %128 = vector.extract_strided_slice %15 {offsets = [37, 0], sizes = [1, 8], strides = [1, 1]} : vector<64x16xf32> to vector<1x8xf32>
    %129 = vector.broadcast %127 : vector<8x1xf32> to vector<8x8xf32>
    %130 = vector.broadcast %128 : vector<1x8xf32> to vector<8x8xf32>
    %131 = arith.addf %129, %130 : vector<8x8xf32>
    %cst_34 = arith.constant 0.000000e+00 : f32
    %132 = vector.broadcast %cst_34 : f32 to vector<8x8xf32>
    %133 = arith.select %118, %131, %132 : vector<8x8xi1>, vector<8x8xf32>
    %134 = arith.addf %116, %133 : vector<8x8xf32>
    %c6_i32 = arith.constant 6 : i32
    %135 = vector.broadcast %c6_i32 : i32 to vector<8x8xi32>
    %136 = arith.cmpi eq, %26, %135 : vector<8x8xi32>
    %137 = vector.extract_strided_slice %13 {offsets = [0, 6], sizes = [8, 1], strides = [1, 1]} : vector<16x64xf32> to vector<8x1xf32>
    %138 = vector.extract_strided_slice %15 {offsets = [6, 0], sizes = [1, 8], strides = [1, 1]} : vector<64x16xf32> to vector<1x8xf32>
    %139 = vector.broadcast %137 : vector<8x1xf32> to vector<8x8xf32>
    %140 = vector.broadcast %138 : vector<1x8xf32> to vector<8x8xf32>
    %141 = arith.addf %139, %140 : vector<8x8xf32>
    %cst_35 = arith.constant 0.000000e+00 : f32
    %142 = vector.broadcast %cst_35 : f32 to vector<8x8xf32>
    %143 = arith.select %136, %141, %142 : vector<8x8xi1>, vector<8x8xf32>
    %144 = arith.addf %126, %143 : vector<8x8xf32>
    %145 = vector.extract_strided_slice %13 {offsets = [0, 38], sizes = [8, 1], strides = [1, 1]} : vector<16x64xf32> to vector<8x1xf32>
    %146 = vector.extract_strided_slice %15 {offsets = [38, 0], sizes = [1, 8], strides = [1, 1]} : vector<64x16xf32> to vector<1x8xf32>
    %147 = vector.broadcast %145 : vector<8x1xf32> to vector<8x8xf32>
    %148 = vector.broadcast %146 : vector<1x8xf32> to vector<8x8xf32>
    %149 = arith.addf %147, %148 : vector<8x8xf32>
    %cst_36 = arith.constant 0.000000e+00 : f32
    %150 = vector.broadcast %cst_36 : f32 to vector<8x8xf32>
    %151 = arith.select %136, %149, %150 : vector<8x8xi1>, vector<8x8xf32>
    %152 = arith.addf %134, %151 : vector<8x8xf32>
    %c7_i32 = arith.constant 7 : i32
    %153 = vector.broadcast %c7_i32 : i32 to vector<8x8xi32>
    %154 = arith.cmpi eq, %26, %153 : vector<8x8xi32>
    %155 = vector.extract_strided_slice %13 {offsets = [0, 7], sizes = [8, 1], strides = [1, 1]} : vector<16x64xf32> to vector<8x1xf32>
    %156 = vector.extract_strided_slice %15 {offsets = [7, 0], sizes = [1, 8], strides = [1, 1]} : vector<64x16xf32> to vector<1x8xf32>
    %157 = vector.broadcast %155 : vector<8x1xf32> to vector<8x8xf32>
    %158 = vector.broadcast %156 : vector<1x8xf32> to vector<8x8xf32>
    %159 = arith.addf %157, %158 : vector<8x8xf32>
    %cst_37 = arith.constant 0.000000e+00 : f32
    %160 = vector.broadcast %cst_37 : f32 to vector<8x8xf32>
    %161 = arith.select %154, %159, %160 : vector<8x8xi1>, vector<8x8xf32>
    %162 = arith.addf %144, %161 : vector<8x8xf32>
    %163 = vector.extract_strided_slice %13 {offsets = [0, 39], sizes = [8, 1], strides = [1, 1]} : vector<16x64xf32> to vector<8x1xf32>
    %164 = vector.extract_strided_slice %15 {offsets = [39, 0], sizes = [1, 8], strides = [1, 1]} : vector<64x16xf32> to vector<1x8xf32>
    %165 = vector.broadcast %163 : vector<8x1xf32> to vector<8x8xf32>
    %166 = vector.broadcast %164 : vector<1x8xf32> to vector<8x8xf32>
    %167 = arith.addf %165, %166 : vector<8x8xf32>
    %cst_38 = arith.constant 0.000000e+00 : f32
    %168 = vector.broadcast %cst_38 : f32 to vector<8x8xf32>
    %169 = arith.select %154, %167, %168 : vector<8x8xi1>, vector<8x8xf32>
    %170 = arith.addf %152, %169 : vector<8x8xf32>
    %c8_i32 = arith.constant 8 : i32
    %171 = vector.broadcast %c8_i32 : i32 to vector<8x8xi32>
    %172 = arith.cmpi eq, %26, %171 : vector<8x8xi32>
    %173 = vector.extract_strided_slice %13 {offsets = [0, 8], sizes = [8, 1], strides = [1, 1]} : vector<16x64xf32> to vector<8x1xf32>
    %174 = vector.extract_strided_slice %15 {offsets = [8, 0], sizes = [1, 8], strides = [1, 1]} : vector<64x16xf32> to vector<1x8xf32>
    %175 = vector.broadcast %173 : vector<8x1xf32> to vector<8x8xf32>
    %176 = vector.broadcast %174 : vector<1x8xf32> to vector<8x8xf32>
    %177 = arith.addf %175, %176 : vector<8x8xf32>
    %cst_39 = arith.constant 0.000000e+00 : f32
    %178 = vector.broadcast %cst_39 : f32 to vector<8x8xf32>
    %179 = arith.select %172, %177, %178 : vector<8x8xi1>, vector<8x8xf32>
    %180 = arith.addf %162, %179 : vector<8x8xf32>
    %181 = vector.extract_strided_slice %13 {offsets = [0, 40], sizes = [8, 1], strides = [1, 1]} : vector<16x64xf32> to vector<8x1xf32>
    %182 = vector.extract_strided_slice %15 {offsets = [40, 0], sizes = [1, 8], strides = [1, 1]} : vector<64x16xf32> to vector<1x8xf32>
    %183 = vector.broadcast %181 : vector<8x1xf32> to vector<8x8xf32>
    %184 = vector.broadcast %182 : vector<1x8xf32> to vector<8x8xf32>
    %185 = arith.addf %183, %184 : vector<8x8xf32>
    %cst_40 = arith.constant 0.000000e+00 : f32
    %186 = vector.broadcast %cst_40 : f32 to vector<8x8xf32>
    %187 = arith.select %172, %185, %186 : vector<8x8xi1>, vector<8x8xf32>
    %188 = arith.addf %170, %187 : vector<8x8xf32>
    %c9_i32 = arith.constant 9 : i32
    %189 = vector.broadcast %c9_i32 : i32 to vector<8x8xi32>
    %190 = arith.cmpi eq, %26, %189 : vector<8x8xi32>
    %191 = vector.extract_strided_slice %13 {offsets = [0, 9], sizes = [8, 1], strides = [1, 1]} : vector<16x64xf32> to vector<8x1xf32>
    %192 = vector.extract_strided_slice %15 {offsets = [9, 0], sizes = [1, 8], strides = [1, 1]} : vector<64x16xf32> to vector<1x8xf32>
    %193 = vector.broadcast %191 : vector<8x1xf32> to vector<8x8xf32>
    %194 = vector.broadcast %192 : vector<1x8xf32> to vector<8x8xf32>
    %195 = arith.addf %193, %194 : vector<8x8xf32>
    %cst_41 = arith.constant 0.000000e+00 : f32
    %196 = vector.broadcast %cst_41 : f32 to vector<8x8xf32>
    %197 = arith.select %190, %195, %196 : vector<8x8xi1>, vector<8x8xf32>
    %198 = arith.addf %180, %197 : vector<8x8xf32>
    %199 = vector.extract_strided_slice %13 {offsets = [0, 41], sizes = [8, 1], strides = [1, 1]} : vector<16x64xf32> to vector<8x1xf32>
    %200 = vector.extract_strided_slice %15 {offsets = [41, 0], sizes = [1, 8], strides = [1, 1]} : vector<64x16xf32> to vector<1x8xf32>
    %201 = vector.broadcast %199 : vector<8x1xf32> to vector<8x8xf32>
    %202 = vector.broadcast %200 : vector<1x8xf32> to vector<8x8xf32>
    %203 = arith.addf %201, %202 : vector<8x8xf32>
    %cst_42 = arith.constant 0.000000e+00 : f32
    %204 = vector.broadcast %cst_42 : f32 to vector<8x8xf32>
    %205 = arith.select %190, %203, %204 : vector<8x8xi1>, vector<8x8xf32>
    %206 = arith.addf %188, %205 : vector<8x8xf32>
    %c10_i32 = arith.constant 10 : i32
    %207 = vector.broadcast %c10_i32 : i32 to vector<8x8xi32>
    %208 = arith.cmpi eq, %26, %207 : vector<8x8xi32>
    %209 = vector.extract_strided_slice %13 {offsets = [0, 10], sizes = [8, 1], strides = [1, 1]} : vector<16x64xf32> to vector<8x1xf32>
    %210 = vector.extract_strided_slice %15 {offsets = [10, 0], sizes = [1, 8], strides = [1, 1]} : vector<64x16xf32> to vector<1x8xf32>
    %211 = vector.broadcast %209 : vector<8x1xf32> to vector<8x8xf32>
    %212 = vector.broadcast %210 : vector<1x8xf32> to vector<8x8xf32>
    %213 = arith.addf %211, %212 : vector<8x8xf32>
    %cst_43 = arith.constant 0.000000e+00 : f32
    %214 = vector.broadcast %cst_43 : f32 to vector<8x8xf32>
    %215 = arith.select %208, %213, %214 : vector<8x8xi1>, vector<8x8xf32>
    %216 = arith.addf %198, %215 : vector<8x8xf32>
    %217 = vector.extract_strided_slice %13 {offsets = [0, 42], sizes = [8, 1], strides = [1, 1]} : vector<16x64xf32> to vector<8x1xf32>
    %218 = vector.extract_strided_slice %15 {offsets = [42, 0], sizes = [1, 8], strides = [1, 1]} : vector<64x16xf32> to vector<1x8xf32>
    %219 = vector.broadcast %217 : vector<8x1xf32> to vector<8x8xf32>
    %220 = vector.broadcast %218 : vector<1x8xf32> to vector<8x8xf32>
    %221 = arith.addf %219, %220 : vector<8x8xf32>
    %cst_44 = arith.constant 0.000000e+00 : f32
    %222 = vector.broadcast %cst_44 : f32 to vector<8x8xf32>
    %223 = arith.select %208, %221, %222 : vector<8x8xi1>, vector<8x8xf32>
    %224 = arith.addf %206, %223 : vector<8x8xf32>
    %c11_i32 = arith.constant 11 : i32
    %225 = vector.broadcast %c11_i32 : i32 to vector<8x8xi32>
    %226 = arith.cmpi eq, %26, %225 : vector<8x8xi32>
    %227 = vector.extract_strided_slice %13 {offsets = [0, 11], sizes = [8, 1], strides = [1, 1]} : vector<16x64xf32> to vector<8x1xf32>
    %228 = vector.extract_strided_slice %15 {offsets = [11, 0], sizes = [1, 8], strides = [1, 1]} : vector<64x16xf32> to vector<1x8xf32>
    %229 = vector.broadcast %227 : vector<8x1xf32> to vector<8x8xf32>
    %230 = vector.broadcast %228 : vector<1x8xf32> to vector<8x8xf32>
    %231 = arith.addf %229, %230 : vector<8x8xf32>
    %cst_45 = arith.constant 0.000000e+00 : f32
    %232 = vector.broadcast %cst_45 : f32 to vector<8x8xf32>
    %233 = arith.select %226, %231, %232 : vector<8x8xi1>, vector<8x8xf32>
    %234 = arith.addf %216, %233 : vector<8x8xf32>
    %235 = vector.extract_strided_slice %13 {offsets = [0, 43], sizes = [8, 1], strides = [1, 1]} : vector<16x64xf32> to vector<8x1xf32>
    %236 = vector.extract_strided_slice %15 {offsets = [43, 0], sizes = [1, 8], strides = [1, 1]} : vector<64x16xf32> to vector<1x8xf32>
    %237 = vector.broadcast %235 : vector<8x1xf32> to vector<8x8xf32>
    %238 = vector.broadcast %236 : vector<1x8xf32> to vector<8x8xf32>
    %239 = arith.addf %237, %238 : vector<8x8xf32>
    %cst_46 = arith.constant 0.000000e+00 : f32
    %240 = vector.broadcast %cst_46 : f32 to vector<8x8xf32>
    %241 = arith.select %226, %239, %240 : vector<8x8xi1>, vector<8x8xf32>
    %242 = arith.addf %224, %241 : vector<8x8xf32>
    %c12_i32 = arith.constant 12 : i32
    %243 = vector.broadcast %c12_i32 : i32 to vector<8x8xi32>
    %244 = arith.cmpi eq, %26, %243 : vector<8x8xi32>
    %245 = vector.extract_strided_slice %13 {offsets = [0, 12], sizes = [8, 1], strides = [1, 1]} : vector<16x64xf32> to vector<8x1xf32>
    %246 = vector.extract_strided_slice %15 {offsets = [12, 0], sizes = [1, 8], strides = [1, 1]} : vector<64x16xf32> to vector<1x8xf32>
    %247 = vector.broadcast %245 : vector<8x1xf32> to vector<8x8xf32>
    %248 = vector.broadcast %246 : vector<1x8xf32> to vector<8x8xf32>
    %249 = arith.addf %247, %248 : vector<8x8xf32>
    %cst_47 = arith.constant 0.000000e+00 : f32
    %250 = vector.broadcast %cst_47 : f32 to vector<8x8xf32>
    %251 = arith.select %244, %249, %250 : vector<8x8xi1>, vector<8x8xf32>
    %252 = arith.addf %234, %251 : vector<8x8xf32>
    %253 = vector.extract_strided_slice %13 {offsets = [0, 44], sizes = [8, 1], strides = [1, 1]} : vector<16x64xf32> to vector<8x1xf32>
    %254 = vector.extract_strided_slice %15 {offsets = [44, 0], sizes = [1, 8], strides = [1, 1]} : vector<64x16xf32> to vector<1x8xf32>
    %255 = vector.broadcast %253 : vector<8x1xf32> to vector<8x8xf32>
    %256 = vector.broadcast %254 : vector<1x8xf32> to vector<8x8xf32>
    %257 = arith.addf %255, %256 : vector<8x8xf32>
    %cst_48 = arith.constant 0.000000e+00 : f32
    %258 = vector.broadcast %cst_48 : f32 to vector<8x8xf32>
    %259 = arith.select %244, %257, %258 : vector<8x8xi1>, vector<8x8xf32>
    %260 = arith.addf %242, %259 : vector<8x8xf32>
    %c13_i32 = arith.constant 13 : i32
    %261 = vector.broadcast %c13_i32 : i32 to vector<8x8xi32>
    %262 = arith.cmpi eq, %26, %261 : vector<8x8xi32>
    %263 = vector.extract_strided_slice %13 {offsets = [0, 13], sizes = [8, 1], strides = [1, 1]} : vector<16x64xf32> to vector<8x1xf32>
    %264 = vector.extract_strided_slice %15 {offsets = [13, 0], sizes = [1, 8], strides = [1, 1]} : vector<64x16xf32> to vector<1x8xf32>
    %265 = vector.broadcast %263 : vector<8x1xf32> to vector<8x8xf32>
    %266 = vector.broadcast %264 : vector<1x8xf32> to vector<8x8xf32>
    %267 = arith.addf %265, %266 : vector<8x8xf32>
    %cst_49 = arith.constant 0.000000e+00 : f32
    %268 = vector.broadcast %cst_49 : f32 to vector<8x8xf32>
    %269 = arith.select %262, %267, %268 : vector<8x8xi1>, vector<8x8xf32>
    %270 = arith.addf %252, %269 : vector<8x8xf32>
    %271 = vector.extract_strided_slice %13 {offsets = [0, 45], sizes = [8, 1], strides = [1, 1]} : vector<16x64xf32> to vector<8x1xf32>
    %272 = vector.extract_strided_slice %15 {offsets = [45, 0], sizes = [1, 8], strides = [1, 1]} : vector<64x16xf32> to vector<1x8xf32>
    %273 = vector.broadcast %271 : vector<8x1xf32> to vector<8x8xf32>
    %274 = vector.broadcast %272 : vector<1x8xf32> to vector<8x8xf32>
    %275 = arith.addf %273, %274 : vector<8x8xf32>
    %cst_50 = arith.constant 0.000000e+00 : f32
    %276 = vector.broadcast %cst_50 : f32 to vector<8x8xf32>
    %277 = arith.select %262, %275, %276 : vector<8x8xi1>, vector<8x8xf32>
    %278 = arith.addf %260, %277 : vector<8x8xf32>
    %c14_i32 = arith.constant 14 : i32
    %279 = vector.broadcast %c14_i32 : i32 to vector<8x8xi32>
    %280 = arith.cmpi eq, %26, %279 : vector<8x8xi32>
    %281 = vector.extract_strided_slice %13 {offsets = [0, 14], sizes = [8, 1], strides = [1, 1]} : vector<16x64xf32> to vector<8x1xf32>
    %282 = vector.extract_strided_slice %15 {offsets = [14, 0], sizes = [1, 8], strides = [1, 1]} : vector<64x16xf32> to vector<1x8xf32>
    %283 = vector.broadcast %281 : vector<8x1xf32> to vector<8x8xf32>
    %284 = vector.broadcast %282 : vector<1x8xf32> to vector<8x8xf32>
    %285 = arith.addf %283, %284 : vector<8x8xf32>
    %cst_51 = arith.constant 0.000000e+00 : f32
    %286 = vector.broadcast %cst_51 : f32 to vector<8x8xf32>
    %287 = arith.select %280, %285, %286 : vector<8x8xi1>, vector<8x8xf32>
    %288 = arith.addf %270, %287 : vector<8x8xf32>
    %289 = vector.extract_strided_slice %13 {offsets = [0, 46], sizes = [8, 1], strides = [1, 1]} : vector<16x64xf32> to vector<8x1xf32>
    %290 = vector.extract_strided_slice %15 {offsets = [46, 0], sizes = [1, 8], strides = [1, 1]} : vector<64x16xf32> to vector<1x8xf32>
    %291 = vector.broadcast %289 : vector<8x1xf32> to vector<8x8xf32>
    %292 = vector.broadcast %290 : vector<1x8xf32> to vector<8x8xf32>
    %293 = arith.addf %291, %292 : vector<8x8xf32>
    %cst_52 = arith.constant 0.000000e+00 : f32
    %294 = vector.broadcast %cst_52 : f32 to vector<8x8xf32>
    %295 = arith.select %280, %293, %294 : vector<8x8xi1>, vector<8x8xf32>
    %296 = arith.addf %278, %295 : vector<8x8xf32>
    %c15_i32 = arith.constant 15 : i32
    %297 = vector.broadcast %c15_i32 : i32 to vector<8x8xi32>
    %298 = arith.cmpi eq, %26, %297 : vector<8x8xi32>
    %299 = vector.extract_strided_slice %13 {offsets = [0, 15], sizes = [8, 1], strides = [1, 1]} : vector<16x64xf32> to vector<8x1xf32>
    %300 = vector.extract_strided_slice %15 {offsets = [15, 0], sizes = [1, 8], strides = [1, 1]} : vector<64x16xf32> to vector<1x8xf32>
    %301 = vector.broadcast %299 : vector<8x1xf32> to vector<8x8xf32>
    %302 = vector.broadcast %300 : vector<1x8xf32> to vector<8x8xf32>
    %303 = arith.addf %301, %302 : vector<8x8xf32>
    %cst_53 = arith.constant 0.000000e+00 : f32
    %304 = vector.broadcast %cst_53 : f32 to vector<8x8xf32>
    %305 = arith.select %298, %303, %304 : vector<8x8xi1>, vector<8x8xf32>
    %306 = arith.addf %288, %305 : vector<8x8xf32>
    %307 = vector.extract_strided_slice %13 {offsets = [0, 47], sizes = [8, 1], strides = [1, 1]} : vector<16x64xf32> to vector<8x1xf32>
    %308 = vector.extract_strided_slice %15 {offsets = [47, 0], sizes = [1, 8], strides = [1, 1]} : vector<64x16xf32> to vector<1x8xf32>
    %309 = vector.broadcast %307 : vector<8x1xf32> to vector<8x8xf32>
    %310 = vector.broadcast %308 : vector<1x8xf32> to vector<8x8xf32>
    %311 = arith.addf %309, %310 : vector<8x8xf32>
    %cst_54 = arith.constant 0.000000e+00 : f32
    %312 = vector.broadcast %cst_54 : f32 to vector<8x8xf32>
    %313 = arith.select %298, %311, %312 : vector<8x8xi1>, vector<8x8xf32>
    %314 = arith.addf %296, %313 : vector<8x8xf32>
    %c0_55 = arith.constant 0 : index
    %c1 = arith.constant 1 : index
    %c0_56 = arith.constant 0 : index
    %c0_57 = arith.constant 0 : index
    %315 = vector.load %arg4[%c0_55, %c1, %c0_56, %c0_57] : memref<2x2x8x8xi32, #tpu.memory_space<vmem>>, vector<1x1x8x8xi32>
    %316 = vector.shape_cast %315 : vector<1x1x8x8xi32> to vector<8x8xi32>
    %c0_i32_58 = arith.constant 0 : i32
    %317 = vector.broadcast %c0_i32_58 : i32 to vector<8x8xi32>
    %318 = arith.cmpi eq, %316, %317 : vector<8x8xi32>
    %319 = vector.extract_strided_slice %13 {offsets = [0, 16], sizes = [8, 1], strides = [1, 1]} : vector<16x64xf32> to vector<8x1xf32>
    %320 = vector.extract_strided_slice %15 {offsets = [16, 0], sizes = [1, 8], strides = [1, 1]} : vector<64x16xf32> to vector<1x8xf32>
    %321 = vector.broadcast %319 : vector<8x1xf32> to vector<8x8xf32>
    %322 = vector.broadcast %320 : vector<1x8xf32> to vector<8x8xf32>
    %323 = arith.addf %321, %322 : vector<8x8xf32>
    %cst_59 = arith.constant 0.000000e+00 : f32
    %324 = vector.broadcast %cst_59 : f32 to vector<8x8xf32>
    %325 = arith.select %318, %323, %324 : vector<8x8xi1>, vector<8x8xf32>
    %326 = arith.addf %306, %325 : vector<8x8xf32>
    %327 = vector.extract_strided_slice %13 {offsets = [0, 48], sizes = [8, 1], strides = [1, 1]} : vector<16x64xf32> to vector<8x1xf32>
    %328 = vector.extract_strided_slice %15 {offsets = [48, 0], sizes = [1, 8], strides = [1, 1]} : vector<64x16xf32> to vector<1x8xf32>
    %329 = vector.broadcast %327 : vector<8x1xf32> to vector<8x8xf32>
    %330 = vector.broadcast %328 : vector<1x8xf32> to vector<8x8xf32>
    %331 = arith.addf %329, %330 : vector<8x8xf32>
    %cst_60 = arith.constant 0.000000e+00 : f32
    %332 = vector.broadcast %cst_60 : f32 to vector<8x8xf32>
    %333 = arith.select %318, %331, %332 : vector<8x8xi1>, vector<8x8xf32>
    %334 = arith.addf %314, %333 : vector<8x8xf32>
    %c1_i32_61 = arith.constant 1 : i32
    %335 = vector.broadcast %c1_i32_61 : i32 to vector<8x8xi32>
    %336 = arith.cmpi eq, %316, %335 : vector<8x8xi32>
    %337 = vector.extract_strided_slice %13 {offsets = [0, 17], sizes = [8, 1], strides = [1, 1]} : vector<16x64xf32> to vector<8x1xf32>
    %338 = vector.extract_strided_slice %15 {offsets = [17, 0], sizes = [1, 8], strides = [1, 1]} : vector<64x16xf32> to vector<1x8xf32>
    %339 = vector.broadcast %337 : vector<8x1xf32> to vector<8x8xf32>
    %340 = vector.broadcast %338 : vector<1x8xf32> to vector<8x8xf32>
    %341 = arith.addf %339, %340 : vector<8x8xf32>
    %cst_62 = arith.constant 0.000000e+00 : f32
    %342 = vector.broadcast %cst_62 : f32 to vector<8x8xf32>
    %343 = arith.select %336, %341, %342 : vector<8x8xi1>, vector<8x8xf32>
    %344 = arith.addf %326, %343 : vector<8x8xf32>
    %345 = vector.extract_strided_slice %13 {offsets = [0, 49], sizes = [8, 1], strides = [1, 1]} : vector<16x64xf32> to vector<8x1xf32>
    %346 = vector.extract_strided_slice %15 {offsets = [49, 0], sizes = [1, 8], strides = [1, 1]} : vector<64x16xf32> to vector<1x8xf32>
    %347 = vector.broadcast %345 : vector<8x1xf32> to vector<8x8xf32>
    %348 = vector.broadcast %346 : vector<1x8xf32> to vector<8x8xf32>
    %349 = arith.addf %347, %348 : vector<8x8xf32>
    %cst_63 = arith.constant 0.000000e+00 : f32
    %350 = vector.broadcast %cst_63 : f32 to vector<8x8xf32>
    %351 = arith.select %336, %349, %350 : vector<8x8xi1>, vector<8x8xf32>
    %352 = arith.addf %334, %351 : vector<8x8xf32>
    %c2_i32_64 = arith.constant 2 : i32
    %353 = vector.broadcast %c2_i32_64 : i32 to vector<8x8xi32>
    %354 = arith.cmpi eq, %316, %353 : vector<8x8xi32>
    %355 = vector.extract_strided_slice %13 {offsets = [0, 18], sizes = [8, 1], strides = [1, 1]} : vector<16x64xf32> to vector<8x1xf32>
    %356 = vector.extract_strided_slice %15 {offsets = [18, 0], sizes = [1, 8], strides = [1, 1]} : vector<64x16xf32> to vector<1x8xf32>
    %357 = vector.broadcast %355 : vector<8x1xf32> to vector<8x8xf32>
    %358 = vector.broadcast %356 : vector<1x8xf32> to vector<8x8xf32>
    %359 = arith.addf %357, %358 : vector<8x8xf32>
    %cst_65 = arith.constant 0.000000e+00 : f32
    %360 = vector.broadcast %cst_65 : f32 to vector<8x8xf32>
    %361 = arith.select %354, %359, %360 : vector<8x8xi1>, vector<8x8xf32>
    %362 = arith.addf %344, %361 : vector<8x8xf32>
    %363 = vector.extract_strided_slice %13 {offsets = [0, 50], sizes = [8, 1], strides = [1, 1]} : vector<16x64xf32> to vector<8x1xf32>
    %364 = vector.extract_strided_slice %15 {offsets = [50, 0], sizes = [1, 8], strides = [1, 1]} : vector<64x16xf32> to vector<1x8xf32>
    %365 = vector.broadcast %363 : vector<8x1xf32> to vector<8x8xf32>
    %366 = vector.broadcast %364 : vector<1x8xf32> to vector<8x8xf32>
    %367 = arith.addf %365, %366 : vector<8x8xf32>
    %cst_66 = arith.constant 0.000000e+00 : f32
    %368 = vector.broadcast %cst_66 : f32 to vector<8x8xf32>
    %369 = arith.select %354, %367, %368 : vector<8x8xi1>, vector<8x8xf32>
    %370 = arith.addf %352, %369 : vector<8x8xf32>
    %c3_i32_67 = arith.constant 3 : i32
    %371 = vector.broadcast %c3_i32_67 : i32 to vector<8x8xi32>
    %372 = arith.cmpi eq, %316, %371 : vector<8x8xi32>
    %373 = vector.extract_strided_slice %13 {offsets = [0, 19], sizes = [8, 1], strides = [1, 1]} : vector<16x64xf32> to vector<8x1xf32>
    %374 = vector.extract_strided_slice %15 {offsets = [19, 0], sizes = [1, 8], strides = [1, 1]} : vector<64x16xf32> to vector<1x8xf32>
    %375 = vector.broadcast %373 : vector<8x1xf32> to vector<8x8xf32>
    %376 = vector.broadcast %374 : vector<1x8xf32> to vector<8x8xf32>
    %377 = arith.addf %375, %376 : vector<8x8xf32>
    %cst_68 = arith.constant 0.000000e+00 : f32
    %378 = vector.broadcast %cst_68 : f32 to vector<8x8xf32>
    %379 = arith.select %372, %377, %378 : vector<8x8xi1>, vector<8x8xf32>
    %380 = arith.addf %362, %379 : vector<8x8xf32>
    %381 = vector.extract_strided_slice %13 {offsets = [0, 51], sizes = [8, 1], strides = [1, 1]} : vector<16x64xf32> to vector<8x1xf32>
    %382 = vector.extract_strided_slice %15 {offsets = [51, 0], sizes = [1, 8], strides = [1, 1]} : vector<64x16xf32> to vector<1x8xf32>
    %383 = vector.broadcast %381 : vector<8x1xf32> to vector<8x8xf32>
    %384 = vector.broadcast %382 : vector<1x8xf32> to vector<8x8xf32>
    %385 = arith.addf %383, %384 : vector<8x8xf32>
    %cst_69 = arith.constant 0.000000e+00 : f32
    %386 = vector.broadcast %cst_69 : f32 to vector<8x8xf32>
    %387 = arith.select %372, %385, %386 : vector<8x8xi1>, vector<8x8xf32>
    %388 = arith.addf %370, %387 : vector<8x8xf32>
    %c4_i32_70 = arith.constant 4 : i32
    %389 = vector.broadcast %c4_i32_70 : i32 to vector<8x8xi32>
    %390 = arith.cmpi eq, %316, %389 : vector<8x8xi32>
    %391 = vector.extract_strided_slice %13 {offsets = [0, 20], sizes = [8, 1], strides = [1, 1]} : vector<16x64xf32> to vector<8x1xf32>
    %392 = vector.extract_strided_slice %15 {offsets = [20, 0], sizes = [1, 8], strides = [1, 1]} : vector<64x16xf32> to vector<1x8xf32>
    %393 = vector.broadcast %391 : vector<8x1xf32> to vector<8x8xf32>
    %394 = vector.broadcast %392 : vector<1x8xf32> to vector<8x8xf32>
    %395 = arith.addf %393, %394 : vector<8x8xf32>
    %cst_71 = arith.constant 0.000000e+00 : f32
    %396 = vector.broadcast %cst_71 : f32 to vector<8x8xf32>
    %397 = arith.select %390, %395, %396 : vector<8x8xi1>, vector<8x8xf32>
    %398 = arith.addf %380, %397 : vector<8x8xf32>
    %399 = vector.extract_strided_slice %13 {offsets = [0, 52], sizes = [8, 1], strides = [1, 1]} : vector<16x64xf32> to vector<8x1xf32>
    %400 = vector.extract_strided_slice %15 {offsets = [52, 0], sizes = [1, 8], strides = [1, 1]} : vector<64x16xf32> to vector<1x8xf32>
    %401 = vector.broadcast %399 : vector<8x1xf32> to vector<8x8xf32>
    %402 = vector.broadcast %400 : vector<1x8xf32> to vector<8x8xf32>
    %403 = arith.addf %401, %402 : vector<8x8xf32>
    %cst_72 = arith.constant 0.000000e+00 : f32
    %404 = vector.broadcast %cst_72 : f32 to vector<8x8xf32>
    %405 = arith.select %390, %403, %404 : vector<8x8xi1>, vector<8x8xf32>
    %406 = arith.addf %388, %405 : vector<8x8xf32>
    %c5_i32_73 = arith.constant 5 : i32
    %407 = vector.broadcast %c5_i32_73 : i32 to vector<8x8xi32>
    %408 = arith.cmpi eq, %316, %407 : vector<8x8xi32>
    %409 = vector.extract_strided_slice %13 {offsets = [0, 21], sizes = [8, 1], strides = [1, 1]} : vector<16x64xf32> to vector<8x1xf32>
    %410 = vector.extract_strided_slice %15 {offsets = [21, 0], sizes = [1, 8], strides = [1, 1]} : vector<64x16xf32> to vector<1x8xf32>
    %411 = vector.broadcast %409 : vector<8x1xf32> to vector<8x8xf32>
    %412 = vector.broadcast %410 : vector<1x8xf32> to vector<8x8xf32>
    %413 = arith.addf %411, %412 : vector<8x8xf32>
    %cst_74 = arith.constant 0.000000e+00 : f32
    %414 = vector.broadcast %cst_74 : f32 to vector<8x8xf32>
    %415 = arith.select %408, %413, %414 : vector<8x8xi1>, vector<8x8xf32>
    %416 = arith.addf %398, %415 : vector<8x8xf32>
    %417 = vector.extract_strided_slice %13 {offsets = [0, 53], sizes = [8, 1], strides = [1, 1]} : vector<16x64xf32> to vector<8x1xf32>
    %418 = vector.extract_strided_slice %15 {offsets = [53, 0], sizes = [1, 8], strides = [1, 1]} : vector<64x16xf32> to vector<1x8xf32>
    %419 = vector.broadcast %417 : vector<8x1xf32> to vector<8x8xf32>
    %420 = vector.broadcast %418 : vector<1x8xf32> to vector<8x8xf32>
    %421 = arith.addf %419, %420 : vector<8x8xf32>
    %cst_75 = arith.constant 0.000000e+00 : f32
    %422 = vector.broadcast %cst_75 : f32 to vector<8x8xf32>
    %423 = arith.select %408, %421, %422 : vector<8x8xi1>, vector<8x8xf32>
    %424 = arith.addf %406, %423 : vector<8x8xf32>
    %c6_i32_76 = arith.constant 6 : i32
    %425 = vector.broadcast %c6_i32_76 : i32 to vector<8x8xi32>
    %426 = arith.cmpi eq, %316, %425 : vector<8x8xi32>
    %427 = vector.extract_strided_slice %13 {offsets = [0, 22], sizes = [8, 1], strides = [1, 1]} : vector<16x64xf32> to vector<8x1xf32>
    %428 = vector.extract_strided_slice %15 {offsets = [22, 0], sizes = [1, 8], strides = [1, 1]} : vector<64x16xf32> to vector<1x8xf32>
    %429 = vector.broadcast %427 : vector<8x1xf32> to vector<8x8xf32>
    %430 = vector.broadcast %428 : vector<1x8xf32> to vector<8x8xf32>
    %431 = arith.addf %429, %430 : vector<8x8xf32>
    %cst_77 = arith.constant 0.000000e+00 : f32
    %432 = vector.broadcast %cst_77 : f32 to vector<8x8xf32>
    %433 = arith.select %426, %431, %432 : vector<8x8xi1>, vector<8x8xf32>
    %434 = arith.addf %416, %433 : vector<8x8xf32>
    %435 = vector.extract_strided_slice %13 {offsets = [0, 54], sizes = [8, 1], strides = [1, 1]} : vector<16x64xf32> to vector<8x1xf32>
    %436 = vector.extract_strided_slice %15 {offsets = [54, 0], sizes = [1, 8], strides = [1, 1]} : vector<64x16xf32> to vector<1x8xf32>
    %437 = vector.broadcast %435 : vector<8x1xf32> to vector<8x8xf32>
    %438 = vector.broadcast %436 : vector<1x8xf32> to vector<8x8xf32>
    %439 = arith.addf %437, %438 : vector<8x8xf32>
    %cst_78 = arith.constant 0.000000e+00 : f32
    %440 = vector.broadcast %cst_78 : f32 to vector<8x8xf32>
    %441 = arith.select %426, %439, %440 : vector<8x8xi1>, vector<8x8xf32>
    %442 = arith.addf %424, %441 : vector<8x8xf32>
    %c7_i32_79 = arith.constant 7 : i32
    %443 = vector.broadcast %c7_i32_79 : i32 to vector<8x8xi32>
    %444 = arith.cmpi eq, %316, %443 : vector<8x8xi32>
    %445 = vector.extract_strided_slice %13 {offsets = [0, 23], sizes = [8, 1], strides = [1, 1]} : vector<16x64xf32> to vector<8x1xf32>
    %446 = vector.extract_strided_slice %15 {offsets = [23, 0], sizes = [1, 8], strides = [1, 1]} : vector<64x16xf32> to vector<1x8xf32>
    %447 = vector.broadcast %445 : vector<8x1xf32> to vector<8x8xf32>
    %448 = vector.broadcast %446 : vector<1x8xf32> to vector<8x8xf32>
    %449 = arith.addf %447, %448 : vector<8x8xf32>
    %cst_80 = arith.constant 0.000000e+00 : f32
    %450 = vector.broadcast %cst_80 : f32 to vector<8x8xf32>
    %451 = arith.select %444, %449, %450 : vector<8x8xi1>, vector<8x8xf32>
    %452 = arith.addf %434, %451 : vector<8x8xf32>
    %453 = vector.extract_strided_slice %13 {offsets = [0, 55], sizes = [8, 1], strides = [1, 1]} : vector<16x64xf32> to vector<8x1xf32>
    %454 = vector.extract_strided_slice %15 {offsets = [55, 0], sizes = [1, 8], strides = [1, 1]} : vector<64x16xf32> to vector<1x8xf32>
    %455 = vector.broadcast %453 : vector<8x1xf32> to vector<8x8xf32>
    %456 = vector.broadcast %454 : vector<1x8xf32> to vector<8x8xf32>
    %457 = arith.addf %455, %456 : vector<8x8xf32>
    %cst_81 = arith.constant 0.000000e+00 : f32
    %458 = vector.broadcast %cst_81 : f32 to vector<8x8xf32>
    %459 = arith.select %444, %457, %458 : vector<8x8xi1>, vector<8x8xf32>
    %460 = arith.addf %442, %459 : vector<8x8xf32>
    %c8_i32_82 = arith.constant 8 : i32
    %461 = vector.broadcast %c8_i32_82 : i32 to vector<8x8xi32>
    %462 = arith.cmpi eq, %316, %461 : vector<8x8xi32>
    %463 = vector.extract_strided_slice %13 {offsets = [0, 24], sizes = [8, 1], strides = [1, 1]} : vector<16x64xf32> to vector<8x1xf32>
    %464 = vector.extract_strided_slice %15 {offsets = [24, 0], sizes = [1, 8], strides = [1, 1]} : vector<64x16xf32> to vector<1x8xf32>
    %465 = vector.broadcast %463 : vector<8x1xf32> to vector<8x8xf32>
    %466 = vector.broadcast %464 : vector<1x8xf32> to vector<8x8xf32>
    %467 = arith.addf %465, %466 : vector<8x8xf32>
    %cst_83 = arith.constant 0.000000e+00 : f32
    %468 = vector.broadcast %cst_83 : f32 to vector<8x8xf32>
    %469 = arith.select %462, %467, %468 : vector<8x8xi1>, vector<8x8xf32>
    %470 = arith.addf %452, %469 : vector<8x8xf32>
    %471 = vector.extract_strided_slice %13 {offsets = [0, 56], sizes = [8, 1], strides = [1, 1]} : vector<16x64xf32> to vector<8x1xf32>
    %472 = vector.extract_strided_slice %15 {offsets = [56, 0], sizes = [1, 8], strides = [1, 1]} : vector<64x16xf32> to vector<1x8xf32>
    %473 = vector.broadcast %471 : vector<8x1xf32> to vector<8x8xf32>
    %474 = vector.broadcast %472 : vector<1x8xf32> to vector<8x8xf32>
    %475 = arith.addf %473, %474 : vector<8x8xf32>
    %cst_84 = arith.constant 0.000000e+00 : f32
    %476 = vector.broadcast %cst_84 : f32 to vector<8x8xf32>
    %477 = arith.select %462, %475, %476 : vector<8x8xi1>, vector<8x8xf32>
    %478 = arith.addf %460, %477 : vector<8x8xf32>
    %c9_i32_85 = arith.constant 9 : i32
    %479 = vector.broadcast %c9_i32_85 : i32 to vector<8x8xi32>
    %480 = arith.cmpi eq, %316, %479 : vector<8x8xi32>
    %481 = vector.extract_strided_slice %13 {offsets = [0, 25], sizes = [8, 1], strides = [1, 1]} : vector<16x64xf32> to vector<8x1xf32>
    %482 = vector.extract_strided_slice %15 {offsets = [25, 0], sizes = [1, 8], strides = [1, 1]} : vector<64x16xf32> to vector<1x8xf32>
    %483 = vector.broadcast %481 : vector<8x1xf32> to vector<8x8xf32>
    %484 = vector.broadcast %482 : vector<1x8xf32> to vector<8x8xf32>
    %485 = arith.addf %483, %484 : vector<8x8xf32>
    %cst_86 = arith.constant 0.000000e+00 : f32
    %486 = vector.broadcast %cst_86 : f32 to vector<8x8xf32>
    %487 = arith.select %480, %485, %486 : vector<8x8xi1>, vector<8x8xf32>
    %488 = arith.addf %470, %487 : vector<8x8xf32>
    %489 = vector.extract_strided_slice %13 {offsets = [0, 57], sizes = [8, 1], strides = [1, 1]} : vector<16x64xf32> to vector<8x1xf32>
    %490 = vector.extract_strided_slice %15 {offsets = [57, 0], sizes = [1, 8], strides = [1, 1]} : vector<64x16xf32> to vector<1x8xf32>
    %491 = vector.broadcast %489 : vector<8x1xf32> to vector<8x8xf32>
    %492 = vector.broadcast %490 : vector<1x8xf32> to vector<8x8xf32>
    %493 = arith.addf %491, %492 : vector<8x8xf32>
    %cst_87 = arith.constant 0.000000e+00 : f32
    %494 = vector.broadcast %cst_87 : f32 to vector<8x8xf32>
    %495 = arith.select %480, %493, %494 : vector<8x8xi1>, vector<8x8xf32>
    %496 = arith.addf %478, %495 : vector<8x8xf32>
    %c10_i32_88 = arith.constant 10 : i32
    %497 = vector.broadcast %c10_i32_88 : i32 to vector<8x8xi32>
    %498 = arith.cmpi eq, %316, %497 : vector<8x8xi32>
    %499 = vector.extract_strided_slice %13 {offsets = [0, 26], sizes = [8, 1], strides = [1, 1]} : vector<16x64xf32> to vector<8x1xf32>
    %500 = vector.extract_strided_slice %15 {offsets = [26, 0], sizes = [1, 8], strides = [1, 1]} : vector<64x16xf32> to vector<1x8xf32>
    %501 = vector.broadcast %499 : vector<8x1xf32> to vector<8x8xf32>
    %502 = vector.broadcast %500 : vector<1x8xf32> to vector<8x8xf32>
    %503 = arith.addf %501, %502 : vector<8x8xf32>
    %cst_89 = arith.constant 0.000000e+00 : f32
    %504 = vector.broadcast %cst_89 : f32 to vector<8x8xf32>
    %505 = arith.select %498, %503, %504 : vector<8x8xi1>, vector<8x8xf32>
    %506 = arith.addf %488, %505 : vector<8x8xf32>
    %507 = vector.extract_strided_slice %13 {offsets = [0, 58], sizes = [8, 1], strides = [1, 1]} : vector<16x64xf32> to vector<8x1xf32>
    %508 = vector.extract_strided_slice %15 {offsets = [58, 0], sizes = [1, 8], strides = [1, 1]} : vector<64x16xf32> to vector<1x8xf32>
    %509 = vector.broadcast %507 : vector<8x1xf32> to vector<8x8xf32>
    %510 = vector.broadcast %508 : vector<1x8xf32> to vector<8x8xf32>
    %511 = arith.addf %509, %510 : vector<8x8xf32>
    %cst_90 = arith.constant 0.000000e+00 : f32
    %512 = vector.broadcast %cst_90 : f32 to vector<8x8xf32>
    %513 = arith.select %498, %511, %512 : vector<8x8xi1>, vector<8x8xf32>
    %514 = arith.addf %496, %513 : vector<8x8xf32>
    %c11_i32_91 = arith.constant 11 : i32
    %515 = vector.broadcast %c11_i32_91 : i32 to vector<8x8xi32>
    %516 = arith.cmpi eq, %316, %515 : vector<8x8xi32>
    %517 = vector.extract_strided_slice %13 {offsets = [0, 27], sizes = [8, 1], strides = [1, 1]} : vector<16x64xf32> to vector<8x1xf32>
    %518 = vector.extract_strided_slice %15 {offsets = [27, 0], sizes = [1, 8], strides = [1, 1]} : vector<64x16xf32> to vector<1x8xf32>
    %519 = vector.broadcast %517 : vector<8x1xf32> to vector<8x8xf32>
    %520 = vector.broadcast %518 : vector<1x8xf32> to vector<8x8xf32>
    %521 = arith.addf %519, %520 : vector<8x8xf32>
    %cst_92 = arith.constant 0.000000e+00 : f32
    %522 = vector.broadcast %cst_92 : f32 to vector<8x8xf32>
    %523 = arith.select %516, %521, %522 : vector<8x8xi1>, vector<8x8xf32>
    %524 = arith.addf %506, %523 : vector<8x8xf32>
    %525 = vector.extract_strided_slice %13 {offsets = [0, 59], sizes = [8, 1], strides = [1, 1]} : vector<16x64xf32> to vector<8x1xf32>
    %526 = vector.extract_strided_slice %15 {offsets = [59, 0], sizes = [1, 8], strides = [1, 1]} : vector<64x16xf32> to vector<1x8xf32>
    %527 = vector.broadcast %525 : vector<8x1xf32> to vector<8x8xf32>
    %528 = vector.broadcast %526 : vector<1x8xf32> to vector<8x8xf32>
    %529 = arith.addf %527, %528 : vector<8x8xf32>
    %cst_93 = arith.constant 0.000000e+00 : f32
    %530 = vector.broadcast %cst_93 : f32 to vector<8x8xf32>
    %531 = arith.select %516, %529, %530 : vector<8x8xi1>, vector<8x8xf32>
    %532 = arith.addf %514, %531 : vector<8x8xf32>
    %c12_i32_94 = arith.constant 12 : i32
    %533 = vector.broadcast %c12_i32_94 : i32 to vector<8x8xi32>
    %534 = arith.cmpi eq, %316, %533 : vector<8x8xi32>
    %535 = vector.extract_strided_slice %13 {offsets = [0, 28], sizes = [8, 1], strides = [1, 1]} : vector<16x64xf32> to vector<8x1xf32>
    %536 = vector.extract_strided_slice %15 {offsets = [28, 0], sizes = [1, 8], strides = [1, 1]} : vector<64x16xf32> to vector<1x8xf32>
    %537 = vector.broadcast %535 : vector<8x1xf32> to vector<8x8xf32>
    %538 = vector.broadcast %536 : vector<1x8xf32> to vector<8x8xf32>
    %539 = arith.addf %537, %538 : vector<8x8xf32>
    %cst_95 = arith.constant 0.000000e+00 : f32
    %540 = vector.broadcast %cst_95 : f32 to vector<8x8xf32>
    %541 = arith.select %534, %539, %540 : vector<8x8xi1>, vector<8x8xf32>
    %542 = arith.addf %524, %541 : vector<8x8xf32>
    %543 = vector.extract_strided_slice %13 {offsets = [0, 60], sizes = [8, 1], strides = [1, 1]} : vector<16x64xf32> to vector<8x1xf32>
    %544 = vector.extract_strided_slice %15 {offsets = [60, 0], sizes = [1, 8], strides = [1, 1]} : vector<64x16xf32> to vector<1x8xf32>
    %545 = vector.broadcast %543 : vector<8x1xf32> to vector<8x8xf32>
    %546 = vector.broadcast %544 : vector<1x8xf32> to vector<8x8xf32>
    %547 = arith.addf %545, %546 : vector<8x8xf32>
    %cst_96 = arith.constant 0.000000e+00 : f32
    %548 = vector.broadcast %cst_96 : f32 to vector<8x8xf32>
    %549 = arith.select %534, %547, %548 : vector<8x8xi1>, vector<8x8xf32>
    %550 = arith.addf %532, %549 : vector<8x8xf32>
    %c13_i32_97 = arith.constant 13 : i32
    %551 = vector.broadcast %c13_i32_97 : i32 to vector<8x8xi32>
    %552 = arith.cmpi eq, %316, %551 : vector<8x8xi32>
    %553 = vector.extract_strided_slice %13 {offsets = [0, 29], sizes = [8, 1], strides = [1, 1]} : vector<16x64xf32> to vector<8x1xf32>
    %554 = vector.extract_strided_slice %15 {offsets = [29, 0], sizes = [1, 8], strides = [1, 1]} : vector<64x16xf32> to vector<1x8xf32>
    %555 = vector.broadcast %553 : vector<8x1xf32> to vector<8x8xf32>
    %556 = vector.broadcast %554 : vector<1x8xf32> to vector<8x8xf32>
    %557 = arith.addf %555, %556 : vector<8x8xf32>
    %cst_98 = arith.constant 0.000000e+00 : f32
    %558 = vector.broadcast %cst_98 : f32 to vector<8x8xf32>
    %559 = arith.select %552, %557, %558 : vector<8x8xi1>, vector<8x8xf32>
    %560 = arith.addf %542, %559 : vector<8x8xf32>
    %561 = vector.extract_strided_slice %13 {offsets = [0, 61], sizes = [8, 1], strides = [1, 1]} : vector<16x64xf32> to vector<8x1xf32>
    %562 = vector.extract_strided_slice %15 {offsets = [61, 0], sizes = [1, 8], strides = [1, 1]} : vector<64x16xf32> to vector<1x8xf32>
    %563 = vector.broadcast %561 : vector<8x1xf32> to vector<8x8xf32>
    %564 = vector.broadcast %562 : vector<1x8xf32> to vector<8x8xf32>
    %565 = arith.addf %563, %564 : vector<8x8xf32>
    %cst_99 = arith.constant 0.000000e+00 : f32
    %566 = vector.broadcast %cst_99 : f32 to vector<8x8xf32>
    %567 = arith.select %552, %565, %566 : vector<8x8xi1>, vector<8x8xf32>
    %568 = arith.addf %550, %567 : vector<8x8xf32>
    %c14_i32_100 = arith.constant 14 : i32
    %569 = vector.broadcast %c14_i32_100 : i32 to vector<8x8xi32>
    %570 = arith.cmpi eq, %316, %569 : vector<8x8xi32>
    %571 = vector.extract_strided_slice %13 {offsets = [0, 30], sizes = [8, 1], strides = [1, 1]} : vector<16x64xf32> to vector<8x1xf32>
    %572 = vector.extract_strided_slice %15 {offsets = [30, 0], sizes = [1, 8], strides = [1, 1]} : vector<64x16xf32> to vector<1x8xf32>
    %573 = vector.broadcast %571 : vector<8x1xf32> to vector<8x8xf32>
    %574 = vector.broadcast %572 : vector<1x8xf32> to vector<8x8xf32>
    %575 = arith.addf %573, %574 : vector<8x8xf32>
    %cst_101 = arith.constant 0.000000e+00 : f32
    %576 = vector.broadcast %cst_101 : f32 to vector<8x8xf32>
    %577 = arith.select %570, %575, %576 : vector<8x8xi1>, vector<8x8xf32>
    %578 = arith.addf %560, %577 : vector<8x8xf32>
    %579 = vector.extract_strided_slice %13 {offsets = [0, 62], sizes = [8, 1], strides = [1, 1]} : vector<16x64xf32> to vector<8x1xf32>
    %580 = vector.extract_strided_slice %15 {offsets = [62, 0], sizes = [1, 8], strides = [1, 1]} : vector<64x16xf32> to vector<1x8xf32>
    %581 = vector.broadcast %579 : vector<8x1xf32> to vector<8x8xf32>
    %582 = vector.broadcast %580 : vector<1x8xf32> to vector<8x8xf32>
    %583 = arith.addf %581, %582 : vector<8x8xf32>
    %cst_102 = arith.constant 0.000000e+00 : f32
    %584 = vector.broadcast %cst_102 : f32 to vector<8x8xf32>
    %585 = arith.select %570, %583, %584 : vector<8x8xi1>, vector<8x8xf32>
    %586 = arith.addf %568, %585 : vector<8x8xf32>
    %c15_i32_103 = arith.constant 15 : i32
    %587 = vector.broadcast %c15_i32_103 : i32 to vector<8x8xi32>
    %588 = arith.cmpi eq, %316, %587 : vector<8x8xi32>
    %589 = vector.extract_strided_slice %13 {offsets = [0, 31], sizes = [8, 1], strides = [1, 1]} : vector<16x64xf32> to vector<8x1xf32>
    %590 = vector.extract_strided_slice %15 {offsets = [31, 0], sizes = [1, 8], strides = [1, 1]} : vector<64x16xf32> to vector<1x8xf32>
    %591 = vector.broadcast %589 : vector<8x1xf32> to vector<8x8xf32>
    %592 = vector.broadcast %590 : vector<1x8xf32> to vector<8x8xf32>
    %593 = arith.addf %591, %592 : vector<8x8xf32>
    %cst_104 = arith.constant 0.000000e+00 : f32
    %594 = vector.broadcast %cst_104 : f32 to vector<8x8xf32>
    %595 = arith.select %588, %593, %594 : vector<8x8xi1>, vector<8x8xf32>
    %596 = arith.addf %578, %595 : vector<8x8xf32>
    %597 = vector.extract_strided_slice %13 {offsets = [0, 63], sizes = [8, 1], strides = [1, 1]} : vector<16x64xf32> to vector<8x1xf32>
    %598 = vector.extract_strided_slice %15 {offsets = [63, 0], sizes = [1, 8], strides = [1, 1]} : vector<64x16xf32> to vector<1x8xf32>
    %599 = vector.broadcast %597 : vector<8x1xf32> to vector<8x8xf32>
    %600 = vector.broadcast %598 : vector<1x8xf32> to vector<8x8xf32>
    %601 = arith.addf %599, %600 : vector<8x8xf32>
    %cst_105 = arith.constant 0.000000e+00 : f32
    %602 = vector.broadcast %cst_105 : f32 to vector<8x8xf32>
    %603 = arith.select %588, %601, %602 : vector<8x8xi1>, vector<8x8xf32>
    %604 = arith.addf %586, %603 : vector<8x8xf32>
    %605 = vector.extract_strided_slice %16 {offsets = [0, 0], sizes = [8, 16], strides = [1, 1]} : vector<8x32xf32> to vector<8x16xf32>
    %606 = arith.truncf %605 : vector<8x16xf32> to vector<8x16xbf16>
    %607 = vector.extract_strided_slice %17 {offsets = [0, 0], sizes = [8, 16], strides = [1, 1]} : vector<8x32xf32> to vector<8x16xf32>
    %608 = arith.truncf %607 : vector<8x16xf32> to vector<8x16xbf16>
    %cst_106 = arith.constant dense<0.000000e+00> : vector<8x8xf32>
    %609 = tpu.matmul %606, %608, %cst_106 {dimension_numbers = #tpu.dot_dimension_numbers<[1], [1], [0], [0], [0, 0, 1, 0], [], []>} : vector<8x16xbf16>, vector<8x16xbf16>, vector<8x8xf32> -> vector<8x8xf32>
    %610 = arith.mulf %22, %596 : vector<8x8xf32>
    %611 = arith.addf %609, %610 : vector<8x8xf32>
    %c0_107 = arith.constant 0 : index
    %c0_108 = arith.constant 0 : index
    %c0_109 = arith.constant 0 : index
    %c0_110 = arith.constant 0 : index
    %612 = vector.load %arg18[%c0_107, %c0_108, %c0_109, %c0_110] : memref<2x2x8x8xf32, #tpu.memory_space<vmem>>, vector<1x1x8x8xf32>
    %613 = vector.shape_cast %612 : vector<1x1x8x8xf32> to vector<8x8xf32>
    %614 = vector.shape_cast %611 : vector<8x8xf32> to vector<1x1x8x8xf32>
    tpu.vector_store %arg18[%c0_107, %c0_108, %c0_109, %c0_110], %614 {strides = array<i32>} : memref<2x2x8x8xf32, #tpu.memory_space<vmem>>, vector<1x1x8x8xf32>,
    %615 = vector.broadcast %20 : vector<1x8xf32> to vector<8x8xf32>
    %616 = arith.addf %611, %615 : vector<8x8xf32>
    %cst_111 = arith.constant dense<0xFF800000> : vector<8xf32>
    %617 = vector.multi_reduction <maximumf>, %616, %cst_111 [1] : vector<8x8xf32> to vector<8xf32>
    %618 = vector.shape_cast %617 : vector<8xf32> to vector<8x1xf32>
    %619 = vector.broadcast %618 : vector<8x1xf32> to vector<8x8xf32>
    %620 = arith.subf %616, %619 : vector<8x8xf32>
    %621 = math.exp %620 : vector<8x8xf32>
    %cst_112 = arith.constant dense<0.000000e+00> : vector<8xf32>
    %622 = vector.multi_reduction <add>, %621, %cst_112 [1] : vector<8x8xf32> to vector<8xf32>
    %623 = vector.shape_cast %622 : vector<8xf32> to vector<8x1xf32>
    %624 = tpu.reciprocal %623 {approx = true} : vector<8x1xf32> -> vector<8x1xf32>
    %625 = vector.broadcast %624 : vector<8x1xf32> to vector<8x8xf32>
    %626 = arith.mulf %621, %625 : vector<8x8xf32>
    %627 = vector.extract_strided_slice %18 {offsets = [0, 0], sizes = [8, 16], strides = [1, 1]} : vector<8x32xf32> to vector<8x16xf32>
    %cst_113 = arith.constant dense<0.000000e+00> : vector<8x16xf32>
    %628 = tpu.matmul %626, %627, %cst_113 {dimension_numbers = #tpu.dot_dimension_numbers<[1], [0], [0], [1], [0, 0, 1, 1], [], []>} : vector<8x8xf32>, vector<8x16xf32>, vector<8x16xf32> -> vector<8x16xf32>
    %629 = vector.extract_strided_slice %16 {offsets = [0, 16], sizes = [8, 16], strides = [1, 1]} : vector<8x32xf32> to vector<8x16xf32>
    %630 = arith.truncf %629 : vector<8x16xf32> to vector<8x16xbf16>
    %631 = vector.extract_strided_slice %17 {offsets = [0, 16], sizes = [8, 16], strides = [1, 1]} : vector<8x32xf32> to vector<8x16xf32>
    %632 = arith.truncf %631 : vector<8x16xf32> to vector<8x16xbf16>
    %cst_114 = arith.constant dense<0.000000e+00> : vector<8x8xf32>
    %633 = tpu.matmul %630, %632, %cst_114 {dimension_numbers = #tpu.dot_dimension_numbers<[1], [1], [0], [0], [0, 0, 1, 0], [], []>} : vector<8x16xbf16>, vector<8x16xbf16>, vector<8x8xf32> -> vector<8x8xf32>
    %634 = arith.mulf %22, %604 : vector<8x8xf32>
    %635 = arith.addf %633, %634 : vector<8x8xf32>
    %c0_115 = arith.constant 0 : index
    %c1_116 = arith.constant 1 : index
    %c0_117 = arith.constant 0 : index
    %c0_118 = arith.constant 0 : index
    %636 = vector.load %arg18[%c0_115, %c1_116, %c0_117, %c0_118] : memref<2x2x8x8xf32, #tpu.memory_space<vmem>>, vector<1x1x8x8xf32>
    %637 = vector.shape_cast %636 : vector<1x1x8x8xf32> to vector<8x8xf32>
    %638 = vector.shape_cast %635 : vector<8x8xf32> to vector<1x1x8x8xf32>
    tpu.vector_store %arg18[%c0_115, %c1_116, %c0_117, %c0_118], %638 {strides = array<i32>} : memref<2x2x8x8xf32, #tpu.memory_space<vmem>>, vector<1x1x8x8xf32>,
    %639 = vector.broadcast %20 : vector<1x8xf32> to vector<8x8xf32>
    %640 = arith.addf %635, %639 : vector<8x8xf32>
    %cst_119 = arith.constant dense<0xFF800000> : vector<8xf32>
    %641 = vector.multi_reduction <maximumf>, %640, %cst_119 [1] : vector<8x8xf32> to vector<8xf32>
    %642 = vector.shape_cast %641 : vector<8xf32> to vector<8x1xf32>
    %643 = vector.broadcast %642 : vector<8x1xf32> to vector<8x8xf32>
    %644 = arith.subf %640, %643 : vector<8x8xf32>
    %645 = math.exp %644 : vector<8x8xf32>
    %cst_120 = arith.constant dense<0.000000e+00> : vector<8xf32>
    %646 = vector.multi_reduction <add>, %645, %cst_120 [1] : vector<8x8xf32> to vector<8xf32>
    %647 = vector.shape_cast %646 : vector<8xf32> to vector<8x1xf32>
    %648 = tpu.reciprocal %647 {approx = true} : vector<8x1xf32> -> vector<8x1xf32>
    %649 = vector.broadcast %648 : vector<8x1xf32> to vector<8x8xf32>
    %650 = arith.mulf %645, %649 : vector<8x8xf32>
    %651 = vector.extract_strided_slice %18 {offsets = [0, 16], sizes = [8, 16], strides = [1, 1]} : vector<8x32xf32> to vector<8x16xf32>
    %cst_121 = arith.constant dense<0.000000e+00> : vector<8x16xf32>
    %652 = tpu.matmul %650, %651, %cst_121 {dimension_numbers = #tpu.dot_dimension_numbers<[1], [0], [0], [1], [0, 0, 1, 1], [], []>} : vector<8x8xf32>, vector<8x16xf32>, vector<8x16xf32> -> vector<8x16xf32>
    %653 = tpu.concatenate %628, %652 in 1 : vector<8x16xf32>, vector<8x16xf32> -> vector<8x32xf32>
    %654 = vector.extract_strided_slice %7 {offsets = [8, 0], sizes = [8, 32], strides = [1, 1]} : vector<16x32xf32> to vector<8x32xf32>
    %655 = vector.extract_strided_slice %8 {offsets = [8, 0], sizes = [8, 32], strides = [1, 1]} : vector<16x32xf32> to vector<8x32xf32>
    %656 = vector.extract_strided_slice %9 {offsets = [8, 0], sizes = [8, 32], strides = [1, 1]} : vector<16x32xf32> to vector<8x32xf32>
    %c1_122 = arith.constant 1 : index
    %c0_123 = arith.constant 0 : index
    %c0_124 = arith.constant 0 : index
    %657 = vector.load %arg2[%c1_122, %c0_123, %c0_124] : memref<2x1x8xf32, #tpu.memory_space<vmem>>, vector<1x1x8xf32>
    %658 = vector.shape_cast %657 : vector<1x1x8xf32> to vector<1x8xf32>
    %c1_125 = arith.constant 1 : index
    %c0_126 = arith.constant 0 : index
    %c0_127 = arith.constant 0 : index
    %659 = vector.load %arg3[%c1_125, %c0_126, %c0_127] : memref<2x8x8xf32, #tpu.memory_space<vmem>>, vector<1x8x8xf32>
    %660 = vector.shape_cast %659 : vector<1x8x8xf32> to vector<8x8xf32>
    %cst_128 = arith.constant 0.000000e+00 : f32
    %661 = vector.broadcast %cst_128 : f32 to vector<8x8xf32>
    %cst_129 = arith.constant 0.000000e+00 : f32
    %662 = vector.broadcast %cst_129 : f32 to vector<8x8xf32>
    %c1_130 = arith.constant 1 : index
    %c0_131 = arith.constant 0 : index
    %c0_132 = arith.constant 0 : index
    %c0_133 = arith.constant 0 : index
    %663 = vector.load %arg4[%c1_130, %c0_131, %c0_132, %c0_133] : memref<2x2x8x8xi32, #tpu.memory_space<vmem>>, vector<1x1x8x8xi32>
    %664 = vector.shape_cast %663 : vector<1x1x8x8xi32> to vector<8x8xi32>
    %c0_i32_134 = arith.constant 0 : i32
    %665 = vector.broadcast %c0_i32_134 : i32 to vector<8x8xi32>
    %666 = arith.cmpi eq, %664, %665 : vector<8x8xi32>
    %667 = vector.extract_strided_slice %13 {offsets = [8, 0], sizes = [8, 1], strides = [1, 1]} : vector<16x64xf32> to vector<8x1xf32>
    %668 = vector.extract_strided_slice %15 {offsets = [0, 8], sizes = [1, 8], strides = [1, 1]} : vector<64x16xf32> to vector<1x8xf32>
    %669 = vector.broadcast %667 : vector<8x1xf32> to vector<8x8xf32>
    %670 = vector.broadcast %668 : vector<1x8xf32> to vector<8x8xf32>
    %671 = arith.addf %669, %670 : vector<8x8xf32>
    %cst_135 = arith.constant 0.000000e+00 : f32
    %672 = vector.broadcast %cst_135 : f32 to vector<8x8xf32>
    %673 = arith.select %666, %671, %672 : vector<8x8xi1>, vector<8x8xf32>
    %674 = arith.addf %661, %673 : vector<8x8xf32>
    %675 = vector.extract_strided_slice %13 {offsets = [8, 32], sizes = [8, 1], strides = [1, 1]} : vector<16x64xf32> to vector<8x1xf32>
    %676 = vector.extract_strided_slice %15 {offsets = [32, 8], sizes = [1, 8], strides = [1, 1]} : vector<64x16xf32> to vector<1x8xf32>
    %677 = vector.broadcast %675 : vector<8x1xf32> to vector<8x8xf32>
    %678 = vector.broadcast %676 : vector<1x8xf32> to vector<8x8xf32>
    %679 = arith.addf %677, %678 : vector<8x8xf32>
    %cst_136 = arith.constant 0.000000e+00 : f32
    %680 = vector.broadcast %cst_136 : f32 to vector<8x8xf32>
    %681 = arith.select %666, %679, %680 : vector<8x8xi1>, vector<8x8xf32>
    %682 = arith.addf %662, %681 : vector<8x8xf32>
    %c1_i32_137 = arith.constant 1 : i32
    %683 = vector.broadcast %c1_i32_137 : i32 to vector<8x8xi32>
    %684 = arith.cmpi eq, %664, %683 : vector<8x8xi32>
    %685 = vector.extract_strided_slice %13 {offsets = [8, 1], sizes = [8, 1], strides = [1, 1]} : vector<16x64xf32> to vector<8x1xf32>
    %686 = vector.extract_strided_slice %15 {offsets = [1, 8], sizes = [1, 8], strides = [1, 1]} : vector<64x16xf32> to vector<1x8xf32>
    %687 = vector.broadcast %685 : vector<8x1xf32> to vector<8x8xf32>
    %688 = vector.broadcast %686 : vector<1x8xf32> to vector<8x8xf32>
    %689 = arith.addf %687, %688 : vector<8x8xf32>
    %cst_138 = arith.constant 0.000000e+00 : f32
    %690 = vector.broadcast %cst_138 : f32 to vector<8x8xf32>
    %691 = arith.select %684, %689, %690 : vector<8x8xi1>, vector<8x8xf32>
    %692 = arith.addf %674, %691 : vector<8x8xf32>
    %693 = vector.extract_strided_slice %13 {offsets = [8, 33], sizes = [8, 1], strides = [1, 1]} : vector<16x64xf32> to vector<8x1xf32>
    %694 = vector.extract_strided_slice %15 {offsets = [33, 8], sizes = [1, 8], strides = [1, 1]} : vector<64x16xf32> to vector<1x8xf32>
    %695 = vector.broadcast %693 : vector<8x1xf32> to vector<8x8xf32>
    %696 = vector.broadcast %694 : vector<1x8xf32> to vector<8x8xf32>
    %697 = arith.addf %695, %696 : vector<8x8xf32>
    %cst_139 = arith.constant 0.000000e+00 : f32
    %698 = vector.broadcast %cst_139 : f32 to vector<8x8xf32>
    %699 = arith.select %684, %697, %698 : vector<8x8xi1>, vector<8x8xf32>
    %700 = arith.addf %682, %699 : vector<8x8xf32>
    %c2_i32_140 = arith.constant 2 : i32
    %701 = vector.broadcast %c2_i32_140 : i32 to vector<8x8xi32>
    %702 = arith.cmpi eq, %664, %701 : vector<8x8xi32>
    %703 = vector.extract_strided_slice %13 {offsets = [8, 2], sizes = [8, 1], strides = [1, 1]} : vector<16x64xf32> to vector<8x1xf32>
    %704 = vector.extract_strided_slice %15 {offsets = [2, 8], sizes = [1, 8], strides = [1, 1]} : vector<64x16xf32> to vector<1x8xf32>
    %705 = vector.broadcast %703 : vector<8x1xf32> to vector<8x8xf32>
    %706 = vector.broadcast %704 : vector<1x8xf32> to vector<8x8xf32>
    %707 = arith.addf %705, %706 : vector<8x8xf32>
    %cst_141 = arith.constant 0.000000e+00 : f32
    %708 = vector.broadcast %cst_141 : f32 to vector<8x8xf32>
    %709 = arith.select %702, %707, %708 : vector<8x8xi1>, vector<8x8xf32>
    %710 = arith.addf %692, %709 : vector<8x8xf32>
    %711 = vector.extract_strided_slice %13 {offsets = [8, 34], sizes = [8, 1], strides = [1, 1]} : vector<16x64xf32> to vector<8x1xf32>
    %712 = vector.extract_strided_slice %15 {offsets = [34, 8], sizes = [1, 8], strides = [1, 1]} : vector<64x16xf32> to vector<1x8xf32>
    %713 = vector.broadcast %711 : vector<8x1xf32> to vector<8x8xf32>
    %714 = vector.broadcast %712 : vector<1x8xf32> to vector<8x8xf32>
    %715 = arith.addf %713, %714 : vector<8x8xf32>
    %cst_142 = arith.constant 0.000000e+00 : f32
    %716 = vector.broadcast %cst_142 : f32 to vector<8x8xf32>
    %717 = arith.select %702, %715, %716 : vector<8x8xi1>, vector<8x8xf32>
    %718 = arith.addf %700, %717 : vector<8x8xf32>
    %c3_i32_143 = arith.constant 3 : i32
    %719 = vector.broadcast %c3_i32_143 : i32 to vector<8x8xi32>
    %720 = arith.cmpi eq, %664, %719 : vector<8x8xi32>
    %721 = vector.extract_strided_slice %13 {offsets = [8, 3], sizes = [8, 1], strides = [1, 1]} : vector<16x64xf32> to vector<8x1xf32>
    %722 = vector.extract_strided_slice %15 {offsets = [3, 8], sizes = [1, 8], strides = [1, 1]} : vector<64x16xf32> to vector<1x8xf32>
    %723 = vector.broadcast %721 : vector<8x1xf32> to vector<8x8xf32>
    %724 = vector.broadcast %722 : vector<1x8xf32> to vector<8x8xf32>
    %725 = arith.addf %723, %724 : vector<8x8xf32>
    %cst_144 = arith.constant 0.000000e+00 : f32
    %726 = vector.broadcast %cst_144 : f32 to vector<8x8xf32>
    %727 = arith.select %720, %725, %726 : vector<8x8xi1>, vector<8x8xf32>
    %728 = arith.addf %710, %727 : vector<8x8xf32>
    %729 = vector.extract_strided_slice %13 {offsets = [8, 35], sizes = [8, 1], strides = [1, 1]} : vector<16x64xf32> to vector<8x1xf32>
    %730 = vector.extract_strided_slice %15 {offsets = [35, 8], sizes = [1, 8], strides = [1, 1]} : vector<64x16xf32> to vector<1x8xf32>
    %731 = vector.broadcast %729 : vector<8x1xf32> to vector<8x8xf32>
    %732 = vector.broadcast %730 : vector<1x8xf32> to vector<8x8xf32>
    %733 = arith.addf %731, %732 : vector<8x8xf32>
    %cst_145 = arith.constant 0.000000e+00 : f32
    %734 = vector.broadcast %cst_145 : f32 to vector<8x8xf32>
    %735 = arith.select %720, %733, %734 : vector<8x8xi1>, vector<8x8xf32>
    %736 = arith.addf %718, %735 : vector<8x8xf32>
    %c4_i32_146 = arith.constant 4 : i32
    %737 = vector.broadcast %c4_i32_146 : i32 to vector<8x8xi32>
    %738 = arith.cmpi eq, %664, %737 : vector<8x8xi32>
    %739 = vector.extract_strided_slice %13 {offsets = [8, 4], sizes = [8, 1], strides = [1, 1]} : vector<16x64xf32> to vector<8x1xf32>
    %740 = vector.extract_strided_slice %15 {offsets = [4, 8], sizes = [1, 8], strides = [1, 1]} : vector<64x16xf32> to vector<1x8xf32>
    %741 = vector.broadcast %739 : vector<8x1xf32> to vector<8x8xf32>
    %742 = vector.broadcast %740 : vector<1x8xf32> to vector<8x8xf32>
    %743 = arith.addf %741, %742 : vector<8x8xf32>
    %cst_147 = arith.constant 0.000000e+00 : f32
    %744 = vector.broadcast %cst_147 : f32 to vector<8x8xf32>
    %745 = arith.select %738, %743, %744 : vector<8x8xi1>, vector<8x8xf32>
    %746 = arith.addf %728, %745 : vector<8x8xf32>
    %747 = vector.extract_strided_slice %13 {offsets = [8, 36], sizes = [8, 1], strides = [1, 1]} : vector<16x64xf32> to vector<8x1xf32>
    %748 = vector.extract_strided_slice %15 {offsets = [36, 8], sizes = [1, 8], strides = [1, 1]} : vector<64x16xf32> to vector<1x8xf32>
    %749 = vector.broadcast %747 : vector<8x1xf32> to vector<8x8xf32>
    %750 = vector.broadcast %748 : vector<1x8xf32> to vector<8x8xf32>
    %751 = arith.addf %749, %750 : vector<8x8xf32>
    %cst_148 = arith.constant 0.000000e+00 : f32
    %752 = vector.broadcast %cst_148 : f32 to vector<8x8xf32>
    %753 = arith.select %738, %751, %752 : vector<8x8xi1>, vector<8x8xf32>
    %754 = arith.addf %736, %753 : vector<8x8xf32>
    %c5_i32_149 = arith.constant 5 : i32
    %755 = vector.broadcast %c5_i32_149 : i32 to vector<8x8xi32>
    %756 = arith.cmpi eq, %664, %755 : vector<8x8xi32>
    %757 = vector.extract_strided_slice %13 {offsets = [8, 5], sizes = [8, 1], strides = [1, 1]} : vector<16x64xf32> to vector<8x1xf32>
    %758 = vector.extract_strided_slice %15 {offsets = [5, 8], sizes = [1, 8], strides = [1, 1]} : vector<64x16xf32> to vector<1x8xf32>
    %759 = vector.broadcast %757 : vector<8x1xf32> to vector<8x8xf32>
    %760 = vector.broadcast %758 : vector<1x8xf32> to vector<8x8xf32>
    %761 = arith.addf %759, %760 : vector<8x8xf32>
    %cst_150 = arith.constant 0.000000e+00 : f32
    %762 = vector.broadcast %cst_150 : f32 to vector<8x8xf32>
    %763 = arith.select %756, %761, %762 : vector<8x8xi1>, vector<8x8xf32>
    %764 = arith.addf %746, %763 : vector<8x8xf32>
    %765 = vector.extract_strided_slice %13 {offsets = [8, 37], sizes = [8, 1], strides = [1, 1]} : vector<16x64xf32> to vector<8x1xf32>
    %766 = vector.extract_strided_slice %15 {offsets = [37, 8], sizes = [1, 8], strides = [1, 1]} : vector<64x16xf32> to vector<1x8xf32>
    %767 = vector.broadcast %765 : vector<8x1xf32> to vector<8x8xf32>
    %768 = vector.broadcast %766 : vector<1x8xf32> to vector<8x8xf32>
    %769 = arith.addf %767, %768 : vector<8x8xf32>
    %cst_151 = arith.constant 0.000000e+00 : f32
    %770 = vector.broadcast %cst_151 : f32 to vector<8x8xf32>
    %771 = arith.select %756, %769, %770 : vector<8x8xi1>, vector<8x8xf32>
    %772 = arith.addf %754, %771 : vector<8x8xf32>
    %c6_i32_152 = arith.constant 6 : i32
    %773 = vector.broadcast %c6_i32_152 : i32 to vector<8x8xi32>
    %774 = arith.cmpi eq, %664, %773 : vector<8x8xi32>
    %775 = vector.extract_strided_slice %13 {offsets = [8, 6], sizes = [8, 1], strides = [1, 1]} : vector<16x64xf32> to vector<8x1xf32>
    %776 = vector.extract_strided_slice %15 {offsets = [6, 8], sizes = [1, 8], strides = [1, 1]} : vector<64x16xf32> to vector<1x8xf32>
    %777 = vector.broadcast %775 : vector<8x1xf32> to vector<8x8xf32>
    %778 = vector.broadcast %776 : vector<1x8xf32> to vector<8x8xf32>
    %779 = arith.addf %777, %778 : vector<8x8xf32>
    %cst_153 = arith.constant 0.000000e+00 : f32
    %780 = vector.broadcast %cst_153 : f32 to vector<8x8xf32>
    %781 = arith.select %774, %779, %780 : vector<8x8xi1>, vector<8x8xf32>
    %782 = arith.addf %764, %781 : vector<8x8xf32>
    %783 = vector.extract_strided_slice %13 {offsets = [8, 38], sizes = [8, 1], strides = [1, 1]} : vector<16x64xf32> to vector<8x1xf32>
    %784 = vector.extract_strided_slice %15 {offsets = [38, 8], sizes = [1, 8], strides = [1, 1]} : vector<64x16xf32> to vector<1x8xf32>
    %785 = vector.broadcast %783 : vector<8x1xf32> to vector<8x8xf32>
    %786 = vector.broadcast %784 : vector<1x8xf32> to vector<8x8xf32>
    %787 = arith.addf %785, %786 : vector<8x8xf32>
    %cst_154 = arith.constant 0.000000e+00 : f32
    %788 = vector.broadcast %cst_154 : f32 to vector<8x8xf32>
    %789 = arith.select %774, %787, %788 : vector<8x8xi1>, vector<8x8xf32>
    %790 = arith.addf %772, %789 : vector<8x8xf32>
    %c7_i32_155 = arith.constant 7 : i32
    %791 = vector.broadcast %c7_i32_155 : i32 to vector<8x8xi32>
    %792 = arith.cmpi eq, %664, %791 : vector<8x8xi32>
    %793 = vector.extract_strided_slice %13 {offsets = [8, 7], sizes = [8, 1], strides = [1, 1]} : vector<16x64xf32> to vector<8x1xf32>
    %794 = vector.extract_strided_slice %15 {offsets = [7, 8], sizes = [1, 8], strides = [1, 1]} : vector<64x16xf32> to vector<1x8xf32>
    %795 = vector.broadcast %793 : vector<8x1xf32> to vector<8x8xf32>
    %796 = vector.broadcast %794 : vector<1x8xf32> to vector<8x8xf32>
    %797 = arith.addf %795, %796 : vector<8x8xf32>
    %cst_156 = arith.constant 0.000000e+00 : f32
    %798 = vector.broadcast %cst_156 : f32 to vector<8x8xf32>
    %799 = arith.select %792, %797, %798 : vector<8x8xi1>, vector<8x8xf32>
    %800 = arith.addf %782, %799 : vector<8x8xf32>
    %801 = vector.extract_strided_slice %13 {offsets = [8, 39], sizes = [8, 1], strides = [1, 1]} : vector<16x64xf32> to vector<8x1xf32>
    %802 = vector.extract_strided_slice %15 {offsets = [39, 8], sizes = [1, 8], strides = [1, 1]} : vector<64x16xf32> to vector<1x8xf32>
    %803 = vector.broadcast %801 : vector<8x1xf32> to vector<8x8xf32>
    %804 = vector.broadcast %802 : vector<1x8xf32> to vector<8x8xf32>
    %805 = arith.addf %803, %804 : vector<8x8xf32>
    %cst_157 = arith.constant 0.000000e+00 : f32
    %806 = vector.broadcast %cst_157 : f32 to vector<8x8xf32>
    %807 = arith.select %792, %805, %806 : vector<8x8xi1>, vector<8x8xf32>
    %808 = arith.addf %790, %807 : vector<8x8xf32>
    %c8_i32_158 = arith.constant 8 : i32
    %809 = vector.broadcast %c8_i32_158 : i32 to vector<8x8xi32>
    %810 = arith.cmpi eq, %664, %809 : vector<8x8xi32>
    %811 = vector.extract_strided_slice %13 {offsets = [8, 8], sizes = [8, 1], strides = [1, 1]} : vector<16x64xf32> to vector<8x1xf32>
    %812 = vector.extract_strided_slice %15 {offsets = [8, 8], sizes = [1, 8], strides = [1, 1]} : vector<64x16xf32> to vector<1x8xf32>
    %813 = vector.broadcast %811 : vector<8x1xf32> to vector<8x8xf32>
    %814 = vector.broadcast %812 : vector<1x8xf32> to vector<8x8xf32>
    %815 = arith.addf %813, %814 : vector<8x8xf32>
    %cst_159 = arith.constant 0.000000e+00 : f32
    %816 = vector.broadcast %cst_159 : f32 to vector<8x8xf32>
    %817 = arith.select %810, %815, %816 : vector<8x8xi1>, vector<8x8xf32>
    %818 = arith.addf %800, %817 : vector<8x8xf32>
    %819 = vector.extract_strided_slice %13 {offsets = [8, 40], sizes = [8, 1], strides = [1, 1]} : vector<16x64xf32> to vector<8x1xf32>
    %820 = vector.extract_strided_slice %15 {offsets = [40, 8], sizes = [1, 8], strides = [1, 1]} : vector<64x16xf32> to vector<1x8xf32>
    %821 = vector.broadcast %819 : vector<8x1xf32> to vector<8x8xf32>
    %822 = vector.broadcast %820 : vector<1x8xf32> to vector<8x8xf32>
    %823 = arith.addf %821, %822 : vector<8x8xf32>
    %cst_160 = arith.constant 0.000000e+00 : f32
    %824 = vector.broadcast %cst_160 : f32 to vector<8x8xf32>
    %825 = arith.select %810, %823, %824 : vector<8x8xi1>, vector<8x8xf32>
    %826 = arith.addf %808, %825 : vector<8x8xf32>
    %c9_i32_161 = arith.constant 9 : i32
    %827 = vector.broadcast %c9_i32_161 : i32 to vector<8x8xi32>
    %828 = arith.cmpi eq, %664, %827 : vector<8x8xi32>
    %829 = vector.extract_strided_slice %13 {offsets = [8, 9], sizes = [8, 1], strides = [1, 1]} : vector<16x64xf32> to vector<8x1xf32>
    %830 = vector.extract_strided_slice %15 {offsets = [9, 8], sizes = [1, 8], strides = [1, 1]} : vector<64x16xf32> to vector<1x8xf32>
    %831 = vector.broadcast %829 : vector<8x1xf32> to vector<8x8xf32>
    %832 = vector.broadcast %830 : vector<1x8xf32> to vector<8x8xf32>
    %833 = arith.addf %831, %832 : vector<8x8xf32>
    %cst_162 = arith.constant 0.000000e+00 : f32
    %834 = vector.broadcast %cst_162 : f32 to vector<8x8xf32>
    %835 = arith.select %828, %833, %834 : vector<8x8xi1>, vector<8x8xf32>
    %836 = arith.addf %818, %835 : vector<8x8xf32>
    %837 = vector.extract_strided_slice %13 {offsets = [8, 41], sizes = [8, 1], strides = [1, 1]} : vector<16x64xf32> to vector<8x1xf32>
    %838 = vector.extract_strided_slice %15 {offsets = [41, 8], sizes = [1, 8], strides = [1, 1]} : vector<64x16xf32> to vector<1x8xf32>
    %839 = vector.broadcast %837 : vector<8x1xf32> to vector<8x8xf32>
    %840 = vector.broadcast %838 : vector<1x8xf32> to vector<8x8xf32>
    %841 = arith.addf %839, %840 : vector<8x8xf32>
    %cst_163 = arith.constant 0.000000e+00 : f32
    %842 = vector.broadcast %cst_163 : f32 to vector<8x8xf32>
    %843 = arith.select %828, %841, %842 : vector<8x8xi1>, vector<8x8xf32>
    %844 = arith.addf %826, %843 : vector<8x8xf32>
    %c10_i32_164 = arith.constant 10 : i32
    %845 = vector.broadcast %c10_i32_164 : i32 to vector<8x8xi32>
    %846 = arith.cmpi eq, %664, %845 : vector<8x8xi32>
    %847 = vector.extract_strided_slice %13 {offsets = [8, 10], sizes = [8, 1], strides = [1, 1]} : vector<16x64xf32> to vector<8x1xf32>
    %848 = vector.extract_strided_slice %15 {offsets = [10, 8], sizes = [1, 8], strides = [1, 1]} : vector<64x16xf32> to vector<1x8xf32>
    %849 = vector.broadcast %847 : vector<8x1xf32> to vector<8x8xf32>
    %850 = vector.broadcast %848 : vector<1x8xf32> to vector<8x8xf32>
    %851 = arith.addf %849, %850 : vector<8x8xf32>
    %cst_165 = arith.constant 0.000000e+00 : f32
    %852 = vector.broadcast %cst_165 : f32 to vector<8x8xf32>
    %853 = arith.select %846, %851, %852 : vector<8x8xi1>, vector<8x8xf32>
    %854 = arith.addf %836, %853 : vector<8x8xf32>
    %855 = vector.extract_strided_slice %13 {offsets = [8, 42], sizes = [8, 1], strides = [1, 1]} : vector<16x64xf32> to vector<8x1xf32>
    %856 = vector.extract_strided_slice %15 {offsets = [42, 8], sizes = [1, 8], strides = [1, 1]} : vector<64x16xf32> to vector<1x8xf32>
    %857 = vector.broadcast %855 : vector<8x1xf32> to vector<8x8xf32>
    %858 = vector.broadcast %856 : vector<1x8xf32> to vector<8x8xf32>
    %859 = arith.addf %857, %858 : vector<8x8xf32>
    %cst_166 = arith.constant 0.000000e+00 : f32
    %860 = vector.broadcast %cst_166 : f32 to vector<8x8xf32>
    %861 = arith.select %846, %859, %860 : vector<8x8xi1>, vector<8x8xf32>
    %862 = arith.addf %844, %861 : vector<8x8xf32>
    %c11_i32_167 = arith.constant 11 : i32
    %863 = vector.broadcast %c11_i32_167 : i32 to vector<8x8xi32>
    %864 = arith.cmpi eq, %664, %863 : vector<8x8xi32>
    %865 = vector.extract_strided_slice %13 {offsets = [8, 11], sizes = [8, 1], strides = [1, 1]} : vector<16x64xf32> to vector<8x1xf32>
    %866 = vector.extract_strided_slice %15 {offsets = [11, 8], sizes = [1, 8], strides = [1, 1]} : vector<64x16xf32> to vector<1x8xf32>
    %867 = vector.broadcast %865 : vector<8x1xf32> to vector<8x8xf32>
    %868 = vector.broadcast %866 : vector<1x8xf32> to vector<8x8xf32>
    %869 = arith.addf %867, %868 : vector<8x8xf32>
    %cst_168 = arith.constant 0.000000e+00 : f32
    %870 = vector.broadcast %cst_168 : f32 to vector<8x8xf32>
    %871 = arith.select %864, %869, %870 : vector<8x8xi1>, vector<8x8xf32>
    %872 = arith.addf %854, %871 : vector<8x8xf32>
    %873 = vector.extract_strided_slice %13 {offsets = [8, 43], sizes = [8, 1], strides = [1, 1]} : vector<16x64xf32> to vector<8x1xf32>
    %874 = vector.extract_strided_slice %15 {offsets = [43, 8], sizes = [1, 8], strides = [1, 1]} : vector<64x16xf32> to vector<1x8xf32>
    %875 = vector.broadcast %873 : vector<8x1xf32> to vector<8x8xf32>
    %876 = vector.broadcast %874 : vector<1x8xf32> to vector<8x8xf32>
    %877 = arith.addf %875, %876 : vector<8x8xf32>
    %cst_169 = arith.constant 0.000000e+00 : f32
    %878 = vector.broadcast %cst_169 : f32 to vector<8x8xf32>
    %879 = arith.select %864, %877, %878 : vector<8x8xi1>, vector<8x8xf32>
    %880 = arith.addf %862, %879 : vector<8x8xf32>
    %c12_i32_170 = arith.constant 12 : i32
    %881 = vector.broadcast %c12_i32_170 : i32 to vector<8x8xi32>
    %882 = arith.cmpi eq, %664, %881 : vector<8x8xi32>
    %883 = vector.extract_strided_slice %13 {offsets = [8, 12], sizes = [8, 1], strides = [1, 1]} : vector<16x64xf32> to vector<8x1xf32>
    %884 = vector.extract_strided_slice %15 {offsets = [12, 8], sizes = [1, 8], strides = [1, 1]} : vector<64x16xf32> to vector<1x8xf32>
    %885 = vector.broadcast %883 : vector<8x1xf32> to vector<8x8xf32>
    %886 = vector.broadcast %884 : vector<1x8xf32> to vector<8x8xf32>
    %887 = arith.addf %885, %886 : vector<8x8xf32>
    %cst_171 = arith.constant 0.000000e+00 : f32
    %888 = vector.broadcast %cst_171 : f32 to vector<8x8xf32>
    %889 = arith.select %882, %887, %888 : vector<8x8xi1>, vector<8x8xf32>
    %890 = arith.addf %872, %889 : vector<8x8xf32>
    %891 = vector.extract_strided_slice %13 {offsets = [8, 44], sizes = [8, 1], strides = [1, 1]} : vector<16x64xf32> to vector<8x1xf32>
    %892 = vector.extract_strided_slice %15 {offsets = [44, 8], sizes = [1, 8], strides = [1, 1]} : vector<64x16xf32> to vector<1x8xf32>
    %893 = vector.broadcast %891 : vector<8x1xf32> to vector<8x8xf32>
    %894 = vector.broadcast %892 : vector<1x8xf32> to vector<8x8xf32>
    %895 = arith.addf %893, %894 : vector<8x8xf32>
    %cst_172 = arith.constant 0.000000e+00 : f32
    %896 = vector.broadcast %cst_172 : f32 to vector<8x8xf32>
    %897 = arith.select %882, %895, %896 : vector<8x8xi1>, vector<8x8xf32>
    %898 = arith.addf %880, %897 : vector<8x8xf32>
    %c13_i32_173 = arith.constant 13 : i32
    %899 = vector.broadcast %c13_i32_173 : i32 to vector<8x8xi32>
    %900 = arith.cmpi eq, %664, %899 : vector<8x8xi32>
    %901 = vector.extract_strided_slice %13 {offsets = [8, 13], sizes = [8, 1], strides = [1, 1]} : vector<16x64xf32> to vector<8x1xf32>
    %902 = vector.extract_strided_slice %15 {offsets = [13, 8], sizes = [1, 8], strides = [1, 1]} : vector<64x16xf32> to vector<1x8xf32>
    %903 = vector.broadcast %901 : vector<8x1xf32> to vector<8x8xf32>
    %904 = vector.broadcast %902 : vector<1x8xf32> to vector<8x8xf32>
    %905 = arith.addf %903, %904 : vector<8x8xf32>
    %cst_174 = arith.constant 0.000000e+00 : f32
    %906 = vector.broadcast %cst_174 : f32 to vector<8x8xf32>
    %907 = arith.select %900, %905, %906 : vector<8x8xi1>, vector<8x8xf32>
    %908 = arith.addf %890, %907 : vector<8x8xf32>
    %909 = vector.extract_strided_slice %13 {offsets = [8, 45], sizes = [8, 1], strides = [1, 1]} : vector<16x64xf32> to vector<8x1xf32>
    %910 = vector.extract_strided_slice %15 {offsets = [45, 8], sizes = [1, 8], strides = [1, 1]} : vector<64x16xf32> to vector<1x8xf32>
    %911 = vector.broadcast %909 : vector<8x1xf32> to vector<8x8xf32>
    %912 = vector.broadcast %910 : vector<1x8xf32> to vector<8x8xf32>
    %913 = arith.addf %911, %912 : vector<8x8xf32>
    %cst_175 = arith.constant 0.000000e+00 : f32
    %914 = vector.broadcast %cst_175 : f32 to vector<8x8xf32>
    %915 = arith.select %900, %913, %914 : vector<8x8xi1>, vector<8x8xf32>
    %916 = arith.addf %898, %915 : vector<8x8xf32>
    %c14_i32_176 = arith.constant 14 : i32
    %917 = vector.broadcast %c14_i32_176 : i32 to vector<8x8xi32>
    %918 = arith.cmpi eq, %664, %917 : vector<8x8xi32>
    %919 = vector.extract_strided_slice %13 {offsets = [8, 14], sizes = [8, 1], strides = [1, 1]} : vector<16x64xf32> to vector<8x1xf32>
    %920 = vector.extract_strided_slice %15 {offsets = [14, 8], sizes = [1, 8], strides = [1, 1]} : vector<64x16xf32> to vector<1x8xf32>
    %921 = vector.broadcast %919 : vector<8x1xf32> to vector<8x8xf32>
    %922 = vector.broadcast %920 : vector<1x8xf32> to vector<8x8xf32>
    %923 = arith.addf %921, %922 : vector<8x8xf32>
    %cst_177 = arith.constant 0.000000e+00 : f32
    %924 = vector.broadcast %cst_177 : f32 to vector<8x8xf32>
    %925 = arith.select %918, %923, %924 : vector<8x8xi1>, vector<8x8xf32>
    %926 = arith.addf %908, %925 : vector<8x8xf32>
    %927 = vector.extract_strided_slice %13 {offsets = [8, 46], sizes = [8, 1], strides = [1, 1]} : vector<16x64xf32> to vector<8x1xf32>
    %928 = vector.extract_strided_slice %15 {offsets = [46, 8], sizes = [1, 8], strides = [1, 1]} : vector<64x16xf32> to vector<1x8xf32>
    %929 = vector.broadcast %927 : vector<8x1xf32> to vector<8x8xf32>
    %930 = vector.broadcast %928 : vector<1x8xf32> to vector<8x8xf32>
    %931 = arith.addf %929, %930 : vector<8x8xf32>
    %cst_178 = arith.constant 0.000000e+00 : f32
    %932 = vector.broadcast %cst_178 : f32 to vector<8x8xf32>
    %933 = arith.select %918, %931, %932 : vector<8x8xi1>, vector<8x8xf32>
    %934 = arith.addf %916, %933 : vector<8x8xf32>
    %c15_i32_179 = arith.constant 15 : i32
    %935 = vector.broadcast %c15_i32_179 : i32 to vector<8x8xi32>
    %936 = arith.cmpi eq, %664, %935 : vector<8x8xi32>
    %937 = vector.extract_strided_slice %13 {offsets = [8, 15], sizes = [8, 1], strides = [1, 1]} : vector<16x64xf32> to vector<8x1xf32>
    %938 = vector.extract_strided_slice %15 {offsets = [15, 8], sizes = [1, 8], strides = [1, 1]} : vector<64x16xf32> to vector<1x8xf32>
    %939 = vector.broadcast %937 : vector<8x1xf32> to vector<8x8xf32>
    %940 = vector.broadcast %938 : vector<1x8xf32> to vector<8x8xf32>
    %941 = arith.addf %939, %940 : vector<8x8xf32>
    %cst_180 = arith.constant 0.000000e+00 : f32
    %942 = vector.broadcast %cst_180 : f32 to vector<8x8xf32>
    %943 = arith.select %936, %941, %942 : vector<8x8xi1>, vector<8x8xf32>
    %944 = arith.addf %926, %943 : vector<8x8xf32>
    %945 = vector.extract_strided_slice %13 {offsets = [8, 47], sizes = [8, 1], strides = [1, 1]} : vector<16x64xf32> to vector<8x1xf32>
    %946 = vector.extract_strided_slice %15 {offsets = [47, 8], sizes = [1, 8], strides = [1, 1]} : vector<64x16xf32> to vector<1x8xf32>
    %947 = vector.broadcast %945 : vector<8x1xf32> to vector<8x8xf32>
    %948 = vector.broadcast %946 : vector<1x8xf32> to vector<8x8xf32>
    %949 = arith.addf %947, %948 : vector<8x8xf32>
    %cst_181 = arith.constant 0.000000e+00 : f32
    %950 = vector.broadcast %cst_181 : f32 to vector<8x8xf32>
    %951 = arith.select %936, %949, %950 : vector<8x8xi1>, vector<8x8xf32>
    %952 = arith.addf %934, %951 : vector<8x8xf32>
    %c1_182 = arith.constant 1 : index
    %c1_183 = arith.constant 1 : index
    %c0_184 = arith.constant 0 : index
    %c0_185 = arith.constant 0 : index
    %953 = vector.load %arg4[%c1_182, %c1_183, %c0_184, %c0_185] : memref<2x2x8x8xi32, #tpu.memory_space<vmem>>, vector<1x1x8x8xi32>
    %954 = vector.shape_cast %953 : vector<1x1x8x8xi32> to vector<8x8xi32>
    %c0_i32_186 = arith.constant 0 : i32
    %955 = vector.broadcast %c0_i32_186 : i32 to vector<8x8xi32>
    %956 = arith.cmpi eq, %954, %955 : vector<8x8xi32>
    %957 = vector.extract_strided_slice %13 {offsets = [8, 16], sizes = [8, 1], strides = [1, 1]} : vector<16x64xf32> to vector<8x1xf32>
    %958 = vector.extract_strided_slice %15 {offsets = [16, 8], sizes = [1, 8], strides = [1, 1]} : vector<64x16xf32> to vector<1x8xf32>
    %959 = vector.broadcast %957 : vector<8x1xf32> to vector<8x8xf32>
    %960 = vector.broadcast %958 : vector<1x8xf32> to vector<8x8xf32>
    %961 = arith.addf %959, %960 : vector<8x8xf32>
    %cst_187 = arith.constant 0.000000e+00 : f32
    %962 = vector.broadcast %cst_187 : f32 to vector<8x8xf32>
    %963 = arith.select %956, %961, %962 : vector<8x8xi1>, vector<8x8xf32>
    %964 = arith.addf %944, %963 : vector<8x8xf32>
    %965 = vector.extract_strided_slice %13 {offsets = [8, 48], sizes = [8, 1], strides = [1, 1]} : vector<16x64xf32> to vector<8x1xf32>
    %966 = vector.extract_strided_slice %15 {offsets = [48, 8], sizes = [1, 8], strides = [1, 1]} : vector<64x16xf32> to vector<1x8xf32>
    %967 = vector.broadcast %965 : vector<8x1xf32> to vector<8x8xf32>
    %968 = vector.broadcast %966 : vector<1x8xf32> to vector<8x8xf32>
    %969 = arith.addf %967, %968 : vector<8x8xf32>
    %cst_188 = arith.constant 0.000000e+00 : f32
    %970 = vector.broadcast %cst_188 : f32 to vector<8x8xf32>
    %971 = arith.select %956, %969, %970 : vector<8x8xi1>, vector<8x8xf32>
    %972 = arith.addf %952, %971 : vector<8x8xf32>
    %c1_i32_189 = arith.constant 1 : i32
    %973 = vector.broadcast %c1_i32_189 : i32 to vector<8x8xi32>
    %974 = arith.cmpi eq, %954, %973 : vector<8x8xi32>
    %975 = vector.extract_strided_slice %13 {offsets = [8, 17], sizes = [8, 1], strides = [1, 1]} : vector<16x64xf32> to vector<8x1xf32>
    %976 = vector.extract_strided_slice %15 {offsets = [17, 8], sizes = [1, 8], strides = [1, 1]} : vector<64x16xf32> to vector<1x8xf32>
    %977 = vector.broadcast %975 : vector<8x1xf32> to vector<8x8xf32>
    %978 = vector.broadcast %976 : vector<1x8xf32> to vector<8x8xf32>
    %979 = arith.addf %977, %978 : vector<8x8xf32>
    %cst_190 = arith.constant 0.000000e+00 : f32
    %980 = vector.broadcast %cst_190 : f32 to vector<8x8xf32>
    %981 = arith.select %974, %979, %980 : vector<8x8xi1>, vector<8x8xf32>
    %982 = arith.addf %964, %981 : vector<8x8xf32>
    %983 = vector.extract_strided_slice %13 {offsets = [8, 49], sizes = [8, 1], strides = [1, 1]} : vector<16x64xf32> to vector<8x1xf32>
    %984 = vector.extract_strided_slice %15 {offsets = [49, 8], sizes = [1, 8], strides = [1, 1]} : vector<64x16xf32> to vector<1x8xf32>
    %985 = vector.broadcast %983 : vector<8x1xf32> to vector<8x8xf32>
    %986 = vector.broadcast %984 : vector<1x8xf32> to vector<8x8xf32>
    %987 = arith.addf %985, %986 : vector<8x8xf32>
    %cst_191 = arith.constant 0.000000e+00 : f32
    %988 = vector.broadcast %cst_191 : f32 to vector<8x8xf32>
    %989 = arith.select %974, %987, %988 : vector<8x8xi1>, vector<8x8xf32>
    %990 = arith.addf %972, %989 : vector<8x8xf32>
    %c2_i32_192 = arith.constant 2 : i32
    %991 = vector.broadcast %c2_i32_192 : i32 to vector<8x8xi32>
    %992 = arith.cmpi eq, %954, %991 : vector<8x8xi32>
    %993 = vector.extract_strided_slice %13 {offsets = [8, 18], sizes = [8, 1], strides = [1, 1]} : vector<16x64xf32> to vector<8x1xf32>
    %994 = vector.extract_strided_slice %15 {offsets = [18, 8], sizes = [1, 8], strides = [1, 1]} : vector<64x16xf32> to vector<1x8xf32>
    %995 = vector.broadcast %993 : vector<8x1xf32> to vector<8x8xf32>
    %996 = vector.broadcast %994 : vector<1x8xf32> to vector<8x8xf32>
    %997 = arith.addf %995, %996 : vector<8x8xf32>
    %cst_193 = arith.constant 0.000000e+00 : f32
    %998 = vector.broadcast %cst_193 : f32 to vector<8x8xf32>
    %999 = arith.select %992, %997, %998 : vector<8x8xi1>, vector<8x8xf32>
    %1000 = arith.addf %982, %999 : vector<8x8xf32>
    %1001 = vector.extract_strided_slice %13 {offsets = [8, 50], sizes = [8, 1], strides = [1, 1]} : vector<16x64xf32> to vector<8x1xf32>
    %1002 = vector.extract_strided_slice %15 {offsets = [50, 8], sizes = [1, 8], strides = [1, 1]} : vector<64x16xf32> to vector<1x8xf32>
    %1003 = vector.broadcast %1001 : vector<8x1xf32> to vector<8x8xf32>
    %1004 = vector.broadcast %1002 : vector<1x8xf32> to vector<8x8xf32>
    %1005 = arith.addf %1003, %1004 : vector<8x8xf32>
    %cst_194 = arith.constant 0.000000e+00 : f32
    %1006 = vector.broadcast %cst_194 : f32 to vector<8x8xf32>
    %1007 = arith.select %992, %1005, %1006 : vector<8x8xi1>, vector<8x8xf32>
    %1008 = arith.addf %990, %1007 : vector<8x8xf32>
    %c3_i32_195 = arith.constant 3 : i32
    %1009 = vector.broadcast %c3_i32_195 : i32 to vector<8x8xi32>
    %1010 = arith.cmpi eq, %954, %1009 : vector<8x8xi32>
    %1011 = vector.extract_strided_slice %13 {offsets = [8, 19], sizes = [8, 1], strides = [1, 1]} : vector<16x64xf32> to vector<8x1xf32>
    %1012 = vector.extract_strided_slice %15 {offsets = [19, 8], sizes = [1, 8], strides = [1, 1]} : vector<64x16xf32> to vector<1x8xf32>
    %1013 = vector.broadcast %1011 : vector<8x1xf32> to vector<8x8xf32>
    %1014 = vector.broadcast %1012 : vector<1x8xf32> to vector<8x8xf32>
    %1015 = arith.addf %1013, %1014 : vector<8x8xf32>
    %cst_196 = arith.constant 0.000000e+00 : f32
    %1016 = vector.broadcast %cst_196 : f32 to vector<8x8xf32>
    %1017 = arith.select %1010, %1015, %1016 : vector<8x8xi1>, vector<8x8xf32>
    %1018 = arith.addf %1000, %1017 : vector<8x8xf32>
    %1019 = vector.extract_strided_slice %13 {offsets = [8, 51], sizes = [8, 1], strides = [1, 1]} : vector<16x64xf32> to vector<8x1xf32>
    %1020 = vector.extract_strided_slice %15 {offsets = [51, 8], sizes = [1, 8], strides = [1, 1]} : vector<64x16xf32> to vector<1x8xf32>
    %1021 = vector.broadcast %1019 : vector<8x1xf32> to vector<8x8xf32>
    %1022 = vector.broadcast %1020 : vector<1x8xf32> to vector<8x8xf32>
    %1023 = arith.addf %1021, %1022 : vector<8x8xf32>
    %cst_197 = arith.constant 0.000000e+00 : f32
    %1024 = vector.broadcast %cst_197 : f32 to vector<8x8xf32>
    %1025 = arith.select %1010, %1023, %1024 : vector<8x8xi1>, vector<8x8xf32>
    %1026 = arith.addf %1008, %1025 : vector<8x8xf32>
    %c4_i32_198 = arith.constant 4 : i32
    %1027 = vector.broadcast %c4_i32_198 : i32 to vector<8x8xi32>
    %1028 = arith.cmpi eq, %954, %1027 : vector<8x8xi32>
    %1029 = vector.extract_strided_slice %13 {offsets = [8, 20], sizes = [8, 1], strides = [1, 1]} : vector<16x64xf32> to vector<8x1xf32>
    %1030 = vector.extract_strided_slice %15 {offsets = [20, 8], sizes = [1, 8], strides = [1, 1]} : vector<64x16xf32> to vector<1x8xf32>
    %1031 = vector.broadcast %1029 : vector<8x1xf32> to vector<8x8xf32>
    %1032 = vector.broadcast %1030 : vector<1x8xf32> to vector<8x8xf32>
    %1033 = arith.addf %1031, %1032 : vector<8x8xf32>
    %cst_199 = arith.constant 0.000000e+00 : f32
    %1034 = vector.broadcast %cst_199 : f32 to vector<8x8xf32>
    %1035 = arith.select %1028, %1033, %1034 : vector<8x8xi1>, vector<8x8xf32>
    %1036 = arith.addf %1018, %1035 : vector<8x8xf32>
    %1037 = vector.extract_strided_slice %13 {offsets = [8, 52], sizes = [8, 1], strides = [1, 1]} : vector<16x64xf32> to vector<8x1xf32>
    %1038 = vector.extract_strided_slice %15 {offsets = [52, 8], sizes = [1, 8], strides = [1, 1]} : vector<64x16xf32> to vector<1x8xf32>
    %1039 = vector.broadcast %1037 : vector<8x1xf32> to vector<8x8xf32>
    %1040 = vector.broadcast %1038 : vector<1x8xf32> to vector<8x8xf32>
    %1041 = arith.addf %1039, %1040 : vector<8x8xf32>
    %cst_200 = arith.constant 0.000000e+00 : f32
    %1042 = vector.broadcast %cst_200 : f32 to vector<8x8xf32>
    %1043 = arith.select %1028, %1041, %1042 : vector<8x8xi1>, vector<8x8xf32>
    %1044 = arith.addf %1026, %1043 : vector<8x8xf32>
    %c5_i32_201 = arith.constant 5 : i32
    %1045 = vector.broadcast %c5_i32_201 : i32 to vector<8x8xi32>
    %1046 = arith.cmpi eq, %954, %1045 : vector<8x8xi32>
    %1047 = vector.extract_strided_slice %13 {offsets = [8, 21], sizes = [8, 1], strides = [1, 1]} : vector<16x64xf32> to vector<8x1xf32>
    %1048 = vector.extract_strided_slice %15 {offsets = [21, 8], sizes = [1, 8], strides = [1, 1]} : vector<64x16xf32> to vector<1x8xf32>
    %1049 = vector.broadcast %1047 : vector<8x1xf32> to vector<8x8xf32>
    %1050 = vector.broadcast %1048 : vector<1x8xf32> to vector<8x8xf32>
    %1051 = arith.addf %1049, %1050 : vector<8x8xf32>
    %cst_202 = arith.constant 0.000000e+00 : f32
    %1052 = vector.broadcast %cst_202 : f32 to vector<8x8xf32>
    %1053 = arith.select %1046, %1051, %1052 : vector<8x8xi1>, vector<8x8xf32>
    %1054 = arith.addf %1036, %1053 : vector<8x8xf32>
    %1055 = vector.extract_strided_slice %13 {offsets = [8, 53], sizes = [8, 1], strides = [1, 1]} : vector<16x64xf32> to vector<8x1xf32>
    %1056 = vector.extract_strided_slice %15 {offsets = [53, 8], sizes = [1, 8], strides = [1, 1]} : vector<64x16xf32> to vector<1x8xf32>
    %1057 = vector.broadcast %1055 : vector<8x1xf32> to vector<8x8xf32>
    %1058 = vector.broadcast %1056 : vector<1x8xf32> to vector<8x8xf32>
    %1059 = arith.addf %1057, %1058 : vector<8x8xf32>
    %cst_203 = arith.constant 0.000000e+00 : f32
    %1060 = vector.broadcast %cst_203 : f32 to vector<8x8xf32>
    %1061 = arith.select %1046, %1059, %1060 : vector<8x8xi1>, vector<8x8xf32>
    %1062 = arith.addf %1044, %1061 : vector<8x8xf32>
    %c6_i32_204 = arith.constant 6 : i32
    %1063 = vector.broadcast %c6_i32_204 : i32 to vector<8x8xi32>
    %1064 = arith.cmpi eq, %954, %1063 : vector<8x8xi32>
    %1065 = vector.extract_strided_slice %13 {offsets = [8, 22], sizes = [8, 1], strides = [1, 1]} : vector<16x64xf32> to vector<8x1xf32>
    %1066 = vector.extract_strided_slice %15 {offsets = [22, 8], sizes = [1, 8], strides = [1, 1]} : vector<64x16xf32> to vector<1x8xf32>
    %1067 = vector.broadcast %1065 : vector<8x1xf32> to vector<8x8xf32>
    %1068 = vector.broadcast %1066 : vector<1x8xf32> to vector<8x8xf32>
    %1069 = arith.addf %1067, %1068 : vector<8x8xf32>
    %cst_205 = arith.constant 0.000000e+00 : f32
    %1070 = vector.broadcast %cst_205 : f32 to vector<8x8xf32>
    %1071 = arith.select %1064, %1069, %1070 : vector<8x8xi1>, vector<8x8xf32>
    %1072 = arith.addf %1054, %1071 : vector<8x8xf32>
    %1073 = vector.extract_strided_slice %13 {offsets = [8, 54], sizes = [8, 1], strides = [1, 1]} : vector<16x64xf32> to vector<8x1xf32>
    %1074 = vector.extract_strided_slice %15 {offsets = [54, 8], sizes = [1, 8], strides = [1, 1]} : vector<64x16xf32> to vector<1x8xf32>
    %1075 = vector.broadcast %1073 : vector<8x1xf32> to vector<8x8xf32>
    %1076 = vector.broadcast %1074 : vector<1x8xf32> to vector<8x8xf32>
    %1077 = arith.addf %1075, %1076 : vector<8x8xf32>
    %cst_206 = arith.constant 0.000000e+00 : f32
    %1078 = vector.broadcast %cst_206 : f32 to vector<8x8xf32>
    %1079 = arith.select %1064, %1077, %1078 : vector<8x8xi1>, vector<8x8xf32>
    %1080 = arith.addf %1062, %1079 : vector<8x8xf32>
    %c7_i32_207 = arith.constant 7 : i32
    %1081 = vector.broadcast %c7_i32_207 : i32 to vector<8x8xi32>
    %1082 = arith.cmpi eq, %954, %1081 : vector<8x8xi32>
    %1083 = vector.extract_strided_slice %13 {offsets = [8, 23], sizes = [8, 1], strides = [1, 1]} : vector<16x64xf32> to vector<8x1xf32>
    %1084 = vector.extract_strided_slice %15 {offsets = [23, 8], sizes = [1, 8], strides = [1, 1]} : vector<64x16xf32> to vector<1x8xf32>
    %1085 = vector.broadcast %1083 : vector<8x1xf32> to vector<8x8xf32>
    %1086 = vector.broadcast %1084 : vector<1x8xf32> to vector<8x8xf32>
    %1087 = arith.addf %1085, %1086 : vector<8x8xf32>
    %cst_208 = arith.constant 0.000000e+00 : f32
    %1088 = vector.broadcast %cst_208 : f32 to vector<8x8xf32>
    %1089 = arith.select %1082, %1087, %1088 : vector<8x8xi1>, vector<8x8xf32>
    %1090 = arith.addf %1072, %1089 : vector<8x8xf32>
    %1091 = vector.extract_strided_slice %13 {offsets = [8, 55], sizes = [8, 1], strides = [1, 1]} : vector<16x64xf32> to vector<8x1xf32>
    %1092 = vector.extract_strided_slice %15 {offsets = [55, 8], sizes = [1, 8], strides = [1, 1]} : vector<64x16xf32> to vector<1x8xf32>
    %1093 = vector.broadcast %1091 : vector<8x1xf32> to vector<8x8xf32>
    %1094 = vector.broadcast %1092 : vector<1x8xf32> to vector<8x8xf32>
    %1095 = arith.addf %1093, %1094 : vector<8x8xf32>
    %cst_209 = arith.constant 0.000000e+00 : f32
    %1096 = vector.broadcast %cst_209 : f32 to vector<8x8xf32>
    %1097 = arith.select %1082, %1095, %1096 : vector<8x8xi1>, vector<8x8xf32>
    %1098 = arith.addf %1080, %1097 : vector<8x8xf32>
    %c8_i32_210 = arith.constant 8 : i32
    %1099 = vector.broadcast %c8_i32_210 : i32 to vector<8x8xi32>
    %1100 = arith.cmpi eq, %954, %1099 : vector<8x8xi32>
    %1101 = vector.extract_strided_slice %13 {offsets = [8, 24], sizes = [8, 1], strides = [1, 1]} : vector<16x64xf32> to vector<8x1xf32>
    %1102 = vector.extract_strided_slice %15 {offsets = [24, 8], sizes = [1, 8], strides = [1, 1]} : vector<64x16xf32> to vector<1x8xf32>
    %1103 = vector.broadcast %1101 : vector<8x1xf32> to vector<8x8xf32>
    %1104 = vector.broadcast %1102 : vector<1x8xf32> to vector<8x8xf32>
    %1105 = arith.addf %1103, %1104 : vector<8x8xf32>
    %cst_211 = arith.constant 0.000000e+00 : f32
    %1106 = vector.broadcast %cst_211 : f32 to vector<8x8xf32>
    %1107 = arith.select %1100, %1105, %1106 : vector<8x8xi1>, vector<8x8xf32>
    %1108 = arith.addf %1090, %1107 : vector<8x8xf32>
    %1109 = vector.extract_strided_slice %13 {offsets = [8, 56], sizes = [8, 1], strides = [1, 1]} : vector<16x64xf32> to vector<8x1xf32>
    %1110 = vector.extract_strided_slice %15 {offsets = [56, 8], sizes = [1, 8], strides = [1, 1]} : vector<64x16xf32> to vector<1x8xf32>
    %1111 = vector.broadcast %1109 : vector<8x1xf32> to vector<8x8xf32>
    %1112 = vector.broadcast %1110 : vector<1x8xf32> to vector<8x8xf32>
    %1113 = arith.addf %1111, %1112 : vector<8x8xf32>
    %cst_212 = arith.constant 0.000000e+00 : f32
    %1114 = vector.broadcast %cst_212 : f32 to vector<8x8xf32>
    %1115 = arith.select %1100, %1113, %1114 : vector<8x8xi1>, vector<8x8xf32>
    %1116 = arith.addf %1098, %1115 : vector<8x8xf32>
    %c9_i32_213 = arith.constant 9 : i32
    %1117 = vector.broadcast %c9_i32_213 : i32 to vector<8x8xi32>
    %1118 = arith.cmpi eq, %954, %1117 : vector<8x8xi32>
    %1119 = vector.extract_strided_slice %13 {offsets = [8, 25], sizes = [8, 1], strides = [1, 1]} : vector<16x64xf32> to vector<8x1xf32>
    %1120 = vector.extract_strided_slice %15 {offsets = [25, 8], sizes = [1, 8], strides = [1, 1]} : vector<64x16xf32> to vector<1x8xf32>
    %1121 = vector.broadcast %1119 : vector<8x1xf32> to vector<8x8xf32>
    %1122 = vector.broadcast %1120 : vector<1x8xf32> to vector<8x8xf32>
    %1123 = arith.addf %1121, %1122 : vector<8x8xf32>
    %cst_214 = arith.constant 0.000000e+00 : f32
    %1124 = vector.broadcast %cst_214 : f32 to vector<8x8xf32>
    %1125 = arith.select %1118, %1123, %1124 : vector<8x8xi1>, vector<8x8xf32>
    %1126 = arith.addf %1108, %1125 : vector<8x8xf32>
    %1127 = vector.extract_strided_slice %13 {offsets = [8, 57], sizes = [8, 1], strides = [1, 1]} : vector<16x64xf32> to vector<8x1xf32>
    %1128 = vector.extract_strided_slice %15 {offsets = [57, 8], sizes = [1, 8], strides = [1, 1]} : vector<64x16xf32> to vector<1x8xf32>
    %1129 = vector.broadcast %1127 : vector<8x1xf32> to vector<8x8xf32>
    %1130 = vector.broadcast %1128 : vector<1x8xf32> to vector<8x8xf32>
    %1131 = arith.addf %1129, %1130 : vector<8x8xf32>
    %cst_215 = arith.constant 0.000000e+00 : f32
    %1132 = vector.broadcast %cst_215 : f32 to vector<8x8xf32>
    %1133 = arith.select %1118, %1131, %1132 : vector<8x8xi1>, vector<8x8xf32>
    %1134 = arith.addf %1116, %1133 : vector<8x8xf32>
    %c10_i32_216 = arith.constant 10 : i32
    %1135 = vector.broadcast %c10_i32_216 : i32 to vector<8x8xi32>
    %1136 = arith.cmpi eq, %954, %1135 : vector<8x8xi32>
    %1137 = vector.extract_strided_slice %13 {offsets = [8, 26], sizes = [8, 1], strides = [1, 1]} : vector<16x64xf32> to vector<8x1xf32>
    %1138 = vector.extract_strided_slice %15 {offsets = [26, 8], sizes = [1, 8], strides = [1, 1]} : vector<64x16xf32> to vector<1x8xf32>
    %1139 = vector.broadcast %1137 : vector<8x1xf32> to vector<8x8xf32>
    %1140 = vector.broadcast %1138 : vector<1x8xf32> to vector<8x8xf32>
    %1141 = arith.addf %1139, %1140 : vector<8x8xf32>
    %cst_217 = arith.constant 0.000000e+00 : f32
    %1142 = vector.broadcast %cst_217 : f32 to vector<8x8xf32>
    %1143 = arith.select %1136, %1141, %1142 : vector<8x8xi1>, vector<8x8xf32>
    %1144 = arith.addf %1126, %1143 : vector<8x8xf32>
    %1145 = vector.extract_strided_slice %13 {offsets = [8, 58], sizes = [8, 1], strides = [1, 1]} : vector<16x64xf32> to vector<8x1xf32>
    %1146 = vector.extract_strided_slice %15 {offsets = [58, 8], sizes = [1, 8], strides = [1, 1]} : vector<64x16xf32> to vector<1x8xf32>
    %1147 = vector.broadcast %1145 : vector<8x1xf32> to vector<8x8xf32>
    %1148 = vector.broadcast %1146 : vector<1x8xf32> to vector<8x8xf32>
    %1149 = arith.addf %1147, %1148 : vector<8x8xf32>
    %cst_218 = arith.constant 0.000000e+00 : f32
    %1150 = vector.broadcast %cst_218 : f32 to vector<8x8xf32>
    %1151 = arith.select %1136, %1149, %1150 : vector<8x8xi1>, vector<8x8xf32>
    %1152 = arith.addf %1134, %1151 : vector<8x8xf32>
    %c11_i32_219 = arith.constant 11 : i32
    %1153 = vector.broadcast %c11_i32_219 : i32 to vector<8x8xi32>
    %1154 = arith.cmpi eq, %954, %1153 : vector<8x8xi32>
    %1155 = vector.extract_strided_slice %13 {offsets = [8, 27], sizes = [8, 1], strides = [1, 1]} : vector<16x64xf32> to vector<8x1xf32>
    %1156 = vector.extract_strided_slice %15 {offsets = [27, 8], sizes = [1, 8], strides = [1, 1]} : vector<64x16xf32> to vector<1x8xf32>
    %1157 = vector.broadcast %1155 : vector<8x1xf32> to vector<8x8xf32>
    %1158 = vector.broadcast %1156 : vector<1x8xf32> to vector<8x8xf32>
    %1159 = arith.addf %1157, %1158 : vector<8x8xf32>
    %cst_220 = arith.constant 0.000000e+00 : f32
    %1160 = vector.broadcast %cst_220 : f32 to vector<8x8xf32>
    %1161 = arith.select %1154, %1159, %1160 : vector<8x8xi1>, vector<8x8xf32>
    %1162 = arith.addf %1144, %1161 : vector<8x8xf32>
    %1163 = vector.extract_strided_slice %13 {offsets = [8, 59], sizes = [8, 1], strides = [1, 1]} : vector<16x64xf32> to vector<8x1xf32>
    %1164 = vector.extract_strided_slice %15 {offsets = [59, 8], sizes = [1, 8], strides = [1, 1]} : vector<64x16xf32> to vector<1x8xf32>
    %1165 = vector.broadcast %1163 : vector<8x1xf32> to vector<8x8xf32>
    %1166 = vector.broadcast %1164 : vector<1x8xf32> to vector<8x8xf32>
    %1167 = arith.addf %1165, %1166 : vector<8x8xf32>
    %cst_221 = arith.constant 0.000000e+00 : f32
    %1168 = vector.broadcast %cst_221 : f32 to vector<8x8xf32>
    %1169 = arith.select %1154, %1167, %1168 : vector<8x8xi1>, vector<8x8xf32>
    %1170 = arith.addf %1152, %1169 : vector<8x8xf32>
    %c12_i32_222 = arith.constant 12 : i32
    %1171 = vector.broadcast %c12_i32_222 : i32 to vector<8x8xi32>
    %1172 = arith.cmpi eq, %954, %1171 : vector<8x8xi32>
    %1173 = vector.extract_strided_slice %13 {offsets = [8, 28], sizes = [8, 1], strides = [1, 1]} : vector<16x64xf32> to vector<8x1xf32>
    %1174 = vector.extract_strided_slice %15 {offsets = [28, 8], sizes = [1, 8], strides = [1, 1]} : vector<64x16xf32> to vector<1x8xf32>
    %1175 = vector.broadcast %1173 : vector<8x1xf32> to vector<8x8xf32>
    %1176 = vector.broadcast %1174 : vector<1x8xf32> to vector<8x8xf32>
    %1177 = arith.addf %1175, %1176 : vector<8x8xf32>
    %cst_223 = arith.constant 0.000000e+00 : f32
    %1178 = vector.broadcast %cst_223 : f32 to vector<8x8xf32>
    %1179 = arith.select %1172, %1177, %1178 : vector<8x8xi1>, vector<8x8xf32>
    %1180 = arith.addf %1162, %1179 : vector<8x8xf32>
    %1181 = vector.extract_strided_slice %13 {offsets = [8, 60], sizes = [8, 1], strides = [1, 1]} : vector<16x64xf32> to vector<8x1xf32>
    %1182 = vector.extract_strided_slice %15 {offsets = [60, 8], sizes = [1, 8], strides = [1, 1]} : vector<64x16xf32> to vector<1x8xf32>
    %1183 = vector.broadcast %1181 : vector<8x1xf32> to vector<8x8xf32>
    %1184 = vector.broadcast %1182 : vector<1x8xf32> to vector<8x8xf32>
    %1185 = arith.addf %1183, %1184 : vector<8x8xf32>
    %cst_224 = arith.constant 0.000000e+00 : f32
    %1186 = vector.broadcast %cst_224 : f32 to vector<8x8xf32>
    %1187 = arith.select %1172, %1185, %1186 : vector<8x8xi1>, vector<8x8xf32>
    %1188 = arith.addf %1170, %1187 : vector<8x8xf32>
    %c13_i32_225 = arith.constant 13 : i32
    %1189 = vector.broadcast %c13_i32_225 : i32 to vector<8x8xi32>
    %1190 = arith.cmpi eq, %954, %1189 : vector<8x8xi32>
    %1191 = vector.extract_strided_slice %13 {offsets = [8, 29], sizes = [8, 1], strides = [1, 1]} : vector<16x64xf32> to vector<8x1xf32>
    %1192 = vector.extract_strided_slice %15 {offsets = [29, 8], sizes = [1, 8], strides = [1, 1]} : vector<64x16xf32> to vector<1x8xf32>
    %1193 = vector.broadcast %1191 : vector<8x1xf32> to vector<8x8xf32>
    %1194 = vector.broadcast %1192 : vector<1x8xf32> to vector<8x8xf32>
    %1195 = arith.addf %1193, %1194 : vector<8x8xf32>
    %cst_226 = arith.constant 0.000000e+00 : f32
    %1196 = vector.broadcast %cst_226 : f32 to vector<8x8xf32>
    %1197 = arith.select %1190, %1195, %1196 : vector<8x8xi1>, vector<8x8xf32>
    %1198 = arith.addf %1180, %1197 : vector<8x8xf32>
    %1199 = vector.extract_strided_slice %13 {offsets = [8, 61], sizes = [8, 1], strides = [1, 1]} : vector<16x64xf32> to vector<8x1xf32>
    %1200 = vector.extract_strided_slice %15 {offsets = [61, 8], sizes = [1, 8], strides = [1, 1]} : vector<64x16xf32> to vector<1x8xf32>
    %1201 = vector.broadcast %1199 : vector<8x1xf32> to vector<8x8xf32>
    %1202 = vector.broadcast %1200 : vector<1x8xf32> to vector<8x8xf32>
    %1203 = arith.addf %1201, %1202 : vector<8x8xf32>
    %cst_227 = arith.constant 0.000000e+00 : f32
    %1204 = vector.broadcast %cst_227 : f32 to vector<8x8xf32>
    %1205 = arith.select %1190, %1203, %1204 : vector<8x8xi1>, vector<8x8xf32>
    %1206 = arith.addf %1188, %1205 : vector<8x8xf32>
    %c14_i32_228 = arith.constant 14 : i32
    %1207 = vector.broadcast %c14_i32_228 : i32 to vector<8x8xi32>
    %1208 = arith.cmpi eq, %954, %1207 : vector<8x8xi32>
    %1209 = vector.extract_strided_slice %13 {offsets = [8, 30], sizes = [8, 1], strides = [1, 1]} : vector<16x64xf32> to vector<8x1xf32>
    %1210 = vector.extract_strided_slice %15 {offsets = [30, 8], sizes = [1, 8], strides = [1, 1]} : vector<64x16xf32> to vector<1x8xf32>
    %1211 = vector.broadcast %1209 : vector<8x1xf32> to vector<8x8xf32>
    %1212 = vector.broadcast %1210 : vector<1x8xf32> to vector<8x8xf32>
    %1213 = arith.addf %1211, %1212 : vector<8x8xf32>
    %cst_229 = arith.constant 0.000000e+00 : f32
    %1214 = vector.broadcast %cst_229 : f32 to vector<8x8xf32>
    %1215 = arith.select %1208, %1213, %1214 : vector<8x8xi1>, vector<8x8xf32>
    %1216 = arith.addf %1198, %1215 : vector<8x8xf32>
    %1217 = vector.extract_strided_slice %13 {offsets = [8, 62], sizes = [8, 1], strides = [1, 1]} : vector<16x64xf32> to vector<8x1xf32>
    %1218 = vector.extract_strided_slice %15 {offsets = [62, 8], sizes = [1, 8], strides = [1, 1]} : vector<64x16xf32> to vector<1x8xf32>
    %1219 = vector.broadcast %1217 : vector<8x1xf32> to vector<8x8xf32>
    %1220 = vector.broadcast %1218 : vector<1x8xf32> to vector<8x8xf32>
    %1221 = arith.addf %1219, %1220 : vector<8x8xf32>
    %cst_230 = arith.constant 0.000000e+00 : f32
    %1222 = vector.broadcast %cst_230 : f32 to vector<8x8xf32>
    %1223 = arith.select %1208, %1221, %1222 : vector<8x8xi1>, vector<8x8xf32>
    %1224 = arith.addf %1206, %1223 : vector<8x8xf32>
    %c15_i32_231 = arith.constant 15 : i32
    %1225 = vector.broadcast %c15_i32_231 : i32 to vector<8x8xi32>
    %1226 = arith.cmpi eq, %954, %1225 : vector<8x8xi32>
    %1227 = vector.extract_strided_slice %13 {offsets = [8, 31], sizes = [8, 1], strides = [1, 1]} : vector<16x64xf32> to vector<8x1xf32>
    %1228 = vector.extract_strided_slice %15 {offsets = [31, 8], sizes = [1, 8], strides = [1, 1]} : vector<64x16xf32> to vector<1x8xf32>
    %1229 = vector.broadcast %1227 : vector<8x1xf32> to vector<8x8xf32>
    %1230 = vector.broadcast %1228 : vector<1x8xf32> to vector<8x8xf32>
    %1231 = arith.addf %1229, %1230 : vector<8x8xf32>
    %cst_232 = arith.constant 0.000000e+00 : f32
    %1232 = vector.broadcast %cst_232 : f32 to vector<8x8xf32>
    %1233 = arith.select %1226, %1231, %1232 : vector<8x8xi1>, vector<8x8xf32>
    %1234 = arith.addf %1216, %1233 : vector<8x8xf32>
    %1235 = vector.extract_strided_slice %13 {offsets = [8, 63], sizes = [8, 1], strides = [1, 1]} : vector<16x64xf32> to vector<8x1xf32>
    %1236 = vector.extract_strided_slice %15 {offsets = [63, 8], sizes = [1, 8], strides = [1, 1]} : vector<64x16xf32> to vector<1x8xf32>
    %1237 = vector.broadcast %1235 : vector<8x1xf32> to vector<8x8xf32>
    %1238 = vector.broadcast %1236 : vector<1x8xf32> to vector<8x8xf32>
    %1239 = arith.addf %1237, %1238 : vector<8x8xf32>
    %cst_233 = arith.constant 0.000000e+00 : f32
    %1240 = vector.broadcast %cst_233 : f32 to vector<8x8xf32>
    %1241 = arith.select %1226, %1239, %1240 : vector<8x8xi1>, vector<8x8xf32>
    %1242 = arith.addf %1224, %1241 : vector<8x8xf32>
    %1243 = vector.extract_strided_slice %654 {offsets = [0, 0], sizes = [8, 16], strides = [1, 1]} : vector<8x32xf32> to vector<8x16xf32>
    %1244 = arith.truncf %1243 : vector<8x16xf32> to vector<8x16xbf16>
    %1245 = vector.extract_strided_slice %655 {offsets = [0, 0], sizes = [8, 16], strides = [1, 1]} : vector<8x32xf32> to vector<8x16xf32>
    %1246 = arith.truncf %1245 : vector<8x16xf32> to vector<8x16xbf16>
    %cst_234 = arith.constant dense<0.000000e+00> : vector<8x8xf32>
    %1247 = tpu.matmul %1244, %1246, %cst_234 {dimension_numbers = #tpu.dot_dimension_numbers<[1], [1], [0], [0], [0, 0, 1, 0], [], []>} : vector<8x16xbf16>, vector<8x16xbf16>, vector<8x8xf32> -> vector<8x8xf32>
    %1248 = arith.mulf %660, %1234 : vector<8x8xf32>
    %1249 = arith.addf %1247, %1248 : vector<8x8xf32>
    %c1_235 = arith.constant 1 : index
    %c0_236 = arith.constant 0 : index
    %c0_237 = arith.constant 0 : index
    %c0_238 = arith.constant 0 : index
    %1250 = vector.load %arg18[%c1_235, %c0_236, %c0_237, %c0_238] : memref<2x2x8x8xf32, #tpu.memory_space<vmem>>, vector<1x1x8x8xf32>
    %1251 = vector.shape_cast %1250 : vector<1x1x8x8xf32> to vector<8x8xf32>
    %1252 = vector.shape_cast %1249 : vector<8x8xf32> to vector<1x1x8x8xf32>
    tpu.vector_store %arg18[%c1_235, %c0_236, %c0_237, %c0_238], %1252 {strides = array<i32>} : memref<2x2x8x8xf32, #tpu.memory_space<vmem>>, vector<1x1x8x8xf32>,
    %1253 = vector.broadcast %658 : vector<1x8xf32> to vector<8x8xf32>
    %1254 = arith.addf %1249, %1253 : vector<8x8xf32>
    %cst_239 = arith.constant dense<0xFF800000> : vector<8xf32>
    %1255 = vector.multi_reduction <maximumf>, %1254, %cst_239 [1] : vector<8x8xf32> to vector<8xf32>
    %1256 = vector.shape_cast %1255 : vector<8xf32> to vector<8x1xf32>
    %1257 = vector.broadcast %1256 : vector<8x1xf32> to vector<8x8xf32>
    %1258 = arith.subf %1254, %1257 : vector<8x8xf32>
    %1259 = math.exp %1258 : vector<8x8xf32>
    %cst_240 = arith.constant dense<0.000000e+00> : vector<8xf32>
    %1260 = vector.multi_reduction <add>, %1259, %cst_240 [1] : vector<8x8xf32> to vector<8xf32>
    %1261 = vector.shape_cast %1260 : vector<8xf32> to vector<8x1xf32>
    %1262 = tpu.reciprocal %1261 {approx = true} : vector<8x1xf32> -> vector<8x1xf32>
    %1263 = vector.broadcast %1262 : vector<8x1xf32> to vector<8x8xf32>
    %1264 = arith.mulf %1259, %1263 : vector<8x8xf32>
    %1265 = vector.extract_strided_slice %656 {offsets = [0, 0], sizes = [8, 16], strides = [1, 1]} : vector<8x32xf32> to vector<8x16xf32>
    %cst_241 = arith.constant dense<0.000000e+00> : vector<8x16xf32>
    %1266 = tpu.matmul %1264, %1265, %cst_241 {dimension_numbers = #tpu.dot_dimension_numbers<[1], [0], [0], [1], [0, 0, 1, 1], [], []>} : vector<8x8xf32>, vector<8x16xf32>, vector<8x16xf32> -> vector<8x16xf32>
    %1267 = vector.extract_strided_slice %654 {offsets = [0, 16], sizes = [8, 16], strides = [1, 1]} : vector<8x32xf32> to vector<8x16xf32>
    %1268 = arith.truncf %1267 : vector<8x16xf32> to vector<8x16xbf16>
    %1269 = vector.extract_strided_slice %655 {offsets = [0, 16], sizes = [8, 16], strides = [1, 1]} : vector<8x32xf32> to vector<8x16xf32>
    %1270 = arith.truncf %1269 : vector<8x16xf32> to vector<8x16xbf16>
    %cst_242 = arith.constant dense<0.000000e+00> : vector<8x8xf32>
    %1271 = tpu.matmul %1268, %1270, %cst_242 {dimension_numbers = #tpu.dot_dimension_numbers<[1], [1], [0], [0], [0, 0, 1, 0], [], []>} : vector<8x16xbf16>, vector<8x16xbf16>, vector<8x8xf32> -> vector<8x8xf32>
    %1272 = arith.mulf %660, %1242 : vector<8x8xf32>
    %1273 = arith.addf %1271, %1272 : vector<8x8xf32>
    %c1_243 = arith.constant 1 : index
    %c1_244 = arith.constant 1 : index
    %c0_245 = arith.constant 0 : index
    %c0_246 = arith.constant 0 : index
    %1274 = vector.load %arg18[%c1_243, %c1_244, %c0_245, %c0_246] : memref<2x2x8x8xf32, #tpu.memory_space<vmem>>, vector<1x1x8x8xf32>
    %1275 = vector.shape_cast %1274 : vector<1x1x8x8xf32> to vector<8x8xf32>
    %1276 = vector.shape_cast %1273 : vector<8x8xf32> to vector<1x1x8x8xf32>
    tpu.vector_store %arg18[%c1_243, %c1_244, %c0_245, %c0_246], %1276 {strides = array<i32>} : memref<2x2x8x8xf32, #tpu.memory_space<vmem>>, vector<1x1x8x8xf32>,
    %1277 = vector.broadcast %658 : vector<1x8xf32> to vector<8x8xf32>
    %1278 = arith.addf %1273, %1277 : vector<8x8xf32>
    %cst_247 = arith.constant dense<0xFF800000> : vector<8xf32>
    %1279 = vector.multi_reduction <maximumf>, %1278, %cst_247 [1] : vector<8x8xf32> to vector<8xf32>
    %1280 = vector.shape_cast %1279 : vector<8xf32> to vector<8x1xf32>
    %1281 = vector.broadcast %1280 : vector<8x1xf32> to vector<8x8xf32>
    %1282 = arith.subf %1278, %1281 : vector<8x8xf32>
    %1283 = math.exp %1282 : vector<8x8xf32>
    %cst_248 = arith.constant dense<0.000000e+00> : vector<8xf32>
    %1284 = vector.multi_reduction <add>, %1283, %cst_248 [1] : vector<8x8xf32> to vector<8xf32>
    %1285 = vector.shape_cast %1284 : vector<8xf32> to vector<8x1xf32>
    %1286 = tpu.reciprocal %1285 {approx = true} : vector<8x1xf32> -> vector<8x1xf32>
    %1287 = vector.broadcast %1286 : vector<8x1xf32> to vector<8x8xf32>
    %1288 = arith.mulf %1283, %1287 : vector<8x8xf32>
    %1289 = vector.extract_strided_slice %656 {offsets = [0, 16], sizes = [8, 16], strides = [1, 1]} : vector<8x32xf32> to vector<8x16xf32>
    %cst_249 = arith.constant dense<0.000000e+00> : vector<8x16xf32>
    %1290 = tpu.matmul %1288, %1289, %cst_249 {dimension_numbers = #tpu.dot_dimension_numbers<[1], [0], [0], [1], [0, 0, 1, 1], [], []>} : vector<8x8xf32>, vector<8x16xf32>, vector<8x16xf32> -> vector<8x16xf32>
    %1291 = tpu.concatenate %1266, %1290 in 1 : vector<8x16xf32>, vector<8x16xf32> -> vector<8x32xf32>
    %1292 = tpu.concatenate %653, %1291 in 0 : vector<8x32xf32>, vector<8x32xf32> -> vector<16x32xf32>
    %cst_250 = arith.constant 5.000000e-01 : f32
    %1293 = vector.broadcast %cst_250 : f32 to vector<16x32xf32>
    %1294 = arith.mulf %1293, %1292 : vector<16x32xf32>
    %1295 = arith.addf %0, %1294 : vector<16x32xf32>
    %c0_251 = arith.constant 0 : index
    %c0_252 = arith.constant 0 : index
    %1296 = vector.load %arg9[%c0_251, %c0_252] : memref<1x32xf32, #tpu.memory_space<vmem>>, vector<1x32xf32>
    %c0_253 = arith.constant 0 : index
    %c0_254 = arith.constant 0 : index
    %1297 = vector.load %arg10[%c0_253, %c0_254] : memref<1x32xf32, #tpu.memory_space<vmem>>, vector<1x32xf32>
    %cst_255 = arith.constant dense<0.000000e+00> : vector<16xf32>
    %1298 = vector.multi_reduction <add>, %1295, %cst_255 [1] : vector<16x32xf32> to vector<16xf32>
    %1299 = vector.shape_cast %1298 : vector<16xf32> to vector<16x1xf32>
    %cst_256 = arith.constant 3.200000e+01 : f32
    %1300 = vector.broadcast %cst_256 : f32 to vector<16x1xf32>
    %1301 = arith.divf %1299, %1300 : vector<16x1xf32>
    %1302 = vector.broadcast %1301 : vector<16x1xf32> to vector<16x32xf32>
    %1303 = arith.subf %1295, %1302 : vector<16x32xf32>
    %1304 = arith.mulf %1303, %1303 : vector<16x32xf32>
    %cst_257 = arith.constant dense<0.000000e+00> : vector<16xf32>
    %1305 = vector.multi_reduction <add>, %1304, %cst_257 [1] : vector<16x32xf32> to vector<16xf32>
    %1306 = vector.shape_cast %1305 : vector<16xf32> to vector<16x1xf32>
    %cst_258 = arith.constant 3.200000e+01 : f32
    %1307 = vector.broadcast %cst_258 : f32 to vector<16x1xf32>
    %1308 = arith.divf %1306, %1307 : vector<16x1xf32>
    %cst_259 = arith.constant 9.99999974E-6 : f32
    %1309 = vector.broadcast %cst_259 : f32 to vector<16x1xf32>
    %1310 = arith.addf %1308, %1309 : vector<16x1xf32>
    %1311 = math.rsqrt %1310 : vector<16x1xf32>
    %1312 = vector.broadcast %1311 : vector<16x1xf32> to vector<16x32xf32>
    %1313 = arith.mulf %1303, %1312 : vector<16x32xf32>
    %1314 = vector.broadcast %1296 : vector<1x32xf32> to vector<16x32xf32>
    %1315 = arith.mulf %1313, %1314 : vector<16x32xf32>
    %1316 = vector.broadcast %1297 : vector<1x32xf32> to vector<16x32xf32>
    %1317 = arith.addf %1315, %1316 : vector<16x32xf32>
    %1318 = arith.truncf %1317 : vector<16x32xf32> to vector<16x32xbf16>
    %c0_260 = arith.constant 0 : index
    %c0_261 = arith.constant 0 : index
    %1319 = vector.load %arg11[%c0_260, %c0_261] : memref<32x64xbf16, #tpu.memory_space<vmem>>, vector<32x64xbf16>
    %cst_262 = arith.constant dense<0.000000e+00> : vector<16x64xf32>
    %1320 = tpu.matmul %1318, %1319, %cst_262 {dimension_numbers = #tpu.dot_dimension_numbers<[1], [0], [0], [1], [0, 0, 1, 1], [], []>} : vector<16x32xbf16>, vector<32x64xbf16>, vector<16x64xf32> -> vector<16x64xf32>
    %c0_263 = arith.constant 0 : index
    %c0_264 = arith.constant 0 : index
    %1321 = vector.load %arg12[%c0_263, %c0_264] : memref<1x64xf32, #tpu.memory_space<vmem>>, vector<1x64xf32>
    %1322 = vector.broadcast %1321 : vector<1x64xf32> to vector<16x64xf32>
    %1323 = arith.addf %1320, %1322 : vector<16x64xf32>
    %cst_265 = arith.constant 5.000000e-01 : f32
    %1324 = vector.broadcast %cst_265 : f32 to vector<16x64xf32>
    %1325 = arith.mulf %1324, %1323 : vector<16x64xf32>
    %cst_266 = arith.constant 4.471500e-02 : f32
    %1326 = vector.broadcast %cst_266 : f32 to vector<16x64xf32>
    %1327 = arith.mulf %1326, %1323 : vector<16x64xf32>
    %1328 = arith.mulf %1327, %1323 : vector<16x64xf32>
    %1329 = arith.mulf %1328, %1323 : vector<16x64xf32>
    %1330 = arith.addf %1323, %1329 : vector<16x64xf32>
    %cst_267 = arith.constant 0.797884583 : f32
    %1331 = vector.broadcast %cst_267 : f32 to vector<16x64xf32>
    %1332 = arith.mulf %1331, %1330 : vector<16x64xf32>
    %1333 = math.tanh %1332 : vector<16x64xf32>
    %cst_268 = arith.constant 1.000000e+00 : f32
    %1334 = vector.broadcast %cst_268 : f32 to vector<16x64xf32>
    %1335 = arith.addf %1334, %1333 : vector<16x64xf32>
    %1336 = arith.mulf %1325, %1335 : vector<16x64xf32>
    %1337 = arith.truncf %1336 : vector<16x64xf32> to vector<16x64xbf16>
    %c0_269 = arith.constant 0 : index
    %c0_270 = arith.constant 0 : index
    %1338 = vector.load %arg13[%c0_269, %c0_270] : memref<64x32xbf16, #tpu.memory_space<vmem>>, vector<64x32xbf16>
    %cst_271 = arith.constant dense<0.000000e+00> : vector<16x32xf32>
    %1339 = tpu.matmul %1337, %1338, %cst_271 {dimension_numbers = #tpu.dot_dimension_numbers<[1], [0], [0], [1], [0, 0, 1, 1], [], []>} : vector<16x64xbf16>, vector<64x32xbf16>, vector<16x32xf32> -> vector<16x32xf32>
    %c0_272 = arith.constant 0 : index
    %c0_273 = arith.constant 0 : index
    %1340 = vector.load %arg14[%c0_272, %c0_273] : memref<1x32xf32, #tpu.memory_space<vmem>>, vector<1x32xf32>
    %1341 = vector.broadcast %1340 : vector<1x32xf32> to vector<16x32xf32>
    %1342 = arith.addf %1339, %1341 : vector<16x32xf32>
    %cst_274 = arith.constant 5.000000e-01 : f32
    %1343 = vector.broadcast %cst_274 : f32 to vector<16x32xf32>
    %1344 = arith.mulf %1343, %1342 : vector<16x32xf32>
    %1345 = arith.addf %1317, %1344 : vector<16x32xf32>
    %c0_275 = arith.constant 0 : index
    %c0_276 = arith.constant 0 : index
    %1346 = vector.load %arg15[%c0_275, %c0_276] : memref<1x32xf32, #tpu.memory_space<vmem>>, vector<1x32xf32>
    %c0_277 = arith.constant 0 : index
    %c0_278 = arith.constant 0 : index
    %1347 = vector.load %arg16[%c0_277, %c0_278] : memref<1x32xf32, #tpu.memory_space<vmem>>, vector<1x32xf32>
    %cst_279 = arith.constant dense<0.000000e+00> : vector<16xf32>
    %1348 = vector.multi_reduction <add>, %1345, %cst_279 [1] : vector<16x32xf32> to vector<16xf32>
    %1349 = vector.shape_cast %1348 : vector<16xf32> to vector<16x1xf32>
    %cst_280 = arith.constant 3.200000e+01 : f32
    %1350 = vector.broadcast %cst_280 : f32 to vector<16x1xf32>
    %1351 = arith.divf %1349, %1350 : vector<16x1xf32>
    %1352 = vector.broadcast %1351 : vector<16x1xf32> to vector<16x32xf32>
    %1353 = arith.subf %1345, %1352 : vector<16x32xf32>
    %1354 = arith.mulf %1353, %1353 : vector<16x32xf32>
    %cst_281 = arith.constant dense<0.000000e+00> : vector<16xf32>
    %1355 = vector.multi_reduction <add>, %1354, %cst_281 [1] : vector<16x32xf32> to vector<16xf32>
    %1356 = vector.shape_cast %1355 : vector<16xf32> to vector<16x1xf32>
    %cst_282 = arith.constant 3.200000e+01 : f32
    %1357 = vector.broadcast %cst_282 : f32 to vector<16x1xf32>
    %1358 = arith.divf %1356, %1357 : vector<16x1xf32>
    %cst_283 = arith.constant 9.99999974E-6 : f32
    %1359 = vector.broadcast %cst_283 : f32 to vector<16x1xf32>
    %1360 = arith.addf %1358, %1359 : vector<16x1xf32>
    %1361 = math.rsqrt %1360 : vector<16x1xf32>
    %1362 = vector.broadcast %1361 : vector<16x1xf32> to vector<16x32xf32>
    %1363 = arith.mulf %1353, %1362 : vector<16x32xf32>
    %1364 = vector.broadcast %1346 : vector<1x32xf32> to vector<16x32xf32>
    %1365 = arith.mulf %1363, %1364 : vector<16x32xf32>
    %1366 = vector.broadcast %1347 : vector<1x32xf32> to vector<16x32xf32>
    %1367 = arith.addf %1365, %1366 : vector<16x32xf32>
    %c0_284 = arith.constant 0 : index
    %c0_285 = arith.constant 0 : index
    %1368 = vector.load %arg17[%c0_284, %c0_285] : memref<16x32xf32, #tpu.memory_space<vmem>>, vector<16x32xf32>
    tpu.vector_store %arg17[%c0_284, %c0_285], %1367 {strides = array<i32>} : memref<16x32xf32, #tpu.memory_space<vmem>>, vector<16x32xf32>,
    return
  }
  func.func @transform_0(%arg0: i32) -> (i32, i32) {
    %c0_i32 = arith.constant 0 : i32
    %c0_i32_0 = arith.constant 0 : i32
    return %arg0, %c0_i32 : i32, i32
  }
  func.func @transform_1(%arg0: i32) -> (i32, i32, i32) {
    %c0_i32 = arith.constant 0 : i32
    %c0_i32_0 = arith.constant 0 : i32
    %c0_i32_1 = arith.constant 0 : i32
    return %arg0, %c0_i32, %c0_i32_0 : i32, i32, i32
  }
  func.func @transform_2(%arg0: i32) -> (i32, i32, i32) {
    %c0_i32 = arith.constant 0 : i32
    %c0_i32_0 = arith.constant 0 : i32
    %c0_i32_1 = arith.constant 0 : i32
    return %arg0, %c0_i32, %c0_i32_0 : i32, i32, i32
  }
  func.func @transform_3(%arg0: i32) -> (i32, i32, i32, i32) {
    %c0_i32 = arith.constant 0 : i32
    %c0_i32_0 = arith.constant 0 : i32
    %c0_i32_1 = arith.constant 0 : i32
    %c0_i32_2 = arith.constant 0 : i32
    return %arg0, %c0_i32, %c0_i32_0, %c0_i32_1 : i32, i32, i32, i32
  }
  func.func @transform_4(%arg0: i32) -> (i32, i32) {
    %c0_i32 = arith.constant 0 : i32
    %c0_i32_0 = arith.constant 0 : i32
    %c0_i32_1 = arith.constant 0 : i32
    return %c0_i32, %c0_i32_0 : i32, i32
  }
  func.func @transform_5(%arg0: i32) -> (i32, i32) {
    %c0_i32 = arith.constant 0 : i32
    %c0_i32_0 = arith.constant 0 : i32
    %c0_i32_1 = arith.constant 0 : i32
    return %c0_i32, %c0_i32_0 : i32, i32
  }
  func.func @transform_6(%arg0: i32) -> (i32, i32) {
    %c0_i32 = arith.constant 0 : i32
    %c0_i32_0 = arith.constant 0 : i32
    %c0_i32_1 = arith.constant 0 : i32
    return %c0_i32, %c0_i32_0 : i32, i32
  }
  func.func @transform_7(%arg0: i32) -> (i32, i32) {
    %c0_i32 = arith.constant 0 : i32
    %c0_i32_0 = arith.constant 0 : i32
    %c0_i32_1 = arith.constant 0 : i32
    return %c0_i32, %c0_i32_0 : i32, i32
  }
  func.func @transform_8(%arg0: i32) -> (i32, i32) {
    %c0_i32 = arith.constant 0 : i32
    %c0_i32_0 = arith.constant 0 : i32
    %c0_i32_1 = arith.constant 0 : i32
    return %c0_i32, %c0_i32_0 : i32, i32
  }
  func.func @transform_9(%arg0: i32) -> (i32, i32) {
    %c0_i32 = arith.constant 0 : i32
    %c0_i32_0 = arith.constant 0 : i32
    %c0_i32_1 = arith.constant 0 : i32
    return %c0_i32, %c0_i32_0 : i32, i32
  }
  func.func @transform_10(%arg0: i32) -> (i32, i32) {
    %c0_i32 = arith.constant 0 : i32
    %c0_i32_0 = arith.constant 0 : i32
    %c0_i32_1 = arith.constant 0 : i32
    return %c0_i32, %c0_i32_0 : i32, i32
  }
  func.func @transform_11(%arg0: i32) -> (i32, i32) {
    %c0_i32 = arith.constant 0 : i32
    %c0_i32_0 = arith.constant 0 : i32
    %c0_i32_1 = arith.constant 0 : i32
    return %c0_i32, %c0_i32_0 : i32, i32
  }
  func.func @transform_12(%arg0: i32) -> (i32, i32) {
    %c0_i32 = arith.constant 0 : i32
    %c0_i32_0 = arith.constant 0 : i32
    %c0_i32_1 = arith.constant 0 : i32
    return %c0_i32, %c0_i32_0 : i32, i32
  }
  func.func @transform_13(%arg0: i32) -> (i32, i32) {
    %c0_i32 = arith.constant 0 : i32
    %c0_i32_0 = arith.constant 0 : i32
    %c0_i32_1 = arith.constant 0 : i32
    return %c0_i32, %c0_i32_0 : i32, i32
  }
  func.func @transform_14(%arg0: i32) -> (i32, i32) {
    %c0_i32 = arith.constant 0 : i32
    %c0_i32_0 = arith.constant 0 : i32
    %c0_i32_1 = arith.constant 0 : i32
    return %c0_i32, %c0_i32_0 : i32, i32
  }
  func.func @transform_15(%arg0: i32) -> (i32, i32) {
    %c0_i32 = arith.constant 0 : i32
    %c0_i32_0 = arith.constant 0 : i32
    %c0_i32_1 = arith.constant 0 : i32
    return %c0_i32, %c0_i32_0 : i32, i32
  }
  func.func @transform_16(%arg0: i32) -> (i32, i32) {
    %c0_i32 = arith.constant 0 : i32
    %c0_i32_0 = arith.constant 0 : i32
    return %arg0, %c0_i32 : i32, i32
  }
  func.func @transform_17(%arg0: i32) -> (i32, i32, i32, i32) {
    %c0_i32 = arith.constant 0 : i32
    %c0_i32_0 = arith.constant 0 : i32
    %c0_i32_1 = arith.constant 0 : i32
    %c0_i32_2 = arith.constant 0 : i32
    return %arg0, %c0_i32, %c0_i32_0, %c0_i32_1 : i32, i32, i32, i32
  }
}

</mosaic_0001>

<bundles_post_ra>
// kernel: tpu_custom_call.1
= control target key start
LH: loop header
LB: loop body
LE: loop exit
PB: predicated region body
PF: predicated region fallthrough
CT: control target
= control target key end

     0   :  { %s4165_s0 = inlined_call_operand.vmem [shape: f32[16,32], index: 0, kind: input, shape index: {}]   ;;  %s4166_s1 = inlined_call_operand.hbm [shape: f32[2,1,8], index: 1, kind: input, shape index: {}]   ;;  %s4167_s2 = inlined_call_operand.vmem [shape: f32[2,8,8], index: 2, kind: input, shape index: {}]   ;;  %s4168_s3 = inlined_call_operand.vmem [shape: s32[2,2,8,8], index: 3, kind: input, shape index: {}]   ;;  %s4169_s4 = inlined_call_operand.vmem [shape: bf16[32,96], index: 4, kind: input, shape index: {}]   ;;  %s4170_s5 = inlined_call_operand.vmem [shape: f32[1,96], index: 5, kind: input, shape index: {}]   ;;  %s4171_s6 = inlined_call_operand.hbm [shape: bf16[32,64], index: 6, kind: input, shape index: {}]   ;;  %s4172_s7 = inlined_call_operand.vmem [shape: bf16[64,32], index: 7, kind: input, shape index: {}]   ;;  %s4173_s8 = inlined_call_operand.vmem [shape: f32[1,32], index: 8, kind: input, shape index: {}]   ;;  %s4174_s9 = inlined_call_operand.vmem [shape: f32[1,32], index: 9, kind: input, shape index: {}]   ;;  %s4175_s10 = inlined_call_operand.hbm [shape: bf16[32,64], index: 10, kind: input, shape index: {}]   ;;  %s4176_s11 = inlined_call_operand.vmem [shape: f32[1,64], index: 11, kind: input, shape index: {}]   ;;  %s4177_s12 = inlined_call_operand.vmem [shape: bf16[64,32], index: 12, kind: input, shape index: {}]   ;;  %s4178_s13 = inlined_call_operand.vmem [shape: f32[1,32], index: 13, kind: input, shape index: {}]   ;;  %s4179_s14 = inlined_call_operand.vmem [shape: f32[1,32], index: 14, kind: input, shape index: {}]   ;;  %s4180_s15 = inlined_call_operand.vmem [shape: f32[1,32], index: 15, kind: input, shape index: {}]   ;;  %s4181_s16 = inlined_call_operand.hbm [shape: f32[16,32], index: 16, kind: output, shape index: {0}]   ;;  %s4182_s17 = inlined_call_operand.hbm [shape: f32[2,2,8,8], index: 17, kind: output, shape index: {1}]  }
   0x1   :  { %4259 = sst [smem:[#allocation15_spill]] %s4165_s0 }
   0x2   :  { %4260 = sst [smem:[#allocation16_spill]] %s4166_s1 }
   0x3   :  { %23 = vsyncpa [#allocation3], 0 }
   0x4   :  { %24 = vsyncpa [#allocation6], 0 }
   0x5   :  { %25 = vsyncpa [#allocation4], 0  ;;  %s54_s26 = sshll.u32 %s4171_s6, 4  ;;  %s55_s26 = int_to_ptr.hbm [resolvable:$true] %s54_s26 }
   0x6   :  { %26 = vsyncpa [#allocation10], 0  ;;  %s2573_s27 = smov [#allocation5]   ;;  %s4261_s30 = sld [smem:[#allocation16_spill]] }
   0x7   :  { %s56_s28 = sshll.u32 %s2573_s27, 4  ;;  %s2574_s19 = smov 64   ;;  %s57_s28 = int_to_ptr.vmem [resolvable:$true] %s56_s28 }
   0x8   :  { %s2575_s1 = smov 4   ;;  %s2576_s20 = smov [#allocation2]  }
   0x9   :  { %62 = dma.hbm_to_vmem [thread:$0]  %s55_s26, 256, %s57_s28, [#allocation6], %s2574_s19, %s2574_s19, %s2575_s1  }
   0xa   :  { %s35_s21 = sshll.u32 %s2576_s20, 4  ;;  %s2577_s22 = smov 16   ;;  %s36_s21 = int_to_ptr.vmem [resolvable:$true] %s35_s21 }
   0xb   :  { %s2578_s6 = smov 1   ;;  %s73_s25 = sshll.u32 %s4175_s10, 4  ;;  %s74_s25 = int_to_ptr.hbm [resolvable:$true] %s73_s25 }
   0xc   :  { %s33_s18 = sshll.u32 %s4261_s30, 4  ;;  %s2579_s27 = smov [#allocation7]   ;;  %s34_s18 = int_to_ptr.hbm [resolvable:$true] %s33_s18 }
   0xd   :  { %41 = dma.hbm_to_vmem [thread:$0]  %s34_s18, 32, %s36_s21, [#allocation3], %s2577_s22, %s2577_s22, %s2578_s6  }
   0xe   :  { %s75_s29 = sshll.u32 %s2579_s27, 4  ;;  %s76_s29 = int_to_ptr.vmem [resolvable:$true] %s75_s29 }
   0xf   :  { %81 = dma.hbm_to_vmem [thread:$0]  %s74_s25, 256, %s76_s29, [#allocation6], %s2574_s19, %s2574_s19, %s2575_s1  }
  0x10   :  { %2565 = dma.done.wait [#allocation3], 32  }
  0x11   :  { %2566 = vsyncadd [#allocation3], 4294967264 }
  0x12   :  { %2567 = dma.done.wait [#allocation6], 512  }
  0x13   :  { %2568 = vsyncadd [#allocation6], 4294966784  ;;  %v2180_v0 = vld [vmem:[%s4169_s4 + $0x8] sm:$0xff]  ;;  %v2179_v1 = vld [vmem:[%s4169_s4] sm:$0xff]  ;;  %s4262_s20 = sld [smem:[#allocation15_spill]]  ;;  %vm4216_vm0 = vcmask 261120  }
  0x14   :  { %138 = vmatpush.bf16.msra.mxu0 %v2180_v0  ;;  %v2182_v5 = vld [vmem:[#allocation5 + $0x8] sm:$0xff]  ;;  %v2181_v6 = vld [vmem:[#allocation5] sm:$0xff]  ;;  %v2403_v7 = vld [vmem:[%s4170_s5] ss:$0 sm:$0xff]  ;;  %s2580_s23 = smov 96   ;;  %s2581_s5 = smov 112  }
  0x15   :  { %172 = vmatpush.bf16.msra.mxu3 %v2182_v5  ;;  %s2582_s24 = smov 80   ;;  %v2583_v15 = vmov 4   ;;  %v2584_v16 = vmov 2   ;;  %v2585_v17 = vmov 0   ;;  %vm4192_vm1 = vcmask 130048   ;;  %v2183_v30 = vld [vmem:[%s4172_s7] sm:$0xff] }
  0x16   :  { %2278 = vset.pattern.permute.xlu0 %v2583_v15  ;;  %2276 = vset.pattern.permute.xlu2 %v2584_v16  ;;  %v2586_v27 = vmov 9   ;;  %v2587_v28 = vmov 3   ;;  %v2588_v29 = vmov 1   ;;  %v2589_v33 = vmov 14   ;;  %v2184_v38 = vld [vmem:[%s4172_s7 + $0x8] sm:$0xff]  ;;  %v2185_v46 = vld [vmem:[%s4172_s7 + $0x10] sm:$0xff] }
  0x17   :  { %2274 = vset.pattern.permute.xlu1 %v2585_v17  ;;  %v2590_v34 = vmov 6   ;;  %v2591_v35 = vmov 5   ;;  %v2592_v39 = vmov 19   ;;  %v2593_v40 = vmov 8   ;;  %s2084_s26 = sshll.u32 %s4182_s17, 4  ;;  %s2651_s28 = smov 128   ;;  %s2085_s26 = int_to_ptr.hbm [resolvable:$true] %s2084_s26 }
  0x18   :  { %139 = vmatpush.bf16.msra.mxu0 %v2179_v1  ;;  %v2594_v41 = vmov 7   ;;  %v2595_v43 = vmov 24   ;;  %v2596_v44 = vmov 11   ;;  %v2597_v45 = vmov 10   ;;  %s2071_s18 = sshll.u32 %s4181_s16, 4  ;;  %s2072_s18 = int_to_ptr.hbm [resolvable:$true] %s2071_s18 }
  0x19   :  { %v105_v2 = vld [vmem:[%s4262_s20] sm:$0xff]  ;;  %v106_v3 = vld [vmem:[%s4262_s20 + $0x8] sm:$0xff]  ;;  %173 = vmatpush.bf16.msra.mxu3 %v2181_v6  ;;  %v2598_v47 = vmov 29   ;;  %v2599_v48 = vmov 13   ;;  %v2600_v49 = vmov 12   ;;  %v2601_v50 = vmov 35  }
  0x1a   :  { %v107_v4 = vpack.c.bf16 %v106_v3, %v105_v2  ;;  %v2602_v51 = vmov 16   ;;  %v2603_v52 = vmov 15   ;;  %v2604_v53 = vmov 18  }
  0x1b   :  { %v2605_v54 = vmov 17   ;;  %v2606_v56 = vmov 21   ;;  %v2607_v57 = vmov 20   ;;  %v2608_v58 = vmov 23  }
  0x1c   :  { %2111 = vmatmul.msk.bf16.vlgmr.msra.gmra.mxu0 %vm4216_vm0, %v107_v4  ;;  %v2609_v59 = vmov 22   ;;  %v2610_v61 = vmov 26   ;;  %v4187_v62 = vmov 25   ;;  %v2612_v63 = vmov 36  }
  0x1d   :  { %v2613_v1 = vmov 28   ;;  %v2614_v2 = vmov 27   ;;  %v2615_v4 = vmov 31   ;;  %v2616_v5 = vmov 30  }
  0x1e   :  { %v4191_v6 = vmov 41  }
  0x99   :  { %v141_v8 = vpop.f32.mrf.mxu0 }
  0x9a   :  { %v2775_v9 = vadd.f32 %v2403_v7, %v141_v8 }
  0x9c   :  { %848 = vrot.lane.b32.xlu0 %v2775_v9, %s2574_s19  ;;  %v805_v12 = vpack.c.bf16 %v2775_v9, %v2775_v9 }
  0xa1   :  { %v143_v10 = vpop.f32.mrf.mxu0 }
  0xa2   :  { %v2779_v11 = vadd.f32 %v2403_v7, %v143_v10 }
  0xa4   :  { %808 = vrot.lane.b32.xlu0 %v805_v12, %s2580_s23  ;;  %v2785_v13 = vpack.c.bf16 %v2779_v11, %v2779_v11  ;;  %v146_v14 = vpack.c.bf16 %v2779_v11, %v2775_v9 }
  0xa6   :  { %1757 = vrot.lane.b32.xlu2 %v2785_v13, %s2581_s5  ;;  %2120 = vmatmul.msk.bf16.vlgmr.msra.gmra.mxu3 %vm4216_vm0, %v146_v14 }
  0xac   :  { %877 = vrot.lane.b32.xlu0 %v805_v12, %s2582_s24 }
  0xb4   :  { %875 = vrot.lane.b32.xlu0 %v805_v12, %s2581_s5 }
  0xbc   :  { %209 = vrot.lane.b32.xlu0 %v146_v14, %s2580_s23  ;;  %v2618_v14 = vmov 32  }
  0xc4   :  { %1691 = vrot.lane.b32.xlu0 %v2785_v13, %s2580_s23  ;;  %s2631_s23 = smov 120  }
  0xcc   :  { %1759 = vrot.lane.b32.xlu0 %v2785_v13, %s2582_s24 }
 0x100   :  { %v1758_v42 = vpop.permute.xlu2 %1757 }
 0x10e   :  { %v849_v18 = vpop.permute.xlu0 %848 }
 0x10f   :  { %869 = vmatpush.msrb.mxu0 %v849_v18  ;;  %v2619_v18 = vmov 33  }
 0x116   :  { %v809_v19 = vpop.permute.xlu0 %808 }
 0x117   :  { %v815_v20 = vsel %vm4192_vm1, %v809_v19, 0 }
 0x118   :  { %824 = vmatpush.bf16.xpose.msrb.mxu3 %v815_v20 }
 0x11e   :  { %v878_v21 = vpop.permute.xlu0 %877 }
 0x11f   :  { %2142 = vmatmul.msk.bf16.vlgmr.msrb.gmra.mxu3 %vm4192_vm1, %v805_v12  ;;  %v883_v22 = vsel %vm4192_vm1, %v878_v21, 0 }
 0x120   :  { %892 = vmatpush.bf16.xpose.msra.mxu1 %v883_v22 }
 0x126   :  { %v876_v23 = vpop.permute.xlu0 %875 }
 0x127   :  { %2144 = vmatmul.msk.bf16.vlgmr.msra.gmra.mxu1 %vm4192_vm1, %v876_v23 }
 0x129   :  { %v2800_v24 = vpop.f32.mrf.mxu3 }
 0x12a   :  { %329 = vperm.xlu0 %2278, %v2800_v24   ;;  %295 = vperm.xlu2 %2276, %v2800_v24  }
 0x12b   :  { %261 = vperm.xlu1 %2274, %v2800_v24  }
 0x12e   :  { %v210_v25 = vpop.permute.xlu0 %209 }
 0x12f   :  { %v224_v26 = vsel %vm4216_vm0, %v210_v25, 0  ;;  %v2620_v25 = vmov 34  }
 0x130   :  { %233 = vmatpush.bf16.xpose.msra.mxu2 %v224_v26  ;;  %v4184_v26 = vmov 45  }
 0x131   :  { %v2860_v55 = vpop.f32.mrf.mxu3 }
 0x132   :  { %2283 = vset.pattern.permute.xlu0 %v2586_v27  ;;  %2277 = vset.pattern.permute.xlu2 %v2587_v28 }
 0x133   :  { %2275 = vset.pattern.permute.xlu1 %v2588_v29  ;;  %414 = vperm.xlu0 %2283, %v2800_v24  }
 0x134   :  { %312 = vperm.xlu2 %2277, %v2800_v24   ;;  %278 = vperm.xlu1 %2275, %v2800_v24  }
 0x136   :  { %v1692_v31 = vpop.permute.xlu0 %1691 }
 0x137   :  { %v1697_v32 = vsel %vm4192_vm1, %v1692_v31, 0  ;;  %2137 = vmatmul.msk.bf16.vlgmr.msra.gmra.mxu2 %vm4216_vm0, %v2183_v30 }
 0x138   :  { %1706 = vmatpush.bf16.xpose.msra.mxu0 %v1697_v32 }
 0x13b   :  { %2288 = vset.pattern.permute.xlu0 %v2589_v33 }
 0x13c   :  { %2280 = vset.pattern.permute.xlu2 %v2590_v34  ;;  %2279 = vset.pattern.permute.xlu1 %v2591_v35 }
 0x13d   :  { %499 = vperm.xlu0 %2288, %v2800_v24   ;;  %363 = vperm.xlu2 %2280, %v2800_v24  }
 0x13e   :  { %346 = vperm.xlu1 %2279, %v2800_v24   ;;  %v1760_v36 = vpop.permute.xlu0 %1759 }
 0x13f   :  { %v1765_v37 = vsel %vm4192_vm1, %v1760_v36, 0  ;;  %v2936_v36 = vld [vmem:[%s4168_s3] sm:$0xff] }
 0x140   :  { %1774 = vmatpush.bf16.xpose.msrb.mxu1 %v1765_v37  ;;  %vm276_vm2 = vcmp.eq.s32.totalorder %v2936_v36, 1  ;;  %vm258_vm3 = vcmp.eq.s32.totalorder %v2936_v36, 0  ;;  %vm293_vm4 = vcmp.eq.s32.totalorder %v2936_v36, 2  ;;  %vm310_vm5 = vcmp.eq.s32.totalorder %v2936_v36, 3 }
 0x141   :  { %vm327_vm6 = vcmp.eq.s32.totalorder %v2936_v36, 4  ;;  %vm344_vm7 = vcmp.eq.s32.totalorder %v2936_v36, 5  ;;  %vm361_vm8 = vcmp.eq.s32.totalorder %v2936_v36, 6  ;;  %vm378_vm9 = vcmp.eq.s32.totalorder %v2936_v36, 7 }
 0x142   :  { %vm395_vm10 = vcmp.eq.s32.totalorder %v2936_v36, 8  ;;  %vm412_vm11 = vcmp.eq.s32.totalorder %v2936_v36, 9  ;;  %vm429_vm12 = vcmp.eq.s32.totalorder %v2936_v36, 10  ;;  %vm446_vm13 = vcmp.eq.s32.totalorder %v2936_v36, 11 }
 0x143   :  { %vm4196_vm14 = vcmp.eq.s32.totalorder %v2936_v36, 12  ;;  %vm4198_vm15 = vcmp.eq.s32.totalorder %v2936_v36, 13 }
 0x145   :  { %2293 = vset.pattern.permute.xlu0 %v2592_v39  ;;  %2282 = vset.pattern.permute.xlu2 %v2593_v40 }
 0x146   :  { %2281 = vset.pattern.permute.xlu1 %v2594_v41  ;;  %586 = vperm.xlu0 %2293, %v2800_v24  }
 0x147   :  { %397 = vperm.xlu2 %2282, %v2800_v24   ;;  %380 = vperm.xlu1 %2281, %v2800_v24  }
 0x148   :  { %2138 = vmatmul.msk.bf16.gmra.mxu2 %vm4216_vm0, %v2184_v38  ;;  %2151 = vmatmul.msk.bf16.vlgmr.msrb.gmra.mxu1 %vm4192_vm1, %v1758_v42  ;;  %vm4197_vm1 = vcmp.eq.s32.totalorder %v2936_v36, 14 }
 0x14e   :  { %2298 = vset.pattern.permute.xlu0 %v2595_v43 }
 0x14f   :  { %2285 = vset.pattern.permute.xlu2 %v2596_v44  ;;  %2284 = vset.pattern.permute.xlu1 %v2597_v45 }
 0x150   :  { %671 = vperm.xlu0 %2298, %v2800_v24   ;;  %448 = vperm.xlu2 %2285, %v2800_v24  }
 0x151   :  { %431 = vperm.xlu1 %2284, %v2800_v24  }
 0x158   :  { %2303 = vset.pattern.permute.xlu0 %v2598_v47  ;;  %2287 = vset.pattern.permute.xlu2 %v2599_v48 }
 0x159   :  { %2286 = vset.pattern.permute.xlu1 %v2600_v49  ;;  %2139 = vmatmul.msk.bf16.gmra.mxu2 %vm4216_vm0, %v2185_v46 }
 0x15a   :  { %756 = vperm.xlu0 %2303, %v2800_v24   ;;  %482 = vperm.xlu2 %2287, %v2800_v24  }
 0x15b   :  { %465 = vperm.xlu1 %2286, %v2800_v24  }
 0x162   :  { %2309 = vset.pattern.permute.xlu0 %v2601_v50  ;;  %2290 = vset.pattern.permute.xlu2 %v2602_v51 }
 0x163   :  { %2289 = vset.pattern.permute.xlu1 %v2603_v52  ;;  %320 = vperm.xlu0 %2309, %v2800_v24  }
 0x164   :  { %535 = vperm.xlu2 %2290, %v2800_v24   ;;  %516 = vperm.xlu1 %2289, %v2800_v24  }
 0x16b   :  { %2312 = vset.pattern.permute.xlu0 %v2588_v29 }
 0x16c   :  { %2292 = vset.pattern.permute.xlu2 %v2604_v53  ;;  %2291 = vset.pattern.permute.xlu1 %v2605_v54 }
 0x16d   :  { %569 = vperm.xlu2 %2292, %v2800_v24   ;;  %552 = vperm.xlu1 %2291, %v2800_v24  }
 0x16e   :  { %975 = vperm.xlu0 %2312, %v2860_v55  }
 0x175   :  { %2295 = vset.pattern.permute.xlu2 %v2606_v56  ;;  %2294 = vset.pattern.permute.xlu1 %v2607_v57 }
 0x176   :  { %2313 = vset.pattern.permute.xlu0 %v2584_v16  ;;  %620 = vperm.xlu2 %2295, %v2800_v24  }
 0x177   :  { %603 = vperm.xlu1 %2294, %v2800_v24   ;;  %998 = vperm.xlu0 %2313, %v2860_v55  }
 0x17e   :  { %2297 = vset.pattern.permute.xlu2 %v2608_v58 }
 0x17f   :  { %2296 = vset.pattern.permute.xlu1 %v2609_v59  ;;  %2318 = vset.pattern.permute.xlu0 %v2591_v35 }
 0x180   :  { %654 = vperm.xlu2 %2297, %v2800_v24   ;;  %637 = vperm.xlu1 %2296, %v2800_v24  }
 0x181   :  { %1067 = vperm.xlu0 %2318, %v2860_v55  }
 0x184   :  { %v2877_v60 = vpop.permute.xlu2 %295 }
 0x188   :  { %2300 = vset.pattern.permute.xlu2 %v2610_v61  ;;  %2299 = vset.pattern.permute.xlu1 %v4187_v62 }
 0x189   :  { %2323 = vset.pattern.permute.xlu0 %v2612_v63  ;;  %705 = vperm.xlu2 %2300, %v2800_v24  }
 0x18a   :  { %688 = vperm.xlu1 %2299, %v2800_v24   ;;  %1055 = vperm.xlu0 %2323, %v2860_v55  }
 0x18e   :  { %v2884_v0 = vpop.permute.xlu2 %312 }
 0x191   :  { %2302 = vset.pattern.permute.xlu2 %v2613_v1 }
 0x192   :  { %2301 = vset.pattern.permute.xlu1 %v2614_v2  ;;  %2328 = vset.pattern.permute.xlu0 %v2597_v45 }
 0x193   :  { %739 = vperm.xlu2 %2302, %v2800_v24   ;;  %722 = vperm.xlu1 %2301, %v2800_v24  }
 0x194   :  { %1182 = vperm.xlu0 %2328, %v2860_v55  }
 0x197   :  { %v2892_v3 = vpop.permute.xlu2 %363 }
 0x19b   :  { %2305 = vset.pattern.permute.xlu2 %v2615_v4  ;;  %2304 = vset.pattern.permute.xlu1 %v2616_v5 }
 0x19c   :  { %2333 = vset.pattern.permute.xlu0 %v4191_v6  ;;  %790 = vperm.xlu2 %2305, %v2800_v24   ;;  %v2898_v7 = vpop.permute.xlu0 %329 }
 0x19d   :  { %773 = vperm.xlu1 %2304, %v2800_v24   ;;  %1170 = vperm.xlu0 %2333, %v2860_v55   ;;  %v262_v8 = vpop.permute.xlu1 %261 }
 0x1a1   :  { %v2902_v10 = vpop.permute.xlu2 %397 }
 0x1a2   :  { %v2904_v12 = vpop.f32.mrf.mxu3 }
 0x1a4   :  { %2306 = vset.pattern.permute.xlu2 %v2618_v14  ;;  %v2906_v16 = vpop.f32.mrf.mxu1 }
 0x1a5   :  { %2307 = vset.pattern.permute.xlu1 %v2619_v18  ;;  %2338 = vset.pattern.permute.xlu0 %v2603_v52  ;;  %v2910_v19 = vpop.permute.xlu0 %414 }
 0x1a6   :  { %269 = vperm.xlu2 %2306, %v2800_v24   ;;  %286 = vperm.xlu1 %2307, %v2800_v24   ;;  %v279_v20 = vpop.permute.xlu1 %278 }
 0x1a7   :  { %1297 = vperm.xlu0 %2338, %v2860_v55  }
 0x1aa   :  { %v2915_v21 = vpop.permute.xlu2 %448  ;;  %v828_v22 = vpop.f32.mrf.mxu3 }
 0x1ac   :  { %v896_v23 = vpop.f32.mrf.mxu1 }
 0x1ae   :  { %2310 = vset.pattern.permute.xlu2 %v2612_v63  ;;  %2308 = vset.pattern.permute.xlu1 %v2620_v25 }
 0x1af   :  { %2341 = vset.pattern.permute.xlu0 %v4184_v26  ;;  %337 = vperm.xlu2 %2310, %v2800_v24   ;;  %v2920_v29 = vpop.permute.xlu0 %499 }
 0x1b0   :  { %303 = vperm.xlu1 %2308, %v2800_v24   ;;  %1262 = vperm.xlu0 %2341, %v2860_v55   ;;  %v347_v30 = vpop.permute.xlu1 %346 }
 0x1b4   :  { %v2924_v31 = vpop.permute.xlu2 %482 }
 0x1b7   :  { %2314 = vset.pattern.permute.xlu2 %v2587_v28 }
 0x1b8   :  { %2311 = vset.pattern.permute.xlu1 %v2585_v17  ;;  %2348 = vset.pattern.permute.xlu0 %v2607_v57  ;;  %v2929_v32 = vpop.permute.xlu0 %586 }
 0x1b9   :  { %1021 = vperm.xlu2 %2314, %v2860_v55   ;;  %1414 = vperm.xlu0 %2348, %v2860_v55   ;;  %v381_v35 = vpop.permute.xlu1 %380 }
 0x1ba   :  { %952 = vperm.xlu1 %2311, %v2860_v55   ;;  %v2939_v37 = vpop.f32.mrf.mxu2 }
 0x1bb   :  { %v4186_v17 = vperm.slane %v2939_v37, 1  ;;  %v298_v28 = vperm.slane %v2939_v37, 2  ;;  %v4185_v38 = vperm.slane %v2939_v37, 3  ;;  %v264_v42 = vperm.slane %v2939_v37, 0 }
 0x1bc   :  { %v332_v63 = vperm.slane %v2939_v37, 4 }
 0x1bd   :  { %v282_v45 = vadd.f32 %v4186_v17, %v279_v20  ;;  %v299_v52 = vadd.f32 %v298_v28, %v2877_v60  ;;  %v265_v57 = vadd.f32 %v264_v42, %v262_v8  ;;  %v349_v20 = vperm.slane %v2939_v37, 5 }
 0x1be   :  { %v2949_v46 = vpop.permute.xlu2 %535  ;;  %v316_v23 = vadd.f32 %v4185_v38, %v2884_v0 }
 0x1bf   :  { %v283_v22 = vsel %vm276_vm2, %v282_v45, 0.0  ;;  %v266_v26 = vsel %vm258_vm3, %v265_v57, 0.0  ;;  %v300_v0 = vsel %vm293_vm4, %v299_v52, 0.0  ;;  %v350_v57 = vadd.f32 %v349_v20, %v347_v30 }
 0x1c0   :  { %v284_v60 = vadd.f32 %v283_v22, %v266_v26  ;;  %v317_v52 = vsel %vm310_vm5, %v316_v23, 0.0 }
 0x1c1   :  { %2316 = vset.pattern.permute.xlu2 %v2618_v14  ;;  %2354 = vset.pattern.permute.xlu0 %v2609_v59  ;;  %v333_v14 = vadd.f32 %v332_v63, %v2898_v7  ;;  %v4188_v59 = vperm.slane %v2939_v37, 6  ;;  %v4190_v7 = vperm.slane %v2939_v37, 7  ;;  %v351_v23 = vsel %vm344_vm7, %v350_v57, 0.0 }
 0x1c2   :  { %2315 = vset.pattern.permute.xlu1 %v2583_v15  ;;  %963 = vperm.xlu2 %2316, %v2860_v55   ;;  %v2970_v8 = vpop.permute.xlu0 %671  ;;  %v2972_v45 = vpop.f32.mrf.mxu2  ;;  %v301_v26 = vadd.f32 %v300_v0, %v284_v60 }
 0x1c3   :  { %1460 = vperm.xlu0 %2354, %v2860_v55   ;;  %1044 = vperm.xlu1 %2315, %v2860_v55   ;;  %v432_v15 = vpop.permute.xlu1 %431  ;;  %v334_v17 = vsel %vm327_vm6, %v333_v14, 0.0  ;;  %v367_v60 = vadd.f32 %v4188_v59, %v2892_v3  ;;  %v4189_v30 = vperm.slane %v2972_v45, 0  ;;  %v2622_v59 = vmov 40  }
 0x1c4   :  { %v318_v38 = vadd.f32 %v317_v52, %v301_v26  ;;  %v4252_v26 = vperm.slane %v2972_v45, 1  ;;  %v384_v52 = vadd.f32 %v4190_v7, %v381_v35 }
 0x1c5   :  { %v2987_v22 = vpop.f32.mrf.mxu1  ;;  %v368_v3 = vsel %vm361_vm8, %v367_v60, 0.0 }
 0x1c6   :  { %v335_v62 = vadd.f32 %v334_v17, %v318_v38  ;;  %v401_v38 = vadd.f32 %v4189_v30, %v2902_v10  ;;  %v418_v60 = vadd.f32 %v4252_v26, %v2910_v19  ;;  %v385_v10 = vsel %vm378_vm9, %v384_v52, 0.0 }
 0x1c7   :  { %v2996_v0 = vpop.permute.xlu2 %569  ;;  %v4193_v30 = vperm.slane %v2972_v45, 4  ;;  %v4195_v52 = vperm.slane %v2972_v45, 5 }
 0x1c8   :  { %v352_v14 = vadd.f32 %v351_v23, %v335_v62  ;;  %v4194_v23 = vperm.slane %v2972_v45, 3  ;;  %v419_v19 = vsel %vm412_vm11, %v418_v60, 0.0 }
 0x1ca   :  { %2319 = vset.pattern.permute.xlu2 %v2620_v25  ;;  %v369_v35 = vadd.f32 %v368_v3, %v352_v14  ;;  %v4238_v25 = vperm.slane %v2972_v45, 2  ;;  %v402_v3 = vsel %vm395_vm10, %v401_v38, 0.0 }
 0x1cb   :  { %2356 = vset.pattern.permute.xlu0 %v2622_v59  ;;  %2317 = vset.pattern.permute.xlu1 %v2619_v18  ;;  %v3011_v17 = vpop.f32.mrf.mxu2 }
 0x1cc   :  { %1009 = vperm.xlu2 %2319, %v2860_v55   ;;  %405 = vperm.xlu0 %2356, %v2800_v24   ;;  %v3018_v62 = vpop.permute.xlu0 %756  ;;  %v386_v14 = vadd.f32 %v385_v10, %v369_v35  ;;  %v452_v35 = vadd.f32 %v4194_v23, %v2915_v21 }
 0x1cd   :  { %986 = vperm.xlu1 %2317, %v2860_v55   ;;  %v466_v18 = vpop.permute.xlu1 %465  ;;  %v1778_v57 = vpop.f32.mrf.mxu1 }
 0x1ce   :  { %v435_v57 = vadd.f32 %v4238_v25, %v432_v15  ;;  %v403_v6 = vadd.f32 %v402_v3, %v386_v14  ;;  %v469_v15 = vadd.f32 %v4193_v30, %v466_v18  ;;  %v2623_v14 = vmov 42  }
 0x1cf   :  { %v4208_v3 = vperm.slane %v2972_v45, 6  ;;  %v486_v18 = vadd.f32 %v4195_v52, %v2924_v31  ;;  %v4227_v52 = vperm.slane %v3011_v17, 0 }
 0x1d0   :  { %v3033_v7 = vpop.permute.xlu2 %620  ;;  %v420_v38 = vadd.f32 %v419_v19, %v403_v6  ;;  %v436_v60 = vsel %vm429_vm12, %v435_v57, 0.0  ;;  %v453_v57 = vsel %vm446_vm13, %v452_v35, 0.0 }
 0x1d1   :  { %v487_v31 = vsel %vm4198_vm15, %v486_v18, 0.0 }
 0x1d2   :  { %v437_v6 = vadd.f32 %v436_v60, %v420_v38  ;;  %v503_v38 = vadd.f32 %v4208_v3, %v2920_v29  ;;  %v470_v60 = vsel %vm4196_vm14, %v469_v15, 0.0  ;;  %vm514_vm14 = vcmp.eq.s32.totalorder %v2936_v36, 15 }
 0x1d3   :  { %v3044_v10 = vpop.f32.mrf.mxu2 }
 0x1d4   :  { %2321 = vset.pattern.permute.xlu2 %v2601_v50  ;;  %2364 = vset.pattern.permute.xlu0 %v2623_v14  ;;  %v454_v19 = vadd.f32 %v453_v57, %v437_v6  ;;  %v504_v29 = vsel %vm4197_vm1, %v503_v38, 0.0 }
 0x1d5   :  { %2320 = vset.pattern.permute.xlu1 %v2590_v34  ;;  %1032 = vperm.xlu2 %2321, %v2860_v55   ;;  %v321_v50 = vpop.permute.xlu0 %320  ;;  %v4229_v34 = vperm.slane %v2972_v45, 7 }
 0x1d6   :  { %439 = vperm.xlu0 %2364, %v2800_v24   ;;  %1090 = vperm.xlu1 %2320, %v2860_v55   ;;  %v517_v21 = vpop.permute.xlu1 %516  ;;  %v471_v30 = vadd.f32 %v470_v60, %v454_v19 }
 0x1d7   :  { %v520_v6 = vadd.f32 %v4229_v34, %v517_v21  ;;  %v4201_v21 = vperm.slane %v3011_v17, 1 }
 0x1d8   :  { %v488_v35 = vadd.f32 %v487_v31, %v471_v30  ;;  %v3089_v30 = vld [vmem:[%s4168_s3 + $0x8] sm:$0xff] }
 0x1d9   :  { %vm4202_vm1 = vcmp.eq.s32.totalorder %v3089_v30, 0  ;;  %vm4200_vm15 = vcmp.eq.s32.totalorder %v3089_v30, 1 }
 0x1da   :  { %v3072_v23 = vpop.permute.xlu2 %654  ;;  %v505_v19 = vadd.f32 %v504_v29, %v488_v35  ;;  %v4199_v29 = vperm.slane %v3011_v17, 2 }
 0x1dc   :  { %v3078_v57 = vpop.f32.mrf.mxu2 }
 0x1dd   :  { %2324 = vset.pattern.permute.xlu2 %v2593_v40  ;;  %v4239_v15 = vperm.slane %v3078_v57, 3 }
 0x1de   :  { %2366 = vset.pattern.permute.xlu0 %v2610_v61  ;;  %2322 = vset.pattern.permute.xlu1 %v2594_v41  ;;  %v539_v61 = vadd.f32 %v4227_v52, %v2949_v46  ;;  %v521_v41 = vsel %vm514_vm14, %v520_v6, 0.0 }
 0x1df   :  { %1136 = vperm.xlu2 %2324, %v2860_v55   ;;  %1552 = vperm.xlu0 %2366, %v2860_v55   ;;  %v553_v40 = vpop.permute.xlu1 %552  ;;  %v324_v18 = vadd.f32 %v4239_v15, %v321_v50  ;;  %v522_v31 = vadd.f32 %v521_v41, %v505_v19  ;;  %v2624_v19 = vmov 37   ;;  %v573_v41 = vadd.f32 %v4199_v29, %v2996_v0 }
 0x1e0   :  { %1113 = vperm.xlu1 %2322, %v2860_v55   ;;  %v3099_v38 = vpop.permute.xlu0 %975  ;;  %v556_v50 = vadd.f32 %v4201_v21, %v553_v40  ;;  %v540_v46 = vsel %vm4202_vm1, %v539_v61, 0.0  ;;  %v4203_v40 = vperm.slane %v3011_v17, 4  ;;  %v4206_v61 = vperm.slane %v3011_v17, 3 }
 0x1e1   :  { %v3108_v60 = vsel %vm310_vm5, %v324_v18, 0.0  ;;  %v541_v6 = vadd.f32 %v540_v46, %v522_v31  ;;  %vm4205_vm5 = vcmp.eq.s32.totalorder %v3089_v30, 2  ;;  %vm4209_vm1 = vcmp.eq.s32.totalorder %v3089_v30, 3 }
 0x1e2   :  { %v557_v18 = vsel %vm4200_vm15, %v556_v50, 0.0  ;;  %v574_v0 = vsel %vm4205_vm5, %v573_v41, 0.0  ;;  %v590_v29 = vadd.f32 %v4206_v61, %v2929_v32  ;;  %vm4204_vm15 = vcmp.eq.s32.totalorder %v3089_v30, 4 }
 0x1e3   :  { %v3113_v35 = vpop.permute.xlu2 %705  ;;  %v2626_v41 = vmov 38   ;;  %vm4210_vm5 = vcmp.eq.s32.totalorder %v3089_v30, 6 }
 0x1e4   :  { %v591_v32 = vsel %vm4209_vm1, %v590_v29, 0.0  ;;  %vm4212_vm1 = vcmp.eq.s32.totalorder %v3089_v30, 7 }
 0x1e7   :  { %2326 = vset.pattern.permute.xlu2 %v2586_v27  ;;  %2369 = vset.pattern.permute.xlu0 %v2614_v2  ;;  %v558_v2 = vadd.f32 %v557_v18, %v541_v6  ;;  %v4224_v18 = vperm.slane %v3011_v17, 6 }
 0x1e8   :  { %2325 = vset.pattern.permute.xlu1 %v2624_v19  ;;  %1159 = vperm.xlu2 %2326, %v2860_v55  }
 0x1e9   :  { %1575 = vperm.xlu0 %2369, %v2860_v55   ;;  %1078 = vperm.xlu1 %2325, %v2860_v55   ;;  %v604_v27 = vpop.permute.xlu1 %603  ;;  %v999_v31 = vpop.permute.xlu0 %998  ;;  %v575_v6 = vadd.f32 %v574_v0, %v558_v2 }
 0x1ea   :  { %v3135_v50 = vadd.f32 %v999_v31, %v298_v28  ;;  %v607_v46 = vadd.f32 %v4203_v40, %v604_v27  ;;  %v4207_v28 = vperm.slane %v3011_v17, 5  ;;  %v2625_v31 = vmov 39  }
 0x1eb   :  { %v592_v40 = vadd.f32 %v591_v32, %v575_v6  ;;  %v4223_v6 = vperm.slane %v3011_v17, 7 }
 0x1ec   :  { %v608_v27 = vsel %vm4204_vm15, %v607_v46, 0.0  ;;  %v624_v2 = vadd.f32 %v4207_v28, %v3033_v7  ;;  %vm4211_vm15 = vcmp.eq.s32.totalorder %v3089_v30, 5 }
 0x1ed   :  { %v3145_v21 = vpop.permute.xlu2 %739  ;;  %v609_v61 = vadd.f32 %v608_v27, %v592_v40  ;;  %v4222_v40 = vperm.slane %v3044_v10, 0 }
 0x1ee   :  { %v625_v7 = vsel %vm4211_vm15, %v624_v2, 0.0  ;;  %vm4214_vm15 = vcmp.eq.s32.totalorder %v3089_v30, 8 }
 0x1ef   :  { %v626_v3 = vadd.f32 %v625_v7, %v609_v61 }
 0x1f0   :  { %2329 = vset.pattern.permute.xlu2 %v2625_v31 }
 0x1f1   :  { %2327 = vset.pattern.permute.xlu1 %v2626_v41  ;;  %1124 = vperm.xlu2 %2329, %v2860_v55  }
 0x1f2   :  { %1101 = vperm.xlu1 %2327, %v2860_v55   ;;  %v638_v0 = vpop.permute.xlu1 %637  ;;  %2372 = vset.pattern.permute.xlu0 %v2613_v1 }
 0x1f3   :  { %v641_v29 = vadd.f32 %v4224_v18, %v638_v0  ;;  %v1068_v46 = vpop.permute.xlu0 %1067  ;;  %v658_v0 = vadd.f32 %v4223_v6, %v3072_v23 }
 0x1f4   :  { %v3169_v32 = vadd.f32 %v1068_v46, %v349_v20  ;;  %v4220_v20 = vperm.slane %v3044_v10, 1 }
 0x1f5   :  { %v642_v1 = vsel %vm4210_vm5, %v641_v29, 0.0  ;;  %v659_v61 = vsel %vm4212_vm1, %v658_v0, 0.0  ;;  %v675_v29 = vadd.f32 %v4222_v40, %v2970_v8  ;;  %vm4213_vm5 = vcmp.eq.s32.totalorder %v3089_v30, 9 }
 0x1f6   :  { %v791_v28 = vpop.permute.xlu2 %790  ;;  %v643_v27 = vadd.f32 %v642_v1, %v626_v3  ;;  %v4215_v3 = vperm.slane %v3044_v10, 2  ;;  %vm703_vm1 = vcmp.eq.s32.totalorder %v3089_v30, 10 }
 0x1f7   :  { %v676_v1 = vsel %vm4214_vm15, %v675_v29, 0.0  ;;  %vm4218_vm15 = vcmp.eq.s32.totalorder %v3089_v30, 12 }
 0x1f8   :  { %v709_v8 = vadd.f32 %v4215_v3, %v3113_v35 }
 0x1f9   :  { %2331 = vset.pattern.permute.xlu2 %v2622_v59 }
 0x1fa   :  { %2330 = vset.pattern.permute.xlu1 %v2596_v44  ;;  %1147 = vperm.xlu2 %2331, %v2860_v55   ;;  %v660_v44 = vadd.f32 %v659_v61, %v643_v27  ;;  %v4226_v61 = vperm.slane %v3044_v10, 4  ;;  %v710_v35 = vsel %vm703_vm1, %v709_v8, 0.0 }
 0x1fb   :  { %1205 = vperm.xlu1 %2330, %v2860_v55  }
 0x1fc   :  { %v689_v2 = vpop.permute.xlu1 %688  ;;  %v3187_v23 = vpop.permute.xlu0 %1055  ;;  %v677_v0 = vadd.f32 %v676_v1, %v660_v44 }
 0x1fd   :  { %v692_v59 = vadd.f32 %v4220_v20, %v689_v2  ;;  %v4231_v2 = vperm.slane %v3044_v10, 3  ;;  %v2627_v20 = vmov 44  }
 0x1ff   :  { %v693_v46 = vsel %vm4213_vm5, %v692_v59, 0.0  ;;  %vm4217_vm5 = vcmp.eq.s32.totalorder %v3089_v30, 11 }
 0x200   :  { %v270_v7 = vpop.permute.xlu2 %269  ;;  %v694_v27 = vadd.f32 %v693_v46, %v677_v0  ;;  %v743_v46 = vadd.f32 %v4226_v61, %v3145_v21  ;;  %v4219_v0 = vperm.slane %v3044_v10, 5  ;;  %v4228_v21 = vperm.slane %v3044_v10, 6 }
 0x202   :  { %2334 = vset.pattern.permute.xlu2 %v2599_v48  ;;  %v2186_v48 = vld [vmem:[%s4172_s7 + $0x18] sm:$0xff]  ;;  %v711_v44 = vadd.f32 %v710_v35, %v694_v27  ;;  %v4225_v27 = vperm.slane %v3044_v10, 7 }
 0x203   :  { %2332 = vset.pattern.permute.xlu1 %v2600_v49  ;;  %1251 = vperm.xlu2 %2334, %v2860_v55  }
 0x204   :  { %1228 = vperm.xlu1 %2332, %v2860_v55   ;;  %2140 = vmatmul.msk.bf16.gmra.mxu2 %vm4216_vm0, %v2186_v48  ;;  %v760_v48 = vadd.f32 %v4219_v0, %v3018_v62  ;;  %vm754_vm0 = vcmp.eq.s32.totalorder %v3089_v30, 13 }
 0x205   :  { %v723_v29 = vpop.permute.xlu1 %722 }
 0x206   :  { %v726_v49 = vadd.f32 %v4231_v2, %v723_v29  ;;  %v3219_v59 = vpop.permute.xlu0 %1182  ;;  %v744_v29 = vsel %vm4218_vm15, %v743_v46, 0.0  ;;  %v761_v46 = vsel %vm754_vm0, %v760_v48, 0.0  ;;  %vm4221_vm15 = vcmp.eq.s32.totalorder %v3089_v30, 15  ;;  %v256_v48 = vld [vmem:[%s4167_s2] sm:$0xff] }
 0x207   :  { %v4233_v2 = vmov 52  }
 0x208   :  { %v727_v1 = vsel %vm4217_vm5, %v726_v49, 0.0  ;;  %vm771_vm5 = vcmp.eq.s32.totalorder %v3089_v30, 14 }
 0x209   :  { %v338_v8 = vpop.permute.xlu2 %337  ;;  %v728_v3 = vadd.f32 %v727_v1, %v711_v44  ;;  %v4235_v1 = vperm.slane %v3078_v57, 0 }
 0x20b   :  { %2336 = vset.pattern.permute.xlu2 %v2589_v33  ;;  %v745_v33 = vadd.f32 %v744_v29, %v728_v3 }
 0x20c   :  { %2335 = vset.pattern.permute.xlu1 %v2623_v14  ;;  %1274 = vperm.xlu2 %2336, %v2860_v55   ;;  %v794_v14 = vadd.f32 %v4225_v27, %v791_v28  ;;  %v2630_v27 = vmov 47  }
 0x20d   :  { %1193 = vperm.xlu1 %2335, %v2860_v55   ;;  %v762_v62 = vadd.f32 %v761_v46, %v745_v33  ;;  %v289_v33 = vperm.slane %v3078_v57, 1 }
 0x20e   :  { %v795_v28 = vsel %vm4221_vm15, %v794_v14, 0.0  ;;  %v273_v14 = vadd.f32 %v4235_v1, %v270_v7  ;;  %vm830_vm15 = vcmask 64512   ;;  %v4241_v1 = vmov 54  }
 0x20f   :  { %v774_v35 = vpop.permute.xlu1 %773  ;;  %v3242_v49 = vpop.permute.xlu0 %1170 }
 0x210   :  { %v777_v44 = vadd.f32 %v4228_v21, %v774_v35  ;;  %v2628_v35 = vmov 43   ;;  %v274_v18 = vsel %vm258_vm3, %v273_v14, 0.0  ;;  %v4237_v14 = vperm.slane %v3078_v57, 4 }
 0x212   :  { %v778_v3 = vsel %vm771_vm5, %v777_v44, 0.0 }
 0x213   :  { %v3254_v29 = vpop.permute.xlu2 %1021  ;;  %v779_v0 = vadd.f32 %v778_v3, %v762_v62 }
 0x214   :  { %2339 = vset.pattern.permute.xlu2 %v2627_v20 }
 0x215   :  { %2337 = vset.pattern.permute.xlu1 %v2628_v35  ;;  %1239 = vperm.xlu2 %2339, %v2860_v55   ;;  %v796_v44 = vadd.f32 %v795_v28, %v779_v0 }
 0x216   :  { %1216 = vperm.xlu1 %2337, %v2860_v55  }
 0x217   :  { %v806_v46 = vmul.f32 %v796_v44, %v256_v48 }
 0x218   :  { %v287_v62 = vpop.permute.xlu1 %286 }
 0x219   :  { %v290_v3 = vadd.f32 %v289_v33, %v287_v62  ;;  %v3270_v40 = vpop.permute.xlu0 %1297  ;;  %v3273_v6 = vadd.f32 %v2904_v12, %v806_v46  ;;  %v4254_v12 = vperm.slane %v3078_v57, 2  ;;  %v341_v46 = vadd.f32 %v4237_v14, %v338_v8 }
 0x21a   :  { %v2629_v62 = vmov 46   ;;  %v4267_v14 = vperm.slane %v2939_v37, 3 }
 0x21b   :  { %v291_v0 = vsel %vm276_vm2, %v290_v3, 0.0  ;;  %831 = vst.msk [vmem:[#allocation9] sm:$0xff] %vm830_vm15, %v3273_v6  ;;  %v342_v8 = vsel %vm327_vm6, %v341_v46, 0.0  ;;  %vm4285_vm6 = vcmp.eq.s32.totalorder %v2936_v36, 13 }
 0x21c   :  { %v292_v7 = vadd.f32 %v291_v0, %v274_v18  ;;  %v3281_v28 = vpop.permute.xlu2 %963  ;;  %v1024_v25 = vadd.f32 %v3254_v29, %v4267_v14 }
 0x21d   :  { %2342 = vset.pattern.permute.xlu2 %v2605_v54 }
 0x21e   :  { %2340 = vset.pattern.permute.xlu1 %v2602_v51  ;;  %1345 = vperm.xlu2 %2342, %v2860_v55  }
 0x21f   :  { %1322 = vperm.xlu1 %2340, %v2860_v55  }
 0x222   :  { %v304_v48 = vpop.permute.xlu1 %303  ;;  %v3288_v44 = vpop.permute.xlu0 %1262 }
 0x223   :  { %v307_v18 = vadd.f32 %v4254_v12, %v304_v48 }
 0x225   :  { %v308_v51 = vsel %vm293_vm4, %v307_v18, 0.0  ;;  %vm4282_vm4 = vcmp.eq.s32.totalorder %v2936_v36, 12 }
 0x226   :  { %v309_v54 = vadd.f32 %v308_v51, %v292_v7  ;;  %2343 = vset.pattern.permute.xlu2 %v2629_v62  ;;  %v3298_v3 = vpop.permute.xlu2 %1009 }
 0x227   :  { %2344 = vset.pattern.permute.xlu1 %v2604_v53  ;;  %1285 = vperm.xlu2 %2343, %v2860_v55  }
 0x228   :  { %1368 = vperm.xlu1 %2344, %v2860_v55   ;;  %v326_v0 = vadd.f32 %v3108_v60, %v309_v54  ;;  %v2632_v54 = vmov 48  }
 0x22a   :  { %v3306_v48 = vadd.f32 %v342_v8, %v326_v0  ;;  %v3329_v0 = vpop.f32.mrf.mxu2 }
 0x22b   :  { %v3308_v18 = vpop.permute.xlu0 %1414  ;;  %v4234_v8 = vperm.slane %v3329_v0, 0 }
 0x22c   :  { %v953_v7 = vpop.permute.xlu1 %952 }
 0x22d   :  { %v955_v51 = vadd.f32 %v953_v7, %v264_v42 }
 0x22f   :  { %2345 = vset.pattern.permute.xlu2 %v2630_v27  ;;  %v3313_v53 = vpop.permute.xlu2 %1032  ;;  %957 = vrot.lane.b32.xlu0 %v955_v51, %s2631_s23 }
 0x230   :  { %2346 = vset.pattern.permute.xlu1 %v2592_v39  ;;  %1308 = vperm.xlu2 %2345, %v2860_v55  }
 0x231   :  { %1391 = vperm.xlu1 %2346, %v2860_v55  }
 0x235   :  { %v3319_v60 = vpop.permute.xlu0 %1460  ;;  %v1045_v46 = vpop.permute.xlu1 %1044 }
 0x236   :  { %v1047_v42 = vadd.f32 %v1045_v46, %v332_v63  ;;  %v4230_v46 = vperm.slane %v3329_v0, 2 }
 0x238   :  { %2349 = vset.pattern.permute.xlu2 %v2624_v19  ;;  %1049 = vrot.lane.b32.xlu0 %v1047_v42, %s2631_s23 }
 0x239   :  { %2347 = vset.pattern.permute.xlu1 %v2632_v54  ;;  %354 = vperm.xlu2 %2349, %v2800_v24   ;;  %v3327_v39 = vpop.permute.xlu2 %1136 }
 0x23a   :  { %1333 = vperm.xlu1 %2347, %v2860_v55  }
 0x23e   :  { %v406_v7 = vpop.permute.xlu0 %405 }
 0x23f   :  { %v3335_v63 = vadd.f32 %v4234_v8, %v406_v7  ;;  %v3337_v19 = vpop.permute.xlu1 %986 }
 0x240   :  { %1598 = vperm.xlu0 %2372, %v2860_v55  }
 0x241   :  { %2352 = vset.pattern.permute.xlu2 %v2606_v56  ;;  %v2633_v56 = vmov 49  }
 0x242   :  { %2350 = vset.pattern.permute.xlu1 %v2626_v41  ;;  %1437 = vperm.xlu2 %2352, %v2860_v55   ;;  %v3343_v51 = vpop.permute.xlu2 %1159 }
 0x243   :  { %371 = vperm.xlu1 %2350, %v2800_v24  }
 0x248   :  { %v440_v42 = vpop.permute.xlu0 %439  ;;  %v3347_v61 = vpop.permute.xlu1 %1090  ;;  %2375 = vset.pattern.permute.xlu0 %v2598_v47  ;;  %v2634_v47 = vmov 51  }
 0x249   :  { %v3352_v7 = vadd.f32 %v4230_v46, %v440_v42  ;;  %1621 = vperm.xlu0 %2375, %v2860_v55   ;;  %v2635_v42 = vmov 50   ;;  %v4236_v46 = vperm.slane %v3329_v0, 1 }
 0x24a   :  { %2355 = vset.pattern.permute.xlu2 %v2625_v31 }
 0x24b   :  { %2351 = vset.pattern.permute.xlu1 %v2633_v56  ;;  %388 = vperm.xlu2 %2355, %v2800_v24   ;;  %v3357_v41 = vpop.permute.xlu2 %1124 }
 0x24c   :  { %1356 = vperm.xlu1 %2351, %v2860_v55  }
 0x251   :  { %2378 = vset.pattern.permute.xlu0 %v2616_v5 }
 0x252   :  { %v3361_v52 = vpop.permute.xlu1 %1113  ;;  %1644 = vperm.xlu0 %2378, %v2860_v55  }
 0x253   :  { %2357 = vset.pattern.permute.xlu2 %v2634_v47 }
 0x254   :  { %2353 = vset.pattern.permute.xlu1 %v2635_v42  ;;  %1402 = vperm.xlu2 %2357, %v2860_v55   ;;  %v3366_v31 = vpop.permute.xlu2 %1147 }
 0x255   :  { %1379 = vperm.xlu1 %2353, %v2860_v55  }
 0x25a   :  { %2381 = vset.pattern.permute.xlu0 %v2615_v4  ;;  %v4232_v4 = vmov 53  }
 0x25b   :  { %v3370_v21 = vpop.permute.xlu1 %1078  ;;  %1667 = vperm.xlu0 %2381, %v2860_v55  }
 0x25c   :  { %2361 = vset.pattern.permute.xlu2 %v2595_v43 }
 0x25d   :  { %2358 = vset.pattern.permute.xlu1 %v2608_v58  ;;  %1506 = vperm.xlu2 %2361, %v2860_v55   ;;  %v3376_v5 = vpop.permute.xlu2 %1251  ;;  %v1173_v58 = vadd.f32 %v3242_v49, %v4236_v46  ;;  %v4264_v49 = vmov 25   ;;  %v4266_v46 = vmov 45  }
 0x25e   :  { %1483 = vperm.xlu1 %2358, %v2860_v55  }
 0x263   :  { %2384 = vset.pattern.permute.xlu0 %v2633_v56 }
 0x264   :  { %v3379_v34 = vpop.permute.xlu1 %1101  ;;  %560 = vperm.xlu0 %2384, %v2800_v24  }
 0x265   :  { %2362 = vset.pattern.permute.xlu2 %v4232_v4  ;;  %v4263_v4 = vmov 41  }
 0x266   :  { %2359 = vset.pattern.permute.xlu1 %v4233_v2  ;;  %1448 = vperm.xlu2 %2362, %v2860_v55   ;;  %v3386_v43 = vpop.permute.xlu2 %1274 }
 0x267   :  { %1425 = vperm.xlu1 %2359, %v2860_v55  }
 0x26c   :  { %1175 = vrot.lane.b32.xlu0 %v1173_v58, %s2631_s23 }
 0x26d   :  { %v3393_v56 = vpop.permute.xlu1 %1205  ;;  %2388 = vset.pattern.permute.xlu0 %v2634_v47 }
 0x26e   :  { %2367 = vset.pattern.permute.xlu2 %v2628_v35  ;;  %v4265_v35 = vperm.slane %v2939_v37, 1 }
 0x26f   :  { %2360 = vset.pattern.permute.xlu1 %v4263_v4  ;;  %456 = vperm.xlu2 %2367, %v2800_v24   ;;  %v1240_v2 = vpop.permute.xlu2 %1239 }
 0x270   :  { %422 = vperm.xlu1 %2360, %v2800_v24   ;;  %v978_v4 = vadd.f32 %v3099_v38, %v4265_v35  ;;  %v4240_v35 = vmov 55  }
 0x274   :  { %594 = vperm.xlu0 %2388, %v2800_v24  }
 0x276   :  { %v3400_v8 = vpop.permute.xlu1 %1228 }
 0x277   :  { %2370 = vset.pattern.permute.xlu2 %v2627_v20 }
 0x278   :  { %2363 = vset.pattern.permute.xlu1 %v4264_v49  ;;  %473 = vperm.xlu2 %2370, %v2800_v24   ;;  %v3405_v47 = vpop.permute.xlu2 %1345  ;;  %v4249_v49 = vperm.slane %v3329_v0, 3 }
 0x279   :  { %1529 = vperm.xlu1 %2363, %v2860_v55  }
 0x27f   :  { %v3411_v58 = vpop.permute.xlu1 %1193 }
 0x280   :  { %980 = vrot.lane.b32.xlu2 %v978_v4, %s2631_s23 }
 0x281   :  { %2365 = vset.pattern.permute.xlu1 %v4241_v1  ;;  %v1286_v20 = vpop.permute.xlu2 %1285  ;;  %2373 = vset.pattern.permute.xlu2 %v4266_v46  ;;  %v4242_v46 = vperm.slane %v3329_v0, 4  ;;  %v4248_v1 = vperm.slane %v3329_v0, 5 }
 0x282   :  { %1471 = vperm.xlu1 %2365, %v2860_v55  }
 0x283   :  { %v1242_v29 = vadd.f32 %v1240_v2, %v4242_v46 }
 0x288   :  { %v1217_v15 = vpop.permute.xlu1 %1216  ;;  %1026 = vrot.lane.b32.xlu2 %v1024_v25, %s2631_s23  ;;  %v4251_v25 = vperm.slane %v3078_v57, 5 }
 0x289   :  { %v1219_v38 = vadd.f32 %v1217_v15, %v4249_v49  ;;  %v4243_v15 = vmov 56  }
 0x28a   :  { %2368 = vset.pattern.permute.xlu1 %v4240_v35  ;;  %v1309_v4 = vpop.permute.xlu2 %1308 }
 0x28b   :  { %1494 = vperm.xlu1 %2368, %v2860_v55   ;;  %1221 = vrot.lane.b32.xlu0 %v1219_v38, %s2631_s23 }
 0x290   :  { %490 = vperm.xlu2 %2373, %v2800_v24  }
 0x291   :  { %v3431_v14 = vpop.permute.xlu1 %1322 }
 0x293   :  { %2371 = vset.pattern.permute.xlu1 %v4243_v15  ;;  %1244 = vrot.lane.b32.xlu0 %v1242_v29, %s2631_s23  ;;  %v355_v35 = vpop.permute.xlu2 %354  ;;  %v1265_v15 = vadd.f32 %v3288_v44, %v4248_v1 }
 0x294   :  { %v358_v38 = vadd.f32 %v4251_v25, %v355_v35  ;;  %1517 = vperm.xlu1 %2371, %v2860_v55  }
 0x296   :  { %v359_v2 = vsel %vm344_vm7, %v358_v38, 0.0  ;;  %v4245_v38 = vperm.slane %v3329_v0, 6  ;;  %vm4289_vm7 = vcmp.eq.s32.totalorder %v2936_v36, 14 }
 0x297   :  { %v360_v46 = vadd.f32 %v359_v2, %v3306_v48  ;;  %v4244_v48 = vmov 57  }
 0x298   :  { %2376 = vset.pattern.permute.xlu2 %v2629_v62  ;;  %v1288_v62 = vadd.f32 %v1286_v20, %v4245_v38 }
 0x299   :  { %507 = vperm.xlu2 %2376, %v2800_v24  }
 0x29a   :  { %v3448_v29 = vpop.permute.xlu1 %1368 }
 0x29b   :  { %1267 = vrot.lane.b32.xlu0 %v1265_v15, %s2631_s23 }
 0x29c   :  { %1003 = vrot.lane.b32.xlu1 %v3135_v50, %s2631_s23  ;;  %v3453_v35 = vpop.permute.xlu2 %1437  ;;  %v4246_v50 = vperm.slane %v3329_v0, 7 }
 0x29d   :  { %2374 = vset.pattern.permute.xlu1 %v4244_v48  ;;  %v3468_v48 = vpop.f32.mrf.mxu2 }
 0x29e   :  { %v1311_v2 = vadd.f32 %v1309_v4, %v4246_v50  ;;  %v3483_v50 = vpop.permute.xlu0 %1552 }
 0x2a1   :  { %2379 = vset.pattern.permute.xlu2 %v2630_v27  ;;  %v4247_v27 = vmov 58  }
 0x2a2   :  { %524 = vperm.xlu2 %2379, %v2800_v24  }
 0x2a3   :  { %1290 = vrot.lane.b32.xlu0 %v1288_v62, %s2631_s23  ;;  %v3462_v44 = vpop.permute.xlu1 %1391  ;;  %v4250_v62 = vperm.slane %v3468_v48, 0 }
 0x2a4   :  { %1540 = vperm.xlu1 %2374, %v2860_v55  }
 0x2a5   :  { %v389_v15 = vpop.permute.xlu2 %388 }
 0x2aa   :  { %2382 = vset.pattern.permute.xlu2 %v2632_v54  ;;  %v4255_v54 = vperm.slane %v3078_v57, 7 }
 0x2ab   :  { %1313 = vrot.lane.b32.xlu0 %v1311_v2, %s2631_s23  ;;  %543 = vperm.xlu2 %2382, %v2800_v24   ;;  %v4256_v2 = vperm.slane %v3078_v57, 6 }
 0x2ac   :  { %2377 = vset.pattern.permute.xlu1 %v4247_v27  ;;  %v1334_v20 = vpop.permute.xlu1 %1333  ;;  %v4253_v27 = vmov 59   ;;  %v392_v49 = vadd.f32 %v4255_v54, %v389_v15  ;;  %v410_v15 = vsel %vm395_vm10, %v3335_v63, 0.0  ;;  %v989_v63 = vadd.f32 %v3337_v19, %v289_v33 }
 0x2ad   :  { %1563 = vperm.xlu1 %2377, %v2860_v55   ;;  %v1336_v4 = vadd.f32 %v1334_v20, %v4250_v62  ;;  %v4268_v62 = vperm.slane %v2939_v37, 6  ;;  %v597_v33 = vperm.slane %v3468_v48, 3  ;;  %v4271_v19 = vperm.slane %v3078_v57, 2 }
 0x2ae   :  { %v1403_v38 = vpop.permute.xlu2 %1402 }
 0x2af   :  { %v1093_v25 = vadd.f32 %v3347_v61, %v4268_v62  ;;  %v3508_v61 = vpop.permute.xlu0 %1575 }
 0x2b3   :  { %1338 = vrot.lane.b32.xlu0 %v1336_v4, %s2631_s23  ;;  %1072 = vrot.lane.b32.xlu2 %v3169_v32, %s2631_s23 }
 0x2b5   :  { %2380 = vset.pattern.permute.xlu1 %v4253_v27  ;;  %v372_v1 = vpop.permute.xlu1 %371  ;;  %v393_v27 = vsel %vm378_vm9, %v392_v49, 0.0  ;;  %vm4296_vm9 = vcmp.eq.s32.totalorder %v3089_v30, 1 }
 0x2b6   :  { %v375_v20 = vadd.f32 %v4256_v2, %v372_v1  ;;  %1586 = vperm.xlu1 %2380, %v2860_v55   ;;  %v563_v1 = vperm.slane %v3468_v48, 1 }
 0x2b7   :  { %v3491_v4 = vpop.permute.xlu2 %1506 }
 0x2b8   :  { %v376_v32 = vsel %vm361_vm8, %v375_v20, 0.0  ;;  %v2644_v20 = vmov 60   ;;  %vm4294_vm8 = vcmp.eq.s32.totalorder %v3089_v30, 0 }
 0x2b9   :  { %v377_v26 = vadd.f32 %v376_v32, %v360_v46  ;;  %v4269_v46 = vperm.slane %v2939_v37, 7  ;;  %v4270_v37 = vperm.slane %v2972_v45, 0 }
 0x2bb   :  { %v394_v12 = vadd.f32 %v393_v27, %v377_v26  ;;  %1095 = vrot.lane.b32.xlu2 %v1093_v25, %s2631_s23  ;;  %v1116_v25 = vadd.f32 %v3361_v52, %v4269_v46  ;;  %v958_v27 = vpop.permute.xlu0 %957  ;;  %v1139_v52 = vadd.f32 %v3327_v39, %v4270_v37  ;;  %v4272_v39 = vperm.slane %v2972_v45, 1 }
 0x2bc   :  { %v4274_v37 = vperm.slane %v2972_v45, 2 }
 0x2bd   :  { %v3505_v54 = vadd.f32 %v410_v15, %v394_v12  ;;  %v580_v12 = vperm.slane %v3468_v48, 2  ;;  %v1012_v15 = vadd.f32 %v3298_v3, %v4271_v19  ;;  %v1162_v46 = vadd.f32 %v3343_v51, %v4272_v39 }
 0x2be   :  { %2383 = vset.pattern.permute.xlu1 %v2644_v20  ;;  %v1357_v2 = vpop.permute.xlu1 %1356  ;;  %v4273_v3 = vperm.slane %v3078_v57, 3  ;;  %v2645_v51 = vmov 61  }
 0x2bf   :  { %v1359_v49 = vadd.f32 %v1357_v2, %v563_v1  ;;  %1609 = vperm.xlu1 %2383, %v2860_v55   ;;  %2385 = vset.pattern.permute.xlu2 %v2645_v51 }
 0x2c0   :  { %v1449_v26 = vpop.permute.xlu2 %1448 }
 0x2c1   :  { %1361 = vrot.lane.b32.xlu0 %v1359_v49, %s2631_s23 }
 0x2c3   :  { %1118 = vrot.lane.b32.xlu2 %v1116_v25, %s2631_s23  ;;  %v3543_v25 = vpop.permute.xlu0 %1049 }
 0x2c7   :  { %991 = vrot.lane.b32.xlu1 %v989_v63, %s2631_s23  ;;  %v1380_v62 = vpop.permute.xlu1 %1379 }
 0x2c8   :  { %v1382_v2 = vadd.f32 %v1380_v62, %v580_v12  ;;  %2386 = vset.pattern.permute.xlu1 %v2635_v42  ;;  %v1405_v42 = vadd.f32 %v1403_v38, %v597_v33  ;;  %v1035_v62 = vadd.f32 %v3313_v53, %v4273_v3  ;;  %v3553_v38 = vld [vmem:[%s4168_s3 + $0x10] sm:$0xff]  ;;  %v1185_v53 = vadd.f32 %v3219_v59, %v4274_v37 }
 0x2c9   :  { %v457_v32 = vpop.permute.xlu2 %456  ;;  %vm949_vm2 = vcmp.eq.s32.totalorder %v3553_v38, 0  ;;  %vm973_vm3 = vcmp.eq.s32.totalorder %v3553_v38, 1  ;;  %v4275_v59 = vperm.slane %v3078_v57, 4  ;;  %v4257_v37 = vperm.slane %v3468_v48, 5 }
 0x2ca   :  { %1384 = vrot.lane.b32.xlu0 %v1382_v2, %s2631_s23  ;;  %v4258_v2 = vperm.slane %v3468_v48, 4  ;;  %vm996_vm10 = vcmp.eq.s32.totalorder %v3553_v38, 2 }
 0x2cb   :  { %1141 = vrot.lane.b32.xlu2 %v1139_v52, %s2631_s23  ;;  %v3567_v39 = vpop.permute.xlu0 %1598 }
 0x2cf   :  { %1014 = vrot.lane.b32.xlu1 %v1012_v15, %s2631_s23 }
 0x2d0   :  { %v3538_v49 = vpop.permute.xlu1 %1483 }
 0x2d2   :  { %1407 = vrot.lane.b32.xlu0 %v1405_v42, %s2631_s23  ;;  %v474_v63 = vpop.permute.xlu2 %473  ;;  %v960_v42 = vsel %vm949_vm2, %v958_v27, 0.0  ;;  %v4276_v27 = vperm.slane %v2972_v45, 3 }
 0x2d3   :  { %1164 = vrot.lane.b32.xlu2 %v1162_v46, %s2631_s23 }
 0x2d7   :  { %1037 = vrot.lane.b32.xlu1 %v1035_v62, %s2631_s23  ;;  %v1058_v62 = vadd.f32 %v3187_v23, %v4275_v59  ;;  %v4278_v23 = vperm.slane %v3078_v57, 5 }
 0x2d9   :  { %v1426_v52 = vpop.permute.xlu1 %1425  ;;  %v1081_v59 = vadd.f32 %v3370_v21, %v4278_v23 }
 0x2da   :  { %v1428_v19 = vadd.f32 %v1426_v52, %v4258_v2  ;;  %v981_v15 = vpop.permute.xlu2 %980  ;;  %v1208_v52 = vadd.f32 %v3393_v56, %v4276_v27  ;;  %v4279_v56 = vperm.slane %v3329_v0, 3 }
 0x2db   :  { %v983_v46 = vsel %vm973_vm3, %v981_v15, 0.0  ;;  %1187 = vrot.lane.b32.xlu2 %v1185_v53, %s2631_s23  ;;  %v1451_v15 = vadd.f32 %v1449_v26, %v4257_v37 }
 0x2dc   :  { %v3572_v3 = vadd.f32 %v983_v46, %v960_v42  ;;  %1430 = vrot.lane.b32.xlu0 %v1428_v19, %s2631_s23  ;;  %v4277_v19 = vperm.slane %v3329_v0, 1  ;;  %v460_v27 = vadd.f32 %v4279_v56, %v457_v32 }
 0x2de   :  { %v461_v32 = vsel %vm446_vm13, %v460_v27, 0.0  ;;  %vm1065_vm13 = vcmp.eq.s32.totalorder %v3553_v38, 5 }
 0x2df   :  { %1060 = vrot.lane.b32.xlu1 %v1058_v62, %s2631_s23  ;;  %v3594_v62 = vpop.permute.xlu0 %1621 }
 0x2e2   :  { %v423_v53 = vpop.permute.xlu1 %422  ;;  %v3585_v42 = vpop.permute.xlu2 %1026 }
 0x2e3   :  { %v426_v46 = vadd.f32 %v4277_v19, %v423_v53  ;;  %1210 = vrot.lane.b32.xlu2 %v1208_v52, %s2631_s23  ;;  %v444_v52 = vsel %vm429_vm12, %v3352_v7, 0.0  ;;  %v4281_v19 = vperm.slane %v3078_v57, 0  ;;  %v4283_v7 = vperm.slane %v3329_v0, 5 }
 0x2e4   :  { %1453 = vrot.lane.b32.xlu0 %v1451_v15, %s2631_s23  ;;  %v4280_v15 = vperm.slane %v3329_v0, 4  ;;  %vm1042_vm12 = vcmp.eq.s32.totalorder %v3553_v38, 4 }
 0x2e5   :  { %v427_v26 = vsel %vm412_vm11, %v426_v46, 0.0  ;;  %v966_v23 = vadd.f32 %v3281_v28, %v4281_v19  ;;  %vm1019_vm11 = vcmp.eq.s32.totalorder %v3553_v38, 3 }
 0x2e6   :  { %v428_v37 = vadd.f32 %v427_v26, %v3505_v54  ;;  %v477_v53 = vadd.f32 %v4280_v15, %v474_v63  ;;  %v4286_v15 = vperm.slane %v3329_v0, 0 }
 0x2e7   :  { %1083 = vrot.lane.b32.xlu1 %v1081_v59, %s2631_s23 }
 0x2e8   :  { %v445_v21 = vadd.f32 %v444_v52, %v428_v37  ;;  %v478_v54 = vsel %vm4282_vm4, %v477_v53, 0.0  ;;  %v4284_v37 = vperm.slane %v3078_v57, 6  ;;  %v3624_v52 = vpop.permute.xlu0 %1644  ;;  %v1150_v53 = vadd.f32 %v3366_v31, %v4286_v15 }
 0x2e9   :  { %vm1111_vm4 = vcmp.eq.s32.totalorder %v3553_v38, 7 }
 0x2ea   :  { %v491_v46 = vpop.permute.xlu2 %490  ;;  %v462_v56 = vadd.f32 %v461_v32, %v445_v21  ;;  %v1104_v28 = vadd.f32 %v3379_v34, %v4284_v37  ;;  %v648_v21 = vperm.slane %v3468_v48, 6  ;;  %v4287_v34 = vperm.slane %v3329_v0, 6 }
 0x2eb   :  { %v494_v26 = vadd.f32 %v4283_v7, %v491_v46  ;;  %v3616_v2 = vpop.permute.xlu1 %1529  ;;  %968 = vrot.lane.b32.xlu2 %v966_v23, %s2631_s23  ;;  %v2646_v23 = vmov 63  }
 0x2ec   :  { %v479_v63 = vadd.f32 %v478_v54, %v462_v56  ;;  %2402 = vset.pattern.permute.xlu0 %v2646_v23  ;;  %v4288_v56 = vperm.slane %v3078_v57, 7  ;;  %v4290_v57 = vperm.slane %v3044_v10, 3 }
 0x2ed   :  { %v495_v59 = vsel %vm4285_vm6, %v494_v26, 0.0  ;;  %vm1134_vm6 = vcmp.eq.s32.totalorder %v3553_v38, 8 }
 0x2ee   :  { %v496_v27 = vadd.f32 %v495_v59, %v479_v63  ;;  %v1127_v54 = vadd.f32 %v3357_v41, %v4288_v56  ;;  %v1578_v41 = vadd.f32 %v3508_v61, %v4290_v57  ;;  %v4293_v56 = vperm.slane %v3468_v48, 0 }
 0x2ef   :  { %1106 = vrot.lane.b32.xlu1 %v1104_v28, %s2631_s23  ;;  %v4291_v28 = vperm.slane %v3329_v0, 7 }
 0x2f0   :  { %v3644_v63 = vpop.permute.xlu0 %1667 }
 0x2f3   :  { %v508_v19 = vpop.permute.xlu2 %507  ;;  %1152 = vrot.lane.b32.xlu2 %v1150_v53, %s2631_s23 }
 0x2f4   :  { %v511_v32 = vadd.f32 %v4287_v34, %v508_v19  ;;  %v1472_v46 = vpop.permute.xlu1 %1471  ;;  %v4292_v19 = vperm.slane %v2972_v45, 5 }
 0x2f5   :  { %v1474_v7 = vadd.f32 %v1472_v46, %v648_v21 }
 0x2f6   :  { %v512_v31 = vsel %vm4289_vm7, %v511_v32, 0.0  ;;  %v1254_v34 = vadd.f32 %v3376_v5, %v4292_v19  ;;  %vm1157_vm7 = vcmp.eq.s32.totalorder %v3553_v38, 9 }
 0x2f7   :  { %v513_v26 = vadd.f32 %v512_v31, %v496_v27  ;;  %1129 = vrot.lane.b32.xlu1 %v1127_v54, %s2631_s23  ;;  %1476 = vrot.lane.b32.xlu0 %v1474_v7, %s2631_s23  ;;  %v4295_v31 = vperm.slane %v3329_v0, 2 }
 0x2f8   :  { %v561_v32 = vpop.permute.xlu0 %560 }
 0x2f9   :  { %v564_v46 = vadd.f32 %v563_v1, %v561_v32  ;;  %v1196_v5 = vadd.f32 %v3411_v58, %v4295_v31  ;;  %v1029_v58 = vsel %vm1019_vm11, %v3585_v42, 0.0 }
 0x2fb   :  { %1632 = vperm.xlu2 %2385, %v2860_v55  }
 0x2fc   :  { %v525_v37 = vpop.permute.xlu2 %524 }
 0x2fd   :  { %v528_v59 = vadd.f32 %v4291_v28, %v525_v37  ;;  %v3652_v15 = vpop.permute.xlu1 %1494  ;;  %v565_v37 = vsel %vm4296_vm9, %v564_v46, 0.0  ;;  %vm1203_vm9 = vcmp.eq.s32.totalorder %v3553_v38, 11 }
 0x2ff   :  { %v529_v27 = vsel %vm514_vm14, %v528_v59, 0.0  ;;  %1580 = vrot.lane.b32.xlu0 %v1578_v41, %s2631_s23  ;;  %v3687_v59 = vpop.f32.mrf.mxu2  ;;  %vm1088_vm14 = vcmp.eq.s32.totalorder %v3553_v38, 6 }
 0x300   :  { %v530_v53 = vadd.f32 %v529_v27, %v513_v26  ;;  %v699_v19 = vperm.slane %v3687_v59, 1 }
 0x303   :  { %1256 = vrot.lane.b32.xlu2 %v1254_v34, %s2631_s23 }
 0x304   :  { %2389 = vset.pattern.permute.xlu2 %v2646_v23 }
 0x305   :  { %v544_v61 = vpop.permute.xlu2 %543 }
 0x306   :  { %v547_v36 = vadd.f32 %v4293_v56, %v544_v61  ;;  %v3666_v54 = vpop.permute.xlu1 %1517 }
 0x308   :  { %v548_v7 = vsel %vm4294_vm8, %v547_v36, 0.0  ;;  %v3702_v36 = vld [vmem:[#allocation2] ss:$0 sm:$0xff]  ;;  %vm1180_vm8 = vcmp.eq.s32.totalorder %v3553_v38, 10 }
 0x309   :  { %v549_v26 = vadd.f32 %v548_v7, %v530_v53  ;;  %v1052_v53 = vsel %vm1042_vm12, %v3543_v25, 0.0  ;;  %v4297_v7 = vperm.slane %v2972_v45, 7 }
 0x30b   :  { %1198 = vrot.lane.b32.xlu2 %v1196_v5, %s2631_s23  ;;  %v3676_v57 = vadd.f32 %v565_v37, %v549_v26  ;;  %v1300_v31 = vadd.f32 %v3270_v40, %v4297_v7  ;;  %v3712_v5 = vadd.f32 %v3702_v36, %v3273_v6 }
 0x30d   :  { %v1073_v1 = vpop.permute.xlu2 %1072 }
 0x30e   :  { %v1004_v41 = vpop.permute.xlu1 %1003  ;;  %v1075_v34 = vsel %vm1065_vm13, %v1073_v1, 0.0  ;;  %v4298_v1 = vperm.slane %v3044_v10, 6 }
 0x30f   :  { %v1006_v28 = vsel %vm996_vm10, %v1004_v41, 0.0 }
 0x310   :  { %v1007_v0 = vadd.f32 %v1006_v28, %v3572_v3  ;;  %v1647_v41 = vadd.f32 %v3624_v52, %v4298_v1  ;;  %v1176_v1 = vpop.permute.xlu0 %1175 }
 0x312   :  { %v1030_v27 = vadd.f32 %v1029_v58, %v1007_v0  ;;  %v836_v0 = vsel %vm830_vm15, %v3712_v5, -inf  ;;  %v4299_v58 = vperm.slane %v3011_v17, 0 }
 0x313   :  { %1678 = vperm.xlu2 %2389, %v2860_v55  }
 0x314   :  { %v1053_v3 = vadd.f32 %v1052_v53, %v1030_v27  ;;  %v1325_v27 = vadd.f32 %v3431_v14, %v4299_v58 }
 0x315   :  { %v1096_v42 = vpop.permute.xlu2 %1095 }
 0x316   :  { %v1076_v32 = vadd.f32 %v1075_v34, %v1053_v3  ;;  %v1098_v61 = vsel %vm1088_vm14, %v1096_v42, 0.0  ;;  %v1541_v46 = vpop.permute.xlu1 %1540  ;;  %v750_v42 = vperm.slane %v3687_v59, 4 }
 0x317   :  { %v1543_v56 = vadd.f32 %v1541_v46, %v699_v19 }
 0x318   :  { %v1099_v25 = vadd.f32 %v1098_v61, %v1076_v32 }
 0x319   :  { %1545 = vrot.lane.b32.xlu0 %v1543_v56, %s2631_s23 }
 0x31b   :  { %1302 = vrot.lane.b32.xlu2 %v1300_v31, %s2631_s23  ;;  %v4300_v31 = vperm.slane %v2972_v45, 4 }
 0x31d   :  { %v1119_v26 = vpop.permute.xlu2 %1118 }
 0x31e   :  { %v1121_v37 = vsel %vm1111_vm4, %v1119_v26, 0.0  ;;  %v1231_v26 = vadd.f32 %v3400_v8, %v4300_v31  ;;  %v4301_v31 = vperm.slane %v2972_v45, 6 }
 0x31f   :  { %v1122_v28 = vadd.f32 %v1121_v37, %v1099_v25  ;;  %v3719_v40 = vpop.permute.xlu1 %1563 }
 0x321   :  { %1649 = vrot.lane.b32.xlu0 %v1647_v41, %s2631_s23  ;;  %837 = vmax.xlane.f32.xlu1 %v836_v0 }
 0x323   :  { %1327 = vrot.lane.b32.xlu2 %v1325_v27, %s2631_s23 }
 0x325   :  { %v1142_v6 = vpop.permute.xlu2 %1141 }
 0x326   :  { %v1144_v52 = vsel %vm1134_vm6, %v1142_v6, 0.0 }
 0x327   :  { %v1145_v53 = vadd.f32 %v1144_v52, %v1122_v28  ;;  %v3757_v52 = vpop.permute.xlu0 %594 }
 0x328   :  { %v3731_v3 = vpop.permute.xlu1 %1586 }
 0x32d   :  { %v1165_v34 = vpop.permute.xlu2 %1164 }
 0x32e   :  { %v1167_v14 = vsel %vm1157_vm7, %v1165_v34, 0.0 }
 0x32f   :  { %v1168_v32 = vadd.f32 %v1167_v14, %v1145_v53 }
 0x331   :  { %v1610_v61 = vpop.permute.xlu1 %1609 }
 0x332   :  { %v1612_v46 = vadd.f32 %v1610_v61, %v750_v42 }
 0x334   :  { %1614 = vrot.lane.b32.xlu0 %v1612_v46, %s2631_s23  ;;  %v2647_v46 = vmov 62  }
 0x335   :  { %v1188_v56 = vpop.permute.xlu2 %1187 }
 0x336   :  { %v1190_v25 = vsel %vm1180_vm8, %v1188_v56, 0.0 }
 0x337   :  { %v1191_v7 = vadd.f32 %v1190_v25, %v1168_v32 }
 0x339   :  { %v992_v37 = vpop.permute.xlu1 %991 }
 0x33a   :  { %1233 = vrot.lane.b32.xlu1 %v1231_v26, %s2631_s23  ;;  %v994_v6 = vsel %vm973_vm3, %v992_v37, 0.0  ;;  %v1277_v26 = vadd.f32 %v3386_v43, %v4301_v31  ;;  %vm1249_vm3 = vcmp.eq.s32.totalorder %v3553_v38, 13 }
 0x33d   :  { %v1211_v41 = vpop.permute.xlu2 %1210 }
 0x33e   :  { %v1213_v28 = vsel %vm1203_vm9, %v1211_v41, 0.0 }
 0x33f   :  { %v3750_v0 = vadd.f32 %v1213_v28, %v1191_v7  ;;  %v1222_v7 = vpop.permute.xlu0 %1221 }
 0x341   :  { %v1015_v58 = vpop.permute.xlu1 %1014 }
 0x342   :  { %577 = vperm.xlu1 %2386, %v2800_v24   ;;  %v1017_v34 = vsel %vm996_vm10, %v1015_v58, 0.0  ;;  %v4302_v58 = vmov 52   ;;  %vm1272_vm10 = vcmp.eq.s32.totalorder %v3553_v38, 14 }
 0x345   :  { %v969_v27 = vpop.permute.xlu2 %968 }
 0x346   :  { %v971_v8 = vsel %vm949_vm2, %v969_v27, 0.0  ;;  %vm1226_vm2 = vcmp.eq.s32.totalorder %v3553_v38, 12 }
 0x347   :  { %v995_v53 = vadd.f32 %v994_v6, %v971_v8  ;;  %v1245_v6 = vpop.permute.xlu0 %1244 }
 0x349   :  { %v1018_v14 = vadd.f32 %v1017_v34, %v995_v53  ;;  %v1038_v32 = vpop.permute.xlu1 %1037 }
 0x34a   :  { %v1040_v61 = vsel %vm1019_vm11, %v1038_v32, 0.0  ;;  %2387 = vset.pattern.permute.xlu1 %v2647_v46  ;;  %vm1295_vm11 = vcmp.eq.s32.totalorder %v3553_v38, 15  ;;  %v716_v38 = vperm.slane %v3687_v59, 2 }
 0x34b   :  { %v1041_v56 = vadd.f32 %v1040_v61, %v1018_v14  ;;  %1655 = vperm.xlu1 %2387, %v2860_v55   ;;  %v4303_v61 = vmov 53  }
 0x34d   :  { %v1153_v25 = vpop.permute.xlu2 %1152 }
 0x34f   :  { %v1268_v14 = vpop.permute.xlu0 %1267 }
 0x351   :  { %v1061_v37 = vpop.permute.xlu1 %1060 }
 0x352   :  { %v1063_v41 = vsel %vm1042_vm12, %v1061_v37, 0.0  ;;  %v801_v37 = vperm.slane %v3687_v59, 7  ;;  %vm4311_vm12 = vcmp.eq.s32.totalorder %v3089_v30, 2 }
 0x353   :  { %v1064_v28 = vadd.f32 %v1063_v41, %v1041_v56  ;;  %1279 = vrot.lane.b32.xlu1 %v1277_v26, %s2631_s23 }
 0x354   :  { %2390 = vset.pattern.permute.xlu1 %v4302_v58  ;;  %v4304_v58 = vmov 54  }
 0x355   :  { %v3772_v27 = vpop.permute.xlu2 %1632 }
 0x359   :  { %v1084_v8 = vpop.permute.xlu1 %1083 }
 0x35a   :  { %v1086_v55 = vsel %vm1065_vm13, %v1084_v8, 0.0  ;;  %v1291_v8 = vpop.permute.xlu0 %1290  ;;  %vm4312_vm13 = vcmp.eq.s32.totalorder %v3089_v30, 3 }
 0x35b   :  { %v1087_v53 = vadd.f32 %v1086_v55, %v1064_v28  ;;  %611 = vperm.xlu1 %2390, %v2800_v24   ;;  %v1155_v28 = vsel %vm1134_vm6, %v1153_v25, 0.0 }
 0x35d   :  { %v3777_v45 = vpop.permute.xlu2 %1256 }
 0x361   :  { %v1107_v43 = vpop.permute.xlu1 %1106 }
 0x362   :  { %v1109_v34 = vsel %vm1088_vm14, %v1107_v43, 0.0  ;;  %v1178_v43 = vsel %vm1157_vm7, %v1176_v1, 0.0  ;;  %v1247_v1 = vsel %vm1226_vm2, %v1245_v6, 0.0  ;;  %vm4318_vm14 = vcmp.eq.s32.totalorder %v3089_v30, 4 }
 0x363   :  { %v1110_v32 = vadd.f32 %v1109_v34, %v1087_v53  ;;  %2391 = vset.pattern.permute.xlu1 %v4303_v61  ;;  %vm4328_vm7 = vcmp.eq.s32.totalorder %v3089_v30, 5 }
 0x364   :  { %628 = vperm.xlu1 %2391, %v2800_v24  }
 0x365   :  { %v1199_v56 = vpop.permute.xlu2 %1198 }
 0x369   :  { %v1130_v31 = vpop.permute.xlu1 %1129 }
 0x36a   :  { %v1132_v26 = vsel %vm1111_vm4, %v1130_v31, 0.0  ;;  %v1224_v31 = vsel %vm1203_vm9, %v1222_v7, 0.0  ;;  %vm4330_vm9 = vcmp.eq.s32.totalorder %v3089_v30, 7 }
 0x36b   :  { %v1133_v41 = vadd.f32 %v1132_v26, %v1110_v32  ;;  %v1201_v32 = vsel %vm1180_vm8, %v1199_v56, 0.0  ;;  %v1270_v56 = vsel %vm1249_vm3, %v1268_v14, 0.0  ;;  %v4307_v14 = vmov 57  }
 0x36c   :  { %2392 = vset.pattern.permute.xlu1 %v4304_v58  ;;  %v1314_v58 = vpop.permute.xlu0 %1313  ;;  %vm4329_vm8 = vcmp.eq.s32.totalorder %v3089_v30, 6 }
 0x36d   :  { %v1156_v55 = vadd.f32 %v1155_v28, %v1133_v41  ;;  %645 = vperm.xlu1 %2392, %v2800_v24   ;;  %v1679_v53 = vpop.permute.xlu2 %1678  ;;  %v4305_v28 = vmov 55   ;;  %v1316_v6 = vsel %vm1295_vm11, %v1314_v58, 0.0 }
 0x36e   :  { %v1681_v34 = vadd.f32 %v1679_v53, %v801_v37 }
 0x36f   :  { %v1179_v61 = vadd.f32 %v1178_v43, %v1156_v55  ;;  %v1293_v55 = vsel %vm1272_vm10, %v1291_v8, 0.0 }
 0x370   :  { %1683 = vrot.lane.b32.xlu0 %v1681_v34, %s2631_s23  ;;  %v4306_v34 = vmov 56  }
 0x371   :  { %v1202_v25 = vadd.f32 %v1201_v32, %v1179_v61  ;;  %v4308_v61 = vmov 58  }
 0x373   :  { %v1225_v26 = vadd.f32 %v1224_v31, %v1202_v25  ;;  %v4309_v31 = vmov 59  }
 0x375   :  { %v1248_v41 = vadd.f32 %v1247_v1, %v1225_v26  ;;  %2393 = vset.pattern.permute.xlu1 %v4305_v28 }
 0x376   :  { %662 = vperm.xlu1 %2393, %v2800_v24  }
 0x377   :  { %v1271_v7 = vadd.f32 %v1270_v56, %v1248_v41  ;;  %v1259_v56 = vsel %vm1249_vm3, %v3777_v45, 0.0 }
 0x379   :  { %v1294_v53 = vadd.f32 %v1293_v55, %v1271_v7  ;;  %v4310_v55 = vperm.slane %v3011_v17, 1 }
 0x37b   :  { %v3813_v43 = vadd.f32 %v1316_v6, %v1294_v53  ;;  %v665_v6 = vperm.slane %v3468_v48, 7 }
 0x37e   :  { %2394 = vset.pattern.permute.xlu1 %v4306_v34  ;;  %v1303_v34 = vpop.permute.xlu2 %1302 }
 0x37f   :  { %679 = vperm.xlu1 %2394, %v2800_v24  }
 0x387   :  { %2395 = vset.pattern.permute.xlu1 %v4307_v14 }
 0x388   :  { %696 = vperm.xlu1 %2395, %v2800_v24  }
 0x390   :  { %2396 = vset.pattern.permute.xlu1 %v4308_v61 }
 0x391   :  { %713 = vperm.xlu1 %2396, %v2800_v24  }
 0x394   :  { %v838_v32 = vpop.xlane.xlu1 %837 }
 0x395   :  { %v839_v8 = vsub.f32 %v3712_v5, %v838_v32  ;;  %v1305_v32 = vsel %vm1295_vm11, %v1303_v34, 0.0  ;;  %v682_v34 = vperm.slane %v3687_v59, 0  ;;  %vm4333_vm11 = vcmask 130048  }
 0x397   :  { %v840_v25 = vmul.f32 1.442695, %v839_v8 }
 0x399   :  { %2412 = vpow2.f32 %v840_v25  ;;  %2397 = vset.pattern.permute.xlu1 %v4309_v31 }
 0x39a   :  { %730 = vperm.xlu1 %2397, %v2800_v24  }
 0x39f   :  { %v3824_v26 = vpop.eup %2412 }
 0x3a0   :  { %v842_v1 = vsel %vm830_vm15, %v3824_v26, 0.0 }
 0x3a1   :  { %843 = vadd.xlane.f32.xlu2 %v842_v1  ;;  %v4316_v1 = vperm.slane %v3468_v48, 4 }
 0x3a2   :  { %2398 = vset.pattern.permute.xlu1 %v2644_v20 }
 0x3a3   :  { %747 = vperm.xlu1 %2398, %v2800_v24  }
 0x3ab   :  { %2399 = vset.pattern.permute.xlu1 %v2645_v51  ;;  %v598_v51 = vadd.f32 %v597_v33, %v3757_v52  ;;  %v4313_v52 = vperm.slane %v3011_v17, 2 }
 0x3ac   :  { %764 = vperm.xlu1 %2399, %v2800_v24   ;;  %v1234_v5 = vpop.permute.xlu1 %1233 }
 0x3ad   :  { %v1236_v41 = vsel %vm1226_vm2, %v1234_v5, 0.0  ;;  %vm4331_vm2 = vcmp.eq.s32.totalorder %v3089_v30, 8 }
 0x3ae   :  { %v1237_v28 = vadd.f32 %v1236_v41, %v3750_v0  ;;  %v1348_v0 = vadd.f32 %v3405_v47, %v4310_v55  ;;  %v1371_v47 = vadd.f32 %v3448_v29, %v4313_v52  ;;  %v4317_v41 = vperm.slane %v3011_v17, 4 }
 0x3af   :  { %v4321_v55 = vperm.slane %v3011_v17, 6 }
 0x3b0   :  { %v1260_v58 = vadd.f32 %v1259_v56, %v1237_v28 }
 0x3b4   :  { %2400 = vset.pattern.permute.xlu1 %v2647_v46  ;;  %v578_v20 = vpop.permute.xlu1 %577  ;;  %v599_v46 = vsel %vm4312_vm13, %v598_v51, 0.0  ;;  %vm4335_vm13 = vcmp.eq.s32.totalorder %v3089_v30, 12 }
 0x3b5   :  { %v581_v7 = vadd.f32 %v580_v12, %v578_v20  ;;  %781 = vperm.xlu1 %2400, %v2800_v24   ;;  %v4319_v20 = vperm.slane %v3011_v17, 5 }
 0x3b7   :  { %v582_v45 = vsel %vm4311_vm12, %v581_v7, 0.0  ;;  %v1440_v51 = vadd.f32 %v3453_v35, %v4319_v20  ;;  %vm4334_vm12 = vcmp.eq.s32.totalorder %v3089_v30, 11 }
 0x3b8   :  { %v583_v53 = vadd.f32 %v582_v45, %v3676_v57  ;;  %v1497_v57 = vadd.f32 %v3652_v15, %v665_v6  ;;  %v4315_v15 = vperm.slane %v3044_v10, 4  ;;  %v784_v45 = vperm.slane %v3687_v59, 6 }
 0x3b9   :  { %1350 = vrot.lane.b32.xlu2 %v1348_v0, %s2631_s23  ;;  %v1463_v0 = vadd.f32 %v3319_v60, %v4321_v55 }
 0x3ba   :  { %v600_v33 = vadd.f32 %v599_v46, %v583_v53  ;;  %v1601_v25 = vadd.f32 %v3567_v39, %v4315_v15  ;;  %v1566_v39 = vadd.f32 %v3719_v40, %v716_v38  ;;  %v4322_v53 = vperm.slane %v3011_v17, 7  ;;  %v3933_v15 = vld [vmem:[%s4168_s3 + $0x18] sm:$0xff] }
 0x3bb   :  { %vm1320_vm4 = vcmp.eq.s32.totalorder %v3933_v15, 0  ;;  %vm1343_vm6 = vcmp.eq.s32.totalorder %v3933_v15, 1  ;;  %vm1366_vm3 = vcmp.eq.s32.totalorder %v3933_v15, 2 }
 0x3bd   :  { %2401 = vset.pattern.permute.xlu1 %v2646_v23  ;;  %v1656_v12 = vpop.permute.xlu1 %1655 }
 0x3be   :  { %798 = vperm.xlu1 %2401, %v2800_v24   ;;  %v4314_v24 = vperm.slane %v3011_v17, 3  ;;  %v1658_v35 = vadd.f32 %v1656_v12, %v784_v45  ;;  %v4325_v17 = vperm.slane %v3044_v10, 2 }
 0x3c0   :  { %v1394_v61 = vadd.f32 %v3462_v44, %v4314_v24  ;;  %v1417_v44 = vadd.f32 %v3308_v18, %v4317_v41  ;;  %v4320_v18 = vperm.slane %v3044_v10, 7 }
 0x3c1   :  { %1373 = vrot.lane.b32.xlu2 %v1371_v47, %s2631_s23  ;;  %v4324_v47 = vperm.slane %v3044_v10, 1 }
 0x3c2   :  { %v1670_v7 = vadd.f32 %v3644_v63, %v4320_v18  ;;  %v1486_v63 = vadd.f32 %v3538_v49, %v4322_v53  ;;  %v1555_v49 = vadd.f32 %v3483_v50, %v4325_v17 }
 0x3c3   :  { %v1532_v12 = vadd.f32 %v3616_v2, %v4324_v47  ;;  %v4326_v2 = vperm.slane %v3044_v10, 5 }
 0x3c5   :  { %v1280_v14 = vpop.permute.xlu1 %1279 }
 0x3c6   :  { %v1282_v23 = vsel %vm1272_vm10, %v1280_v14, 0.0  ;;  %1499 = vrot.lane.b32.xlu1 %v1497_v57, %s2631_s23  ;;  %vm4332_vm10 = vcmp.eq.s32.totalorder %v3089_v30, 9 }
 0x3c7   :  { %v1283_v29 = vadd.f32 %v1282_v23, %v1260_v58  ;;  %v1328_v23 = vpop.permute.xlu2 %1327 }
 0x3c9   :  { %v1306_v8 = vadd.f32 %v1305_v32, %v1283_v29  ;;  %1396 = vrot.lane.b32.xlu2 %v1394_v61, %s2631_s23  ;;  %v1624_v61 = vadd.f32 %v3594_v62, %v4326_v2  ;;  %v733_v29 = vperm.slane %v3687_v59, 3  ;;  %v767_v62 = vperm.slane %v3687_v59, 5 }
 0x3cd   :  { %v612_v31 = vpop.permute.xlu1 %611 }
 0x3ce   :  { %v615_v5 = vadd.f32 %v4316_v1, %v612_v31  ;;  %1603 = vrot.lane.b32.xlu1 %v1601_v25, %s2631_s23  ;;  %v4327_v25 = vperm.slane %v3468_v48, 5  ;;  %v1330_v1 = vsel %vm1320_vm4, %v1328_v23, 0.0 }
 0x3d0   :  { %v616_v28 = vsel %vm4318_vm14, %v615_v5, 0.0  ;;  %vm1389_vm14 = vcmp.eq.s32.totalorder %v3933_v15, 3 }
 0x3d1   :  { %v617_v56 = vadd.f32 %v616_v28, %v600_v33  ;;  %1419 = vrot.lane.b32.xlu2 %v1417_v44, %s2631_s23  ;;  %v4323_v33 = vperm.slane %v3044_v10, 0 }
 0x3d3   :  { %v1509_v60 = vadd.f32 %v3491_v4, %v4323_v33  ;;  %v1520_v4 = vadd.f32 %v3666_v54, %v682_v34  ;;  %v1589_v54 = vadd.f32 %v3731_v3, %v733_v29  ;;  %v1331_v3 = vadd.f32 %v1330_v1, %v1306_v8 }
 0x3d6   :  { %1568 = vrot.lane.b32.xlu1 %v1566_v39, %s2631_s23  ;;  %v629_v58 = vpop.permute.xlu1 %628 }
 0x3d7   :  { %v632_v31 = vadd.f32 %v4327_v25, %v629_v58 }
 0x3d9   :  { %1442 = vrot.lane.b32.xlu2 %v1440_v51, %s2631_s23  ;;  %v633_v28 = vsel %vm4328_vm7, %v632_v31, 0.0  ;;  %vm1412_vm7 = vcmp.eq.s32.totalorder %v3933_v15, 4 }
 0x3de   :  { %1672 = vrot.lane.b32.xlu1 %v1670_v7, %s2631_s23 }
 0x3df   :  { %v646_v40 = vpop.permute.xlu1 %645 }
 0x3e0   :  { %v649_v5 = vadd.f32 %v648_v21, %v646_v40  ;;  %v1635_v21 = vadd.f32 %v3772_v27, %v767_v62 }
 0x3e1   :  { %1465 = vrot.lane.b32.xlu2 %v1463_v0, %s2631_s23  ;;  %v1339_v0 = vpop.permute.xlu0 %1338 }
 0x3e2   :  { %v650_v8 = vsel %vm4329_vm8, %v649_v5, 0.0  ;;  %vm1481_vm8 = vcmp.eq.s32.totalorder %v3933_v15, 7 }
 0x3e6   :  { %1660 = vrot.lane.b32.xlu1 %v1658_v35, %s2631_s23 }
 0x3e8   :  { %v663_v46 = vpop.permute.xlu1 %662 }
 0x3e9   :  { %1488 = vrot.lane.b32.xlu2 %v1486_v63, %s2631_s23  ;;  %v666_v39 = vadd.f32 %v665_v6, %v663_v46 }
 0x3eb   :  { %v667_v7 = vsel %vm4330_vm9, %v666_v39, 0.0  ;;  %vm1550_vm9 = vcmp.eq.s32.totalorder %v3933_v15, 10 }
 0x3f1   :  { %1511 = vrot.lane.b32.xlu2 %v1509_v60, %s2631_s23  ;;  %v680_v52 = vpop.permute.xlu1 %679 }
 0x3f2   :  { %v683_v18 = vadd.f32 %v682_v34, %v680_v52 }
 0x3f4   :  { %v684_v55 = vsel %vm4331_vm2, %v683_v18, 0.0  ;;  %vm1573_vm2 = vcmp.eq.s32.totalorder %v3933_v15, 11 }
 0x3f9   :  { %1534 = vrot.lane.b32.xlu2 %v1532_v12, %s2631_s23 }
 0x3fa   :  { %v697_v57 = vpop.permute.xlu1 %696 }
 0x3fb   :  { %v700_v48 = vadd.f32 %v699_v19, %v697_v57 }
 0x3fd   :  { %v701_v35 = vsel %vm4332_vm10, %v700_v48, 0.0  ;;  %vm1619_vm10 = vcmp.eq.s32.totalorder %v3933_v15, 13 }
 0x401   :  { %1557 = vrot.lane.b32.xlu2 %v1555_v49, %s2631_s23 }
 0x403   :  { %v714_v14 = vpop.permute.xlu1 %713 }
 0x404   :  { %v717_v27 = vadd.f32 %v716_v38, %v714_v14 }
 0x406   :  { %v718_v38 = vsel %vm703_vm1, %v717_v27, 0.0  ;;  %vm4336_vm1 = vcmp.eq.s32.totalorder %v3089_v30, 15 }
 0x409   :  { %1522 = vrot.lane.b32.xlu2 %v1520_v4, %s2631_s23 }
 0x40c   :  { %v731_v24 = vpop.permute.xlu1 %730 }
 0x40d   :  { %v734_v53 = vadd.f32 %v733_v29, %v731_v24 }
 0x40f   :  { %v735_v47 = vsel %vm4334_vm12, %v734_v53, 0.0  ;;  %vm1665_vm12 = vcmp.eq.s32.totalorder %v3933_v15, 15 }
 0x411   :  { %1626 = vrot.lane.b32.xlu2 %v1624_v61, %s2631_s23 }
 0x414   :  { %v844_v50 = vpop.xlane.xlu2 %843 }
 0x415   :  { %2414 = vrcp.f32 %v844_v50  ;;  %v748_v32 = vpop.permute.xlu1 %747 }
 0x416   :  { %v751_v33 = vadd.f32 %v750_v42, %v748_v32 }
 0x418   :  { %v752_v17 = vsel %vm4335_vm13, %v751_v33, 0.0  ;;  %vm4337_vm13 = vcmask 130048  }
 0x419   :  { %1591 = vrot.lane.b32.xlu2 %v1589_v54, %s2631_s23 }
 0x41b   :  { %v2415_v10 = vpop.eup %2414 }
 0x41c   :  { %v1351_v41 = vpop.permute.xlu2 %1350  ;;  %v846_v44 = vmul.f32 %v2415_v10, %v3824_v26  ;;  %v634_v26 = vadd.f32 %v633_v28, %v617_v56 }
 0x41d   :  { %v1353_v58 = vsel %vm1343_vm6, %v1351_v41, 0.0 }
 0x41e   :  { %v1354_v20 = vadd.f32 %v1353_v58, %v1331_v3  ;;  %2143 = vmatmul.msk.f32.vlgmr.msrb.gmra.mxu0 %vm830_vm15, %v846_v44  ;;  %v765_v51 = vpop.permute.xlu1 %764  ;;  %v651_v6 = vadd.f32 %v650_v8, %v634_v26 }
 0x41f   :  { %v768_v12 = vadd.f32 %v767_v62, %v765_v51  ;;  %v2442_v62 = vld [vmem:[%s4167_s2] sm:$0xff] }
 0x420   :  { %v668_v40 = vadd.f32 %v667_v7, %v651_v6  ;;  %v1341_v7 = vsel %vm1320_vm4, %v1339_v0, 0.0  ;;  %vm1504_vm4 = vcmp.eq.s32.totalorder %v3933_v15, 8 }
 0x421   :  { %1637 = vrot.lane.b32.xlu2 %v1635_v21, %s2631_s23  ;;  %v769_v42 = vsel %vm754_vm0, %v768_v12, 0.0  ;;  %vm1435_vm0 = vcmp.eq.s32.totalorder %v3933_v15, 5  ;;  %v1342_v48 = vadd.f32 %v1341_v7, %v3813_v43 }
 0x422   :  { %v685_v63 = vadd.f32 %v684_v55, %v668_v40 }
 0x424   :  { %v1374_v56 = vpop.permute.xlu2 %1373  ;;  %v702_v52 = vadd.f32 %v701_v35, %v685_v63 }
 0x425   :  { %v1376_v19 = vsel %vm1366_vm3, %v1374_v56, 0.0 }
 0x426   :  { %v1377_v46 = vadd.f32 %v1376_v19, %v1354_v20  ;;  %2149 = vmatmul.msk.bf16.vlgmr.msra.gmra.mxu0 %vm4333_vm11, %v2785_v13  ;;  %v719_v57 = vadd.f32 %v718_v38, %v702_v52  ;;  %v1362_v13 = vpop.permute.xlu0 %1361  ;;  %vm1642_vm11 = vcmp.eq.s32.totalorder %v3933_v15, 14 }
 0x427   :  { %v782_v60 = vpop.permute.xlu1 %781  ;;  %v1364_v27 = vsel %vm1343_vm6, %v1362_v13, 0.0  ;;  %vm1527_vm6 = vcmp.eq.s32.totalorder %v3933_v15, 9 }
 0x428   :  { %v785_v49 = vadd.f32 %v784_v45, %v782_v60  ;;  %v736_v34 = vadd.f32 %v735_v47, %v719_v57  ;;  %v1365_v40 = vadd.f32 %v1364_v27, %v1342_v48 }
 0x42a   :  { %v753_v23 = vadd.f32 %v752_v17, %v736_v34  ;;  %v786_v2 = vsel %vm771_vm5, %v785_v49, 0.0  ;;  %vm1458_vm5 = vcmp.eq.s32.totalorder %v3933_v15, 6 }
 0x42c   :  { %v1397_v14 = vpop.permute.xlu2 %1396  ;;  %v770_v61 = vadd.f32 %v769_v42, %v753_v23 }
 0x42d   :  { %v1399_v4 = vsel %vm1389_vm14, %v1397_v14, 0.0 }
 0x42e   :  { %v1400_v24 = vadd.f32 %v1399_v4, %v1377_v46  ;;  %v787_v50 = vadd.f32 %v786_v2, %v770_v61  ;;  %v1385_v10 = vpop.permute.xlu0 %1384 }
 0x42f   :  { %v1387_v56 = vsel %vm1366_vm3, %v1385_v10, 0.0  ;;  %vm1596_vm3 = vcmp.eq.s32.totalorder %v3933_v15, 12 }
 0x430   :  { %v799_v29 = vpop.permute.xlu1 %798  ;;  %v1388_v35 = vadd.f32 %v1387_v56, %v1365_v40 }
 0x431   :  { %v802_v45 = vadd.f32 %v801_v37, %v799_v29 }
 0x433   :  { %v803_v32 = vsel %vm4336_vm1, %v802_v45, 0.0  ;;  %vm4339_vm1 = vmmov %vm4337_vm13 }
 0x434   :  { %v804_v54 = vadd.f32 %v803_v32, %v787_v50  ;;  %v1420_v25 = vpop.permute.xlu2 %1419 }
 0x435   :  { %v1422_v31 = vsel %vm1412_vm7, %v1420_v25, 0.0 }
 0x436   :  { %v874_v1 = vmul.f32 %v2442_v62, %v804_v54  ;;  %v1423_v5 = vadd.f32 %v1422_v31, %v1400_v24  ;;  %v1408_v3 = vpop.permute.xlu0 %1407 }
 0x437   :  { %v1410_v63 = vsel %vm1389_vm14, %v1408_v3, 0.0  ;;  %vm4338_vm14 = vcmask 261120  }
 0x438   :  { %v895_v59 = vadd.f32 %v2906_v16, %v874_v1  ;;  %v1500_v6 = vpop.permute.xlu1 %1499  ;;  %v1411_v46 = vadd.f32 %v1410_v63, %v1388_v35 }
 0x439   :  { %v1502_v17 = vsel %vm1481_vm8, %v1500_v6, 0.0 }
 0x43a   :  { %899 = vst.msk [vmem:[#allocation9 + $0x8] sm:$0xff] %vm830_vm15, %v895_v59  ;;  %v4009_v39 = vadd.f32 %v3702_v36, %v895_v59 }
 0x43c   :  { %v1443_v30 = vpop.permute.xlu2 %1442  ;;  %v901_v20 = vsel %vm830_vm15, %v4009_v39, -inf }
 0x43d   :  { %v1445_v37 = vsel %vm1435_vm0, %v1443_v30, 0.0 }
 0x43e   :  { %v1446_v41 = vadd.f32 %v1445_v37, %v1423_v5  ;;  %v1431_v58 = vpop.permute.xlu0 %1430 }
 0x43f   :  { %v1433_v43 = vsel %vm1412_vm7, %v1431_v58, 0.0  ;;  %vm4340_vm7 = vmmov %vm4338_vm14 }
 0x440   :  { %v1604_v0 = vpop.permute.xlu1 %1603  ;;  %v1434_v38 = vadd.f32 %v1433_v43, %v1411_v46 }
 0x444   :  { %v1466_v44 = vpop.permute.xlu2 %1465 }
 0x445   :  { %v1468_v28 = vsel %vm1458_vm5, %v1466_v44, 0.0 }
 0x446   :  { %v1469_v16 = vadd.f32 %v1468_v28, %v1446_v41  ;;  %v1454_v18 = vpop.permute.xlu0 %1453 }
 0x447   :  { %v1456_v52 = vsel %vm1435_vm0, %v1454_v18, 0.0  ;;  %vm4341_vm0 = vmmov %vm4340_vm7 }
 0x448   :  { %v1457_v47 = vadd.f32 %v1456_v52, %v1434_v38  ;;  %v1569_v12 = vpop.permute.xlu1 %1568 }
 0x449   :  { %v1571_v29 = vsel %vm1550_vm9, %v1569_v12, 0.0 }
 0x44a   :  { %902 = vmax.xlane.f32.xlu2 %v901_v20 }
 0x44c   :  { %v1489_v51 = vpop.permute.xlu2 %1488 }
 0x44d   :  { %v1491_v21 = vsel %vm1481_vm8, %v1489_v51, 0.0  ;;  %v2146_v51 = vld [vmem:[%s4167_s2 + $0x8] sm:$0xff]  ;;  %s2648_s2 = smov 48  }
 0x44e   :  { %v1492_v8 = vadd.f32 %v1491_v21, %v1469_v16  ;;  %v1477_v36 = vpop.permute.xlu0 %1476 }
 0x44f   :  { %v1479_v57 = vsel %vm1458_vm5, %v1477_v36, 0.0  ;;  %vm4342_vm5 = vmmov %vm4341_vm0 }
 0x450   :  { %v1480_v49 = vadd.f32 %v1479_v57, %v1457_v47  ;;  %v1673_v24 = vpop.permute.xlu1 %1672 }
 0x452   :  { %v1503_v34 = vadd.f32 %v1502_v17, %v1480_v49 }
 0x454   :  { %v1512_v26 = vpop.permute.xlu2 %1511 }
 0x455   :  { %v1514_v1 = vsel %vm1504_vm4, %v1512_v26, 0.0  ;;  %v2405_v26 = vld [vmem:[#allocation2 + $0x1] ss:$0 sm:$0xff] }
 0x456   :  { %v1581_v53 = vpop.permute.xlu0 %1580  ;;  %v1515_v3 = vadd.f32 %v1514_v1, %v1492_v8 }
 0x457   :  { %v1583_v8 = vsel %vm1573_vm2, %v1581_v53, 0.0 }
 0x458   :  { %v1661_v31 = vpop.permute.xlu1 %1660 }
 0x459   :  { %v1663_v37 = vsel %vm1642_vm11, %v1661_v31, 0.0 }
 0x45c   :  { %v1535_v55 = vpop.permute.xlu2 %1534 }
 0x45d   :  { %v1537_v41 = vsel %vm1527_vm6, %v1535_v55, 0.0  ;;  %v1606_v55 = vsel %vm1596_vm3, %v1604_v0, 0.0 }
 0x45e   :  { %v1546_v33 = vpop.permute.xlu0 %1545  ;;  %v1538_v58 = vadd.f32 %v1537_v41, %v1515_v3  ;;  %v2443_v41 = vld [vmem:[%s4262_s20] sm:$0xff] }
 0x45f   :  { %v1548_v23 = vsel %vm1527_vm6, %v1546_v33, 0.0 }
 0x464   :  { %v1558_v19 = vpop.permute.xlu2 %1557 }
 0x465   :  { %v1560_v16 = vsel %vm1550_vm9, %v1558_v19, 0.0  ;;  %v1675_v19 = vsel %vm1665_vm12, %v1673_v24, 0.0 }
 0x466   :  { %v1650_v42 = vpop.permute.xlu0 %1649  ;;  %v1561_v21 = vadd.f32 %v1560_v16, %v1538_v58 }
 0x468   :  { %v1584_v36 = vadd.f32 %v1583_v8, %v1561_v21 }
 0x46a   :  { %v1607_v40 = vadd.f32 %v1606_v55, %v1584_v36 }
 0x46c   :  { %v1523_v60 = vpop.permute.xlu2 %1522 }
 0x46d   :  { %v1525_v13 = vsel %vm1504_vm4, %v1523_v60, 0.0 }
 0x46e   :  { %v1526_v4 = vadd.f32 %v1525_v13, %v1503_v34  ;;  %v1615_v50 = vpop.permute.xlu0 %1614 }
 0x46f   :  { %v1617_v25 = vsel %vm1596_vm3, %v1615_v50, 0.0 }
 0x470   :  { %v1549_v2 = vadd.f32 %v1548_v23, %v1526_v4 }
 0x472   :  { %v1572_v32 = vadd.f32 %v1571_v29, %v1549_v2 }
 0x474   :  { %v1627_v14 = vpop.permute.xlu2 %1626 }
 0x475   :  { %v1629_v27 = vsel %vm1619_vm10, %v1627_v14, 0.0 }
 0x476   :  { %v1684_v59 = vpop.permute.xlu0 %1683  ;;  %v1630_v56 = vadd.f32 %v1629_v27, %v1607_v40 }
 0x477   :  { %v1686_v28 = vsel %vm1665_vm12, %v1684_v59, 0.0  ;;  %vm4344_vm12 = vmmov %vm4341_vm0 }
 0x47c   :  { %v1592_v61 = vpop.permute.xlu2 %1591 }
 0x47d   :  { %v1594_v45 = vsel %vm1573_vm2, %v1592_v61, 0.0 }
 0x47e   :  { %v1595_v54 = vadd.f32 %v1594_v45, %v1572_v32 }
 0x480   :  { %v1618_v62 = vadd.f32 %v1617_v25, %v1595_v54 }
 0x484   :  { %v1638_v10 = vpop.permute.xlu2 %1637 }
 0x485   :  { %v1640_v5 = vsel %vm1619_vm10, %v1638_v10, 0.0  ;;  %vm4343_vm10 = vmmov %vm4341_vm0 }
 0x486   :  { %v1641_v30 = vadd.f32 %v1640_v5, %v1618_v62 }
 0x488   :  { %v1664_v44 = vadd.f32 %v1663_v37, %v1641_v30 }
 0x48a   :  { %v1687_v20 = vadd.f32 %v1686_v28, %v1664_v44  ;;  %v2649_v28 = vmov 32.0  }
 0x48c   :  { %v1756_v18 = vmul.f32 %v2146_v51, %v1687_v20 }
 0x48e   :  { %v1777_v7 = vadd.f32 %v2987_v22, %v1756_v18  ;;  %v1652_v22 = vsel %vm1642_vm11, %v1650_v42, 0.0  ;;  %vm1985_vm11 = vcmask 523264  }
 0x48f   :  { %v1653_v35 = vadd.f32 %v1652_v22, %v1630_v56 }
 0x490   :  { %v1782_v48 = vadd.f32 %v2405_v26, %v1777_v7  ;;  %1781 = vst.msk [vmem:[#allocation9 + $0x18] sm:$0xff] %vm830_vm15, %v1777_v7 }
 0x491   :  { %v1676_v63 = vadd.f32 %v1675_v19, %v1653_v35 }
 0x492   :  { %v1783_v6 = vsel %vm830_vm15, %v1782_v48, -inf }
 0x493   :  { %1784 = vmax.xlane.f32.xlu0 %v1783_v6  ;;  %v1689_v46 = vmul.f32 %v2146_v51, %v1676_v63  ;;  %v2444_v6 = vld [vmem:[%s4262_s20 + $0x8] sm:$0xff] }
 0x49b   :  { %v871_v53 = vpop.f32.mrf.mxu0 }
 0x4a3   :  { %v1708_v43 = vpop.f32.mrf.mxu0 }
 0x4a4   :  { %v1709_v38 = vadd.f32 %v1708_v43, %v1689_v46 }
 0x4a6   :  { %1713 = vst.msk [vmem:[#allocation9 + $0x10] sm:$0xff] %vm830_vm15, %v1709_v38  ;;  %v1717_v0 = vadd.f32 %v2405_v26, %v1709_v38 }
 0x4a7   :  { %912 = vrot.lane.b32.xlu0 %v2775_v9, %s2648_s2 }
 0x4a8   :  { %v1718_v33 = vsel %vm830_vm15, %v1717_v0, -inf }
 0x4a9   :  { %1719 = vmax.xlane.f32.xlu1 %v1718_v33  ;;  %v2188_v33 = vld [vmem:[#allocation7 + $0x8] sm:$0xff] }
 0x4aa   :  { %1922 = vmatpush.bf16.msrb.mxu0 %v2188_v33 }
 0x4ab   :  { %v1710_v60 = vpop.f32.mrf.mxu0 }
 0x4bd   :  { %v903_v52 = vpop.xlane.xlu2 %902 }
 0x4be   :  { %v904_v47 = vsub.f32 %v4009_v39, %v903_v52  ;;  %v2187_v52 = vld [vmem:[#allocation7] sm:$0xff] }
 0x4bf   :  { %1923 = vmatpush.bf16.msrb.mxu0 %v2187_v52 }
 0x4c0   :  { %v905_v12 = vmul.f32 1.442695, %v904_v47 }
 0x4c2   :  { %2416 = vpow2.f32 %v905_v12 }
 0x4c8   :  { %v2417_v15 = vpop.eup %2416 }
 0x4c9   :  { %v907_v57 = vsel %vm830_vm15, %v2417_v15, 0.0 }
 0x4ca   :  { %908 = vadd.xlane.f32.xlu2 %v907_v57 }
 0x506   :  { %v1785_v17 = vpop.xlane.xlu0 %1784 }
 0x507   :  { %v1786_v49 = vsub.f32 %v1782_v48, %v1785_v17 }
 0x509   :  { %v1787_v13 = vmul.f32 1.442695, %v1786_v49 }
 0x50b   :  { %2418 = vpow2.f32 %v1787_v13 }
 0x511   :  { %v2419_v34 = vpop.eup %2418 }
 0x512   :  { %v1789_v9 = vsel %vm830_vm15, %v2419_v34, 0.0 }
 0x513   :  { %1790 = vadd.xlane.f32.xlu2 %v1789_v9 }
 0x519   :  { %v913_v14 = vpop.permute.xlu0 %912 }
 0x51a   :  { %933 = vmatpush.msra.mxu3 %v913_v14 }
 0x51c   :  { %v1720_v42 = vpop.xlane.xlu1 %1719 }
 0x51d   :  { %v1721_v4 = vsub.f32 %v1717_v0, %v1720_v42 }
 0x51f   :  { %v1722_v23 = vmul.f32 1.442695, %v1721_v4 }
 0x521   :  { %2420 = vpow2.f32 %v1722_v23 }
 0x527   :  { %v2421_v39 = vpop.eup %2420 }
 0x528   :  { %v1724_v24 = vsel %vm830_vm15, %v2421_v39, 0.0 }
 0x529   :  { %1725 = vadd.xlane.f32.xlu1 %v1724_v24  ;;  %v2406_v24 = vld [vmem:[%s4173_s8] ss:$0 sm:$0xff] }
 0x52b   :  { %1794 = vrot.lane.b32.xlu2 %v2779_v11, %s2648_s2  ;;  %s2652_s2 = smov 8  }
 0x53d   :  { %v909_v2 = vpop.xlane.xlu2 %908 }
 0x53e   :  { %2422 = vrcp.f32 %v909_v2 }
 0x542   :  { %1730 = vrot.lane.b32.xlu1 %v2779_v11, %s2574_s19 }
 0x544   :  { %v2423_v61 = vpop.eup %2422 }
 0x545   :  { %v911_v29 = vmul.f32 %v2423_v61, %v2417_v15 }
 0x547   :  { %2145 = vmatmul.msk.f32.vlgmr.msra.gmra.mxu3 %vm830_vm15, %v911_v29 }
 0x586   :  { %v1791_v50 = vpop.xlane.xlu2 %1790 }
 0x58e   :  { %v1795_v31 = vpop.permute.xlu2 %1794 }
 0x59c   :  { %v1726_v45 = vpop.xlane.xlu1 %1725 }
 0x59d   :  { %2424 = vrcp.f32 %v1726_v45  ;;  %v2407_v45 = vld [vmem:[%s4174_s9] ss:$0 sm:$0xff] }
 0x59e   :  { %2426 = vrcp.f32 %v1791_v50 }
 0x59f   :  { %2428 = vrcp.f32 %v2649_v28 }
 0x5a3   :  { %v2425_v32 = vpop.eup %2424 }
 0x5a4   :  { %v1728_v54 = vmul.f32 %v2425_v32, %v2421_v39  ;;  %v2427_v10 = vpop.eup %2426 }
 0x5a5   :  { %v1793_v62 = vmul.f32 %v2427_v10, %v2419_v34  ;;  %v2429_v16 = vpop.eup %2428 }
 0x5a6   :  { %v1838_v58 = vmul.f32 32.0, %v2429_v16 }
 0x5a8   :  { %v1839_v20 = vsub.f32 1.0, %v1838_v58 }
 0x5aa   :  { %v1840_v51 = vmul.f32 %v2429_v16, %v1839_v20 }
 0x5ac   :  { %v1841_v21 = vadd.f32 %v2429_v16, %v1840_v51 }
 0x5b4   :  { %v1731_v25 = vpop.permute.xlu1 %1730 }
 0x5b5   :  { %1751 = vmatpush.msrb.mxu3 %v1731_v25 }
 0x5b6   :  { %2150 = vmatmul.msk.f32.vlgmr.msrb.gmra.mxu3 %vm830_vm15, %v1728_v54 }
 0x5b7   :  { %1815 = vmatpush.msra.mxu3 %v1795_v31 }
 0x5be   :  { %2152 = vmatmul.msk.f32.vlgmr.msra.gmra.mxu3 %vm830_vm15, %v1793_v62  ;;  %vm1842_vm15 = vweird.f32 %v2429_v16  ;;  %v2192_v62 = vld [vmem:[%s4177_s12 + $0x18] sm:$0xff] }
 0x5bf   :  { %v4100_v7 = vsel %vm1842_vm15, %v2429_v16, %v1841_v21  ;;  %1993 = vmatpush.bf16.msra.mxu1 %v2192_v62  ;;  %vm4347_vm15 = vmmov %vm4341_vm0  ;;  %v2410_v62 = vld [vmem:[%s4179_s14] ss:$0 sm:$0xff]  ;;  %s2653_s14 = smov [#allocation8]  }
 0x5c0   :  { %s2069_s30 = sshll.u32 %s2653_s14, 4  ;;  %s2070_s30 = int_to_ptr.vmem [resolvable:$true] %s2069_s30 }
 0x5ca   :  { %v935_v11 = vpop.f32.mrf.mxu3 }
 0x5cb   :  { %939 = vrot.lane.b32.xlu0 %v935_v11, %s2577_s22  ;;  %v2191_v11 = vld [vmem:[%s4177_s12 + $0x10] sm:$0xff] }
 0x5cc   :  { %1994 = vmatpush.bf16.msra.mxu1 %v2191_v11 }
 0x639   :  { %v1753_v1 = vpop.f32.mrf.mxu3 }
 0x63d   :  { %v940_v5 = vpop.permute.xlu0 %939 }
 0x63e   :  { %v942_v59 = vsel %vm4337_vm13, %v871_v53, %v940_v5  ;;  %v2189_v5 = vld [vmem:[%s4177_s12] sm:$0xff]  ;;  %vm4345_vm13 = vmmov %vm4341_vm0 }
 0x63f   :  { %v1825_v30 = vmul.f32 0.5, %v942_v59  ;;  %v2408_v59 = vld [vmem:[%s4176_s11] ss:$0 sm:$0xff] }
 0x641   :  { %v1817_v37 = vpop.f32.mrf.mxu3  ;;  %v1827_v3 = vadd.f32 %v2443_v41, %v1825_v30 }
 0x642   :  { %1821 = vrot.lane.b32.xlu0 %v1817_v37, %s2577_s22 }
 0x643   :  { %v1831_v44 = vsel %vm4338_vm14, %v1827_v3, 0.0  ;;  %vm4346_vm14 = vmmov %vm4341_vm0 }
 0x644   :  { %1832 = vadd.xlane.f32.xlu1 %v1831_v44 }
 0x6b4   :  { %v1822_v18 = vpop.permute.xlu0 %1821 }
 0x6b5   :  { %v1824_v26 = vsel %vm4339_vm1, %v1753_v1, %v1822_v18  ;;  %v2190_v1 = vld [vmem:[%s4177_s12 + $0x8] sm:$0xff] }
 0x6b6   :  { %v1826_v8 = vmul.f32 0.5, %v1824_v26  ;;  %1995 = vmatpush.bf16.msra.mxu1 %v2190_v1 }
 0x6b7   :  { %v1833_v36 = vpop.xlane.xlu1 %1832 }
 0x6b8   :  { %v1844_v48 = vmul.f32 %v4100_v7, %v1833_v36  ;;  %v1828_v55 = vadd.f32 %v2444_v6, %v1826_v8 }
 0x6ba   :  { %v1846_v27 = vsub.f32 %v1827_v3, %v1844_v48  ;;  %v1834_v40 = vsel %vm4340_vm7, %v1828_v55, 0.0  ;;  %1996 = vmatpush.bf16.msra.mxu1 %v2189_v5 }
 0x6bb   :  { %1835 = vadd.xlane.f32.xlu2 %v1834_v40 }
 0x6bc   :  { %v1848_v56 = vmul.f32 %v1846_v27, %v1846_v27 }
 0x6be   :  { %v1850_v22 = vsel %vm4341_vm0, %v1848_v56, 0.0 }
 0x6bf   :  { %1851 = vadd.xlane.f32.xlu0 %v1850_v22 }
 0x72e   :  { %v1836_v35 = vpop.xlane.xlu2 %1835 }
 0x72f   :  { %v1845_v53 = vmul.f32 %v4100_v7, %v1836_v35 }
 0x731   :  { %v1847_v19 = vsub.f32 %v1828_v55, %v1845_v53  ;;  %v2409_v53 = vld [vmem:[%s4178_s13] ss:$0 sm:$0xff]  ;;  %s2650_s13 = smov [#allocation9]  }
 0x732   :  { %v1852_v43 = vpop.xlane.xlu0 %1851  ;;  %s2082_s27 = sshll.u32 %s2650_s13, 4  ;;  %s2083_s27 = int_to_ptr.vmem [resolvable:$true] %s2082_s27 }
 0x733   :  { %v1849_v63 = vmul.f32 %v1847_v19, %v1847_v19  ;;  %v1856_v38 = vmul.f32 %v1852_v43, %v4100_v7  ;;  %2090 = dma.vmem_to_hbm [thread:$0]  %s2083_s27, 512, %s2085_s26, [#allocation10], %s2651_s28, %s2651_s28, %s2652_s2  }
 0x735   :  { %v1853_v46 = vsel %vm4342_vm5, %v1849_v63, 0.0  ;;  %v1858_v0 = vadd.f32 1e-05, %v1856_v38 }
 0x736   :  { %1854 = vadd.xlane.f32.xlu1 %v1853_v46 }
 0x737   :  { %2430 = vrsqrt.f32 %v1858_v0  ;;  %vm1866_vm4 = vweird.f32 %v1858_v0 }
 0x73d   :  { %v2431_v60 = vpop.eup %2430 }
 0x73e   :  { %v1861_v47 = vmul.f32 %v2431_v60, %v1858_v0  ;;  %vm1867_vm8 = vweird.f32 %v2431_v60 }
 0x73f   :  { %vm1868_vm6 = vmor %vm1866_vm4, %vm1867_vm8 }
 0x740   :  { %v1862_v12 = vmul.f32 %v2431_v60, %v1861_v47  ;;  %vm4348_vm4 = vmmov %vm4343_vm10 }
 0x742   :  { %v1863_v49 = vmul.f32 0.5, %v1862_v12 }
 0x744   :  { %v1864_v13 = vsub.f32 1.5, %v1863_v49 }
 0x746   :  { %v1865_v9 = vmul.f32 %v2431_v60, %v1864_v13 }
 0x748   :  { %v1869_v4 = vsel %vm1868_vm6, %v2431_v60, %v1865_v9 }
 0x749   :  { %v1880_v2 = vmul.f32 %v1869_v4, %v1846_v27 }
 0x74b   :  { %v1885_v50 = vmul.f32 %v2406_v24, %v1880_v2 }
 0x74d   :  { %v1890_v25 = vadd.f32 %v2407_v45, %v1885_v50 }
 0x7a9   :  { %v1855_v15 = vpop.xlane.xlu1 %1854 }
 0x7aa   :  { %v1857_v57 = vmul.f32 %v1855_v15, %v4100_v7 }
 0x7ac   :  { %v1859_v17 = vadd.f32 1e-05, %v1857_v57 }
 0x7ae   :  { %2432 = vrsqrt.f32 %v1859_v17  ;;  %vm1876_vm2 = vweird.f32 %v1859_v17 }
 0x7b4   :  { %v2433_v34 = vpop.eup %2432 }
 0x7b5   :  { %v1871_v14 = vmul.f32 %v2433_v34, %v1859_v17  ;;  %vm1877_vm9 = vweird.f32 %v2433_v34 }
 0x7b6   :  { %vm1878_vm3 = vmor %vm1876_vm2, %vm1877_vm9 }
 0x7b7   :  { %v1872_v42 = vmul.f32 %v2433_v34, %v1871_v14  ;;  %vm4349_vm9 = vmmov %vm4348_vm4 }
 0x7b9   :  { %v1873_v23 = vmul.f32 0.5, %v1872_v42 }
 0x7bb   :  { %v1874_v39 = vsub.f32 1.5, %v1873_v23 }
 0x7bd   :  { %v1875_v61 = vmul.f32 %v2433_v34, %v1874_v39 }
 0x7bf   :  { %v1879_v29 = vsel %vm1878_vm3, %v2433_v34, %v1875_v61 }
 0x7c0   :  { %v1881_v32 = vmul.f32 %v1879_v29, %v1847_v19 }
 0x7c2   :  { %v1886_v54 = vmul.f32 %v2406_v24, %v1881_v32 }
 0x7c4   :  { %v1891_v31 = vadd.f32 %v2407_v45, %v1886_v54 }
 0x7c6   :  { %v1892_v10 = vpack.c.bf16 %v1891_v31, %v1890_v25 }
 0x7c8   :  { %2161 = vmatmul.msk.bf16.vlgmr.msrb.gmra.mxu0 %vm4343_vm10, %v1892_v10 }
 0x845   :  { %v1925_v30 = vpop.f32.mrf.mxu0 }
 0x846   :  { %v1926_v37 = vadd.f32 %v2408_v59, %v1925_v30 }
 0x848   :  { %v1932_v41 = vmul.f32 0.044715, %v1926_v37  ;;  %v1930_v55 = vmul.f32 0.5, %v1926_v37 }
 0x84a   :  { %v1934_v3 = vmul.f32 %v1932_v41, %v1926_v37 }
 0x84c   :  { %v1936_v44 = vmul.f32 %v1934_v3, %v1926_v37 }
 0x84d   :  { %v1927_v28 = vpop.f32.mrf.mxu0 }
 0x84e   :  { %v1938_v16 = vadd.f32 %v1936_v44, %v1926_v37  ;;  %v1928_v58 = vadd.f32 %v2408_v59, %v1927_v28 }
 0x850   :  { %v1933_v20 = vmul.f32 0.044715, %v1928_v58  ;;  %v1940_v51 = vmul.f32 0.7978846, %v1938_v16  ;;  %v1931_v27 = vmul.f32 0.5, %v1928_v58 }
 0x852   :  { %v1935_v21 = vmul.f32 %v1933_v20, %v1928_v58  ;;  %2434 = vtanh.f32 %v1940_v51 }
 0x854   :  { %v1937_v18 = vmul.f32 %v1935_v21, %v1928_v58 }
 0x856   :  { %v1939_v26 = vadd.f32 %v1937_v18, %v1928_v58 }
 0x858   :  { %v1941_v8 = vmul.f32 0.7978846, %v1939_v26  ;;  %v2435_v36 = vpop.eup %2434 }
 0x859   :  { %v1944_v48 = vadd.f32 1.0, %v2435_v36 }
 0x85a   :  { %2436 = vtanh.f32 %v1941_v8 }
 0x85b   :  { %v1946_v56 = vmul.f32 %v1944_v48, %v1930_v55 }
 0x860   :  { %v2437_v6 = vpop.eup %2436 }
 0x861   :  { %v1945_v40 = vadd.f32 1.0, %v2437_v6 }
 0x863   :  { %v1947_v22 = vmul.f32 %v1945_v40, %v1931_v27 }
 0x865   :  { %v1948_v35 = vpack.c.bf16 %v1947_v22, %v1946_v56 }
 0x867   :  { %2178 = vmatmul.msk.bf16.vlgmr.msra.gmra.mxu1 %vm1985_vm11, %v1948_v35 }
 0x8e4   :  { %v1998_v19 = vpop.f32.mrf.mxu1 }
 0x8e5   :  { %v1999_v63 = vadd.f32 %v2409_v53, %v1998_v19 }
 0x8e7   :  { %v2003_v46 = vmul.f32 0.5, %v1999_v63 }
 0x8e9   :  { %v2005_v43 = vadd.f32 %v2003_v46, %v1890_v25 }
 0x8eb   :  { %v2009_v38 = vsel %vm4344_vm12, %v2005_v43, 0.0 }
 0x8ec   :  { %v2000_v0 = vpop.f32.mrf.mxu1  ;;  %2010 = vadd.xlane.f32.xlu2 %v2009_v38 }
 0x8ed   :  { %v2001_v33 = vadd.f32 %v2409_v53, %v2000_v0 }
 0x8ef   :  { %v2004_v60 = vmul.f32 0.5, %v2001_v33 }
 0x8f1   :  { %v2006_v52 = vadd.f32 %v2004_v60, %v1891_v31 }
 0x8f3   :  { %v2012_v47 = vsel %vm4345_vm13, %v2006_v52, 0.0 }
 0x8f4   :  { %2013 = vadd.xlane.f32.xlu0 %v2012_v47 }
 0x95f   :  { %v2011_v12 = vpop.xlane.xlu2 %2010 }
 0x960   :  { %v2015_v15 = vmul.f32 %v2011_v12, %v4100_v7 }
 0x962   :  { %v2017_v57 = vsub.f32 %v2005_v43, %v2015_v15 }
 0x964   :  { %v2019_v17 = vmul.f32 %v2017_v57, %v2017_v57 }
 0x966   :  { %v2021_v49 = vsel %vm4346_vm14, %v2019_v17, 0.0 }
 0x967   :  { %v2014_v13 = vpop.xlane.xlu0 %2013  ;;  %2022 = vadd.xlane.f32.xlu1 %v2021_v49 }
 0x968   :  { %v2016_v34 = vmul.f32 %v2014_v13, %v4100_v7 }
 0x96a   :  { %v2018_v9 = vsub.f32 %v2006_v52, %v2016_v34 }
 0x96c   :  { %v2020_v14 = vmul.f32 %v2018_v9, %v2018_v9 }
 0x96e   :  { %v2024_v42 = vsel %vm4347_vm15, %v2020_v14, 0.0 }
 0x96f   :  { %2025 = vadd.xlane.f32.xlu2 %v2024_v42 }
 0x9da   :  { %v2023_v4 = vpop.xlane.xlu1 %2022 }
 0x9db   :  { %v2027_v23 = vmul.f32 %v2023_v4, %v4100_v7 }
 0x9dd   :  { %v2029_v39 = vadd.f32 1e-05, %v2027_v23 }
 0x9df   :  { %2438 = vrsqrt.f32 %v2029_v39  ;;  %vm2037_vm7 = vweird.f32 %v2029_v39 }
 0x9e2   :  { %v2026_v24 = vpop.xlane.xlu2 %2025 }
 0x9e3   :  { %v2028_v2 = vmul.f32 %v2026_v24, %v4100_v7  ;;  %v2411_v7 = vld [vmem:[%s4180_s15] ss:$0 sm:$0xff] }
 0x9e5   :  { %v2439_v61 = vpop.eup %2438  ;;  %v2030_v29 = vadd.f32 1e-05, %v2028_v2 }
 0x9e6   :  { %v2032_v45 = vmul.f32 %v2439_v61, %v2029_v39  ;;  %vm2038_vm1 = vweird.f32 %v2439_v61 }
 0x9e7   :  { %2440 = vrsqrt.f32 %v2030_v29  ;;  %vm2039_vm0 = vmor %vm2037_vm7, %vm2038_vm1  ;;  %vm2047_vm8 = vweird.f32 %v2030_v29 }
 0x9e8   :  { %v2033_v50 = vmul.f32 %v2439_v61, %v2032_v45 }
 0x9ea   :  { %v2034_v32 = vmul.f32 0.5, %v2033_v50 }
 0x9ec   :  { %v2035_v54 = vsub.f32 1.5, %v2034_v32 }
 0x9ed   :  { %v2441_v25 = vpop.eup %2440 }
 0x9ee   :  { %v2036_v31 = vmul.f32 %v2439_v61, %v2035_v54  ;;  %v2042_v10 = vmul.f32 %v2441_v25, %v2030_v29  ;;  %vm2048_vm5 = vweird.f32 %v2441_v25 }
 0x9ef   :  { %vm2049_vm6 = vmor %vm2047_vm8, %vm2048_vm5 }
 0x9f0   :  { %v2040_v11 = vsel %vm2039_vm0, %v2439_v61, %v2036_v31  ;;  %v2043_v1 = vmul.f32 %v2441_v25, %v2042_v10 }
 0x9f1   :  { %v2051_v5 = vmul.f32 %v2040_v11, %v2017_v57 }
 0x9f2   :  { %v2044_v59 = vmul.f32 0.5, %v2043_v1 }
 0x9f3   :  { %v2056_v30 = vmul.f32 %v2410_v62, %v2051_v5 }
 0x9f4   :  { %v2045_v37 = vsub.f32 1.5, %v2044_v59 }
 0x9f5   :  { %v2061_v41 = vadd.f32 %v2411_v7, %v2056_v30 }
 0x9f6   :  { %v2046_v3 = vmul.f32 %v2441_v25, %v2045_v37 }
 0x9f7   :  { %2063 = vst.msk [vmem:[#allocation8] sm:$0xff] %vm4348_vm4, %v2061_v41 }
 0x9f8   :  { %v2050_v44 = vsel %vm2049_vm6, %v2441_v25, %v2046_v3 }
 0x9f9   :  { %v2052_v28 = vmul.f32 %v2050_v44, %v2018_v9 }
 0x9fb   :  { %v2057_v16 = vmul.f32 %v2410_v62, %v2052_v28 }
 0x9fd   :  { %v2062_v58 = vadd.f32 %v2411_v7, %v2057_v16 }
 0x9ff   :  { %2064 = vst.msk [vmem:[#allocation8 + $0x8] sm:$0xff] %vm4349_vm9, %v2062_v58 }
 0xa00   :  { %2077 = dma.vmem_to_hbm [thread:$0]  %s2070_s30, 256, %s2072_s18, [#allocation4], %s2651_s28, %s2651_s28, %s2652_s2  }
 0xa01   :  { %2569 = dma.done.wait [#allocation4], 256  }
 0xa02   :  { %2570 = vsyncadd [#allocation4], 4294967040 }
 0xa03   :  { %2571 = dma.done.wait [#allocation10], 512  }
 0xa04   :  { %2572 = vsyncadd [#allocation10], 4294966784 }
 0xa05   :  { %2099 = vsyncpa [#allocation3], 1 }
 0xa06   :  { %2100 = vsyncpa [#allocation6], 1 }
 0xa07   :  { %2101 = vsyncpa [#allocation4], 1 }
 0xa08   :  { %2102 = vsyncpa [#allocation10], 1 }

</bundles_post_ra>
